<compile_context>
chip_gen: v5e
topology: v5e:2x2
jax: 0.10.0
libtpu: 0.0.40
codegen_flags: <defaults>
</compile_context>

<pallas_src>
import functools

import jax
import jax.numpy as jnp
import numpy as np
from jax.experimental import pallas as pl
from jax.experimental.pallas import tpu as pltpu

EPS = 1e-5
MXU_DTYPE = jnp.bfloat16   # MXU operand dtype (f32 accumulation everywhere)


# ----------------------------------------------------------------------------
# Fully fused network kernel: conv stack + GAP + Linear for one batch tile.
#
# refs = (col0,                    # (bt, H0*W0, K0)  layer-0 im2col, bf16
#         w_0 .. w_{D-1},          # (K0, C) and (9C, C) folded-K weights, bf16
#         g_0 .. g_{D-1},          # (1, C)  instance-norm gamma, f32
#         b_0 .. b_{D-1},          # (1, C)  instance-norm beta,  f32
#         fc_w, fc_b,              # (C, ncls), (1, ncls) f32
#         out,                     # (bt, 1, ncls) f32
#         pad_1 .. pad_{D-1})      # bf16 padded-activation VMEM scratch
# ----------------------------------------------------------------------------
def _fused_kernel(*refs, depth, k0, width, ncls, spatial, use_norm, act, pooling):
    n_in = 1 + 3 * depth + 2
    col0_ref = refs[0]
    w_refs = refs[1:1 + depth]
    g_refs = refs[1 + depth:1 + 2 * depth]
    b_refs = refs[1 + 2 * depth:1 + 3 * depth]
    fcw_ref = refs[1 + 3 * depth]
    fcb_ref = refs[2 + 3 * depth]
    out_ref = refs[n_in]
    pad_refs = refs[n_in + 1:]

    bt = col0_ref.shape[0]
    C = width

    def norm_act(y, hw, g_ref, b_ref):
        # y: (bt, hw, C) f32.  Two-pass instance norm (per sample, per channel).
        if use_norm:
            inv = 1.0 / float(hw)
            mean = jnp.sum(y, axis=1, keepdims=True) * inv
            d = y - mean
            var = jnp.sum(d * d, axis=1, keepdims=True) * inv
            y = d * jax.lax.rsqrt(var + EPS)
            y = y * g_ref[...] + b_ref[...]
        if act == "relu":
            y = jnp.maximum(y, 0.0)
        elif act == "leakyrelu":
            y = jnp.where(y >= 0.0, y, 0.01 * y)
        elif act == "sigmoid":
            y = jax.nn.sigmoid(y)
        return y

    def pool2x2(y, h, w):
        # y: (bt, h, w, C) f32 -> (bt, h/2, w/2, C); C stays on the lane dim.
        if pooling not in ("avgpooling", "maxpooling"):
            return y, h, w
        h2, w2 = h // 2, w // 2
        # H direction: split an OUTER dim (free, no re-tiling) and combine slabs.
        yh = y.reshape(bt, h2, 2, w, C)
        a = yh[:, :, 0:1, :, :].reshape(bt, h2, w, C)
        b = yh[:, :, 1:2, :, :].reshape(bt, h2, w, C)
        z = (a + b) if pooling == "avgpooling" else jnp.maximum(a, b)
        # W direction: adjacent columns are adjacent sublanes.
        zw = z.reshape(bt * h2 * w2, 2, C)
        if pooling == "avgpooling":
            z = (zw[:, 0, :] + zw[:, 1, :]) * 0.25
        else:
            z = jnp.maximum(zw[:, 0, :], zw[:, 1, :])
        return z.reshape(bt, h2, w2, C), h2, w2

    # ---- layer 0: im2col built in the XLA wrapper (Cin is lane-sparse there);
    #      here it is one bf16 MXU matmul with f32 accumulation.
    h, w = spatial[0]
    hw = h * w
    x0 = col0_ref[...].reshape(bt * hw, k0)                        # bf16
    acc = jnp.dot(x0, w_refs[0][...], preferred_element_type=jnp.float32)
    y = norm_act(acc.reshape(bt, hw, C), hw, g_refs[0], b_refs[0])
    y, h, w = pool2x2(y.reshape(bt, h, w, C), h, w)

    # ---- layers 1..D-1: activation stays in VMEM.  The padded bf16 input
    #      lives in a scratch ref; the conv is 9 accumulating matmuls on
    #      shifted bf16 views (no col materialisation, no f32 casts).
    for d in range(1, depth):
        pad_ref = pad_refs[d - 1]
        pad_ref[...] = jnp.zeros(pad_ref.shape, pad_ref.dtype)     # zero halo
        pad_ref[:, 1:h + 1, 1:w + 1, :] = y.astype(pad_ref.dtype)
        ho, wo = spatial[d]
        m = bt * ho * wo
        acc = jnp.zeros((m, C), jnp.float32)
        wref = w_refs[d]
        for t in range(9):
            ky, kx = t // 3, t % 3
            xs = pad_ref[:, ky:ky + ho, kx:kx + wo, :].reshape(m, C)
            acc = acc + jnp.dot(xs, wref[t * C:(t + 1) * C, :],
                                preferred_element_type=jnp.float32)
        y = norm_act(acc.reshape(bt, ho * wo, C), ho * wo, g_refs[d], b_refs[d])
        y, h, w = pool2x2(y.reshape(bt, ho, wo, C), ho, wo)

    # ---- global-average-pool + linear classifier, fused (no HBM round trip).
    feat = jnp.mean(y.reshape(bt, h * w, C), axis=1)               # (bt, C) f32
    logits = jnp.dot(feat, fcw_ref[...],
                     preferred_element_type=jnp.float32) + fcb_ref[...]
    out_ref[...] = logits.reshape(bt, 1, ncls)


# ----------------------------------------------------------------------------
# Wrapper: layer-0 im2col, weight layout, tiling, and the pallas_call.
# ----------------------------------------------------------------------------
def _to_col_weight(w_oihw):
    cout, cin, kh, kw = w_oihw.shape
    # (Cout, Cin, kh, kw) -> (kh, kw, Cin, Cout) -> (kh*kw*Cin, Cout)
    return jnp.transpose(w_oihw, (2, 3, 1, 0)).reshape(kh * kw * cin, cout)


def _round_up(x, m):
    return ((x + m - 1) // m) * m


def _pick_batch_tile(n, per_sample_bytes, fixed_bytes, budget_bytes):
    # Largest divisor of n that fits the VMEM budget; capped at n//2 so the
    # grid has >= 2 steps (keeps both TensorCores busy on v7x).
    cap = max(1, n // 2) if n >= 2 else 1
    best = 1
    for bt in range(1, cap + 1):
        if n % bt == 0 and fixed_bytes + bt * per_sample_bytes <= budget_bytes:
            best = bt
    return best


def convnet_gap_forward(x_nchw, params, *, cfg):
    if cfg["net_norm"] not in ("instancenorm", "none"):
        # TODO(synk): batchnorm / layernorm / groupnorm branches not implemented.
        raise NotImplementedError(cfg["net_norm"])
    use_norm = cfg["net_norm"] == "instancenorm"
    act = cfg["net_act"]
    pooling = cfg["net_pooling"]
    depth = cfg["net_depth"]
    C = cfg["net_width"]
    ncls = cfg["num_classes"]

    x = jnp.transpose(x_nchw, (0, 2, 3, 1)).astype(jnp.float32)    # NCHW -> NHWC
    n, hh, ww, cin = x.shape

    # ---- layer-0 im2col in XLA (Cin=3 is lane-sparse; keep it out of the kernel)
    pad0 = 3 if cfg["channel"] == 1 else 1
    h0, w0 = hh + 2 * pad0 - 2, ww + 2 * pad0 - 2
    xp = jnp.pad(x, ((0, 0), (pad0, pad0), (pad0, pad0), (0, 0)))
    taps = [xp[:, ky:ky + h0, kx:kx + w0, :] for ky in range(3) for kx in range(3)]
    col0 = jnp.concatenate(taps, axis=-1)                          # (N,H0,W0,9*Cin)
    k0 = _round_up(9 * cin, 8)
    col0 = jnp.pad(col0, ((0, 0), (0, 0), (0, 0), (0, k0 - 9 * cin)))
    col0 = col0.reshape(n, h0 * w0, k0).astype(MXU_DTYPE)

    # ---- weights (taps folded into K), norm affine, classifier
    conv_ws, gammas, betas = [], [], []
    for d, lp in enumerate(params["layers"]):
        wcol = _to_col_weight(lp["w"])
        if d == 0:
            wcol = jnp.pad(wcol, ((0, k0 - 9 * cin), (0, 0)))
        conv_ws.append(wcol.astype(MXU_DTYPE))
        g = lp.get("g", jnp.ones((C,), jnp.float32))
        b = lp.get("b", jnp.zeros((C,), jnp.float32))
        gammas.append(g.reshape(1, C).astype(jnp.float32))
        betas.append(b.reshape(1, C).astype(jnp.float32))
    fc_w = jnp.transpose(params["fc_w"]).astype(jnp.float32)       # (C, ncls)
    fc_b = params["fc_b"].reshape(1, ncls).astype(jnp.float32)

    # ---- per-layer conv-output spatial sizes (static)
    do_pool = pooling in ("avgpooling", "maxpooling")
    spatial = []
    h, w = h0, w0
    for d in range(depth):
        spatial.append((h, w))
        if do_pool:
            assert h % 2 == 0 and w % 2 == 0, "2x2 pooling needs even spatial dims"
            h, w = h // 2, w // 2

    # ---- batch tile from a VMEM budget; explicit vmem_limit (v7x-safe cap)
    per_sample = 2 * (h0 * w0 * k0) * 2                # col0, double-buffered bf16
    per_sample += 4 * h0 * w0 * C * 4                  # f32 intermediates, layer 0
    for d in range(1, depth):
        hp, wp = spatial[d][0] + 2, spatial[d][1] + 2
        per_sample += hp * wp * C * 2                  # padded bf16 scratch
        per_sample += 4 * spatial[d][0] * spatial[d][1] * C * 4
    fixed = 2 * (k0 * C + (depth - 1) * 9 * C * C) * 2 + 2 * C * ncls * 4
    bt = _pick_batch_tile(n, per_sample, fixed, budget_bytes=40 << 20)
    vmem_limit = int(min(max(2 * (fixed + bt * per_sample), 32 << 20), 48 << 20))

    in_specs = [pl.BlockSpec((bt, h0 * w0, k0), lambda i: (i, 0, 0))]
    in_specs += [pl.BlockSpec(wc.shape, lambda i: (0, 0)) for wc in conv_ws]
    in_specs += [pl.BlockSpec((1, C), lambda i: (0, 0))] * (2 * depth)
    in_specs += [pl.BlockSpec((C, ncls), lambda i: (0, 0)),
                 pl.BlockSpec((1, ncls), lambda i: (0, 0))]
    out_specs = pl.BlockSpec((bt, 1, ncls), lambda i: (i, 0, 0))
    scratch_shapes = [pltpu.VMEM((bt, spatial[d][0] + 2, spatial[d][1] + 2, C),
                                 MXU_DTYPE) for d in range(1, depth)]

    kernel = functools.partial(
        _fused_kernel, depth=depth, k0=k0, width=C, ncls=ncls,
        spatial=tuple(spatial), use_norm=use_norm, act=act, pooling=pooling)

    out3 = pl.pallas_call(
        kernel,
        out_shape=jax.ShapeDtypeStruct((n, 1, ncls), jnp.float32),
        grid=(n // bt,),
        in_specs=in_specs,
        out_specs=out_specs,
        scratch_shapes=scratch_shapes,
        compiler_params=pltpu.CompilerParams(
            dimension_semantics=("parallel",),
            vmem_limit_bytes=vmem_limit),
    )(col0, *conv_ws, *gammas, *betas, fc_w, fc_b)
    return out3.reshape(n, ncls)


# ----------------------------------------------------------------------------
# Pure-JAX f32 reference (matches PyTorch semantics) for verification.
# ----------------------------------------------------------------------------
def convnet_gap_ref(x_nchw, params, cfg):
    out = x_nchw.astype(jnp.float32)
    for d, lp in enumerate(params["layers"]):
        pad = 3 if cfg["channel"] == 1 and d == 0 else 1
        out = jax.lax.conv_general_dilated(
            out, lp["w"], (1, 1), [(pad, pad), (pad, pad)],
            dimension_numbers=("NCHW", "OIHW", "NCHW"),
            precision=jax.lax.Precision.HIGHEST)
        if cfg["net_norm"] == "instancenorm":
            mean = out.mean(axis=(2, 3), keepdims=True)
            var = ((out - mean) ** 2).mean(axis=(2, 3), keepdims=True)
            out = (out - mean) / jnp.sqrt(var + EPS)
            out = out * lp["g"][None, :, None, None] + lp["b"][None, :, None, None]
        if cfg["net_act"] == "relu":
            out = jax.nn.relu(out)
        elif cfg["net_act"] == "leakyrelu":
            out = jnp.where(out >= 0, out, 0.01 * out)
        elif cfg["net_act"] == "sigmoid":
            out = jax.nn.sigmoid(out)
        if cfg["net_pooling"] == "avgpooling":
            n, c, h, w = out.shape
            out = out.reshape(n, c, h // 2, 2, w // 2, 2).mean(axis=(3, 5))
        elif cfg["net_pooling"] == "maxpooling":
            n, c, h, w = out.shape
            out = out.reshape(n, c, h // 2, 2, w // 2, 2).max(axis=(3, 5))
    feat = out.mean(axis=(2, 3))                                    # GAP -> (N, C)
    return jnp.dot(feat, params["fc_w"].T,
                   precision=jax.lax.Precision.HIGHEST) + params["fc_b"]


# ----------------------------------------------------------------------------
if __name__ == "__main__":
    cfg = dict(channel=3, num_classes=10, net_width=128, net_depth=2,
               net_act="relu", net_norm="instancenorm",
               net_pooling="avgpooling", im_size=(16, 16))
    N = 2

    key = jax.random.PRNGKey(0)
    keys = iter(jax.random.split(key, 32))
    x = jax.random.normal(next(keys), (N, cfg["channel"], *cfg["im_size"]), jnp.float32)

    layers = []
    in_c = cfg["channel"]
    for d in range(cfg["net_depth"]):
        fan_in = 9 * in_c
        layers.append({
            "w": jax.random.normal(next(keys), (cfg["net_width"], in_c, 3, 3),
                                   jnp.float32) / np.sqrt(fan_in),
            "g": 1.0 + 0.1 * jax.random.normal(next(keys), (cfg["net_width"],), jnp.float32),
            "b": 0.1 * jax.random.normal(next(keys), (cfg["net_width"],), jnp.float32),
        })
        in_c = cfg["net_width"]
    params = {
        "layers": layers,
        "fc_w": jax.random.normal(next(keys), (cfg["num_classes"], cfg["net_width"]),
                                  jnp.float32) / np.sqrt(cfg["net_width"]),
        "fc_b": 0.1 * jax.random.normal(next(keys), (cfg["num_classes"],), jnp.float32),
    }

    fwd = jax.jit(functools.partial(convnet_gap_forward, cfg=cfg))
    out = jax.block_until_ready(fwd(x, params))
    ref = jax.block_until_ready(convnet_gap_ref(x, params, cfg))

    assert out.shape == ref.shape == (N, cfg["num_classes"]), (out.shape, ref.shape)
    # bf16 MXU operands / bf16 in-VMEM inter-layer activations vs. f32-HIGHEST ref.
    np.testing.assert_allclose(np.asarray(out), np.asarray(ref), rtol=5e-2, atol=5e-2)
    print("KERNEL_OK")
</pallas_src>

<mosaic_0001>
module attributes {stable_mosaic.version = 11 : i64} {
  func.func @_fused_kernel(%arg0: i32, %arg1: memref<1x256x32xbf16, #tpu.memory_space<vmem>>, %arg2: memref<32x128xbf16, #tpu.memory_space<vmem>>, %arg3: memref<1152x128xbf16, #tpu.memory_space<vmem>>, %arg4: memref<1x128xf32, #tpu.memory_space<vmem>>, %arg5: memref<1x128xf32, #tpu.memory_space<vmem>>, %arg6: memref<1x128xf32, #tpu.memory_space<vmem>>, %arg7: memref<1x128xf32, #tpu.memory_space<vmem>>, %arg8: memref<128x10xf32, #tpu.memory_space<vmem>>, %arg9: memref<1x10xf32, #tpu.memory_space<vmem>>, %arg10: memref<1x1x10xf32, #tpu.memory_space<vmem>>, %arg11: memref<1x10x10x128xbf16, #tpu.memory_space<vmem>>) attributes {dimension_semantics = [#tpu.dimension_semantics<parallel>], iteration_bounds = array<i64: 2>, scalar_prefetch = 0 : i64, scratch_operands = 1 : i64, tpu.core_type = #tpu.core_type<tc>, window_params = [{transform_indices = @transform_0, window_bounds = array<i64: 1, 256, 32>}, {pipeline_mode = #tpu.pipeline_mode<synchronous>, transform_indices = @transform_1, window_bounds = array<i64: 32, 128>}, {pipeline_mode = #tpu.pipeline_mode<synchronous>, transform_indices = @transform_2, window_bounds = array<i64: 1152, 128>}, {pipeline_mode = #tpu.pipeline_mode<synchronous>, transform_indices = @transform_3, window_bounds = array<i64: 1, 128>}, {pipeline_mode = #tpu.pipeline_mode<synchronous>, transform_indices = @transform_4, window_bounds = array<i64: 1, 128>}, {pipeline_mode = #tpu.pipeline_mode<synchronous>, transform_indices = @transform_5, window_bounds = array<i64: 1, 128>}, {pipeline_mode = #tpu.pipeline_mode<synchronous>, transform_indices = @transform_6, window_bounds = array<i64: 1, 128>}, {pipeline_mode = #tpu.pipeline_mode<synchronous>, transform_indices = @transform_7, window_bounds = array<i64: 128, 10>}, {pipeline_mode = #tpu.pipeline_mode<synchronous>, transform_indices = @transform_8, window_bounds = array<i64: 1, 10>}, {transform_indices = @transform_9, window_bounds = array<i64: 1, 1, 10>}]} {
    %c0 = arith.constant 0 : index
    %c0_0 = arith.constant 0 : index
    %c0_1 = arith.constant 0 : index
    %0 = vector.load %arg1[%c0, %c0_0, %c0_1] : memref<1x256x32xbf16, #tpu.memory_space<vmem>>, vector<1x256x32xbf16>
    %1 = vector.shape_cast %0 : vector<1x256x32xbf16> to vector<256x32xbf16>
    %c0_2 = arith.constant 0 : index
    %c0_3 = arith.constant 0 : index
    %2 = vector.load %arg2[%c0_2, %c0_3] : memref<32x128xbf16, #tpu.memory_space<vmem>>, vector<32x128xbf16>
    %cst = arith.constant dense<0.000000e+00> : vector<256x128xf32>
    %3 = tpu.matmul %1, %2, %cst {dimension_numbers = #tpu.dot_dimension_numbers<[1], [0], [0], [1], [0, 0, 1, 1], [], []>} : vector<256x32xbf16>, vector<32x128xbf16>, vector<256x128xf32> -> vector<256x128xf32>
    %4 = vector.shape_cast %3 : vector<256x128xf32> to vector<1x256x128xf32>
    %cst_4 = arith.constant dense<0.000000e+00> : vector<1x128xf32>
    %5 = vector.multi_reduction <add>, %4, %cst_4 [1] : vector<1x256x128xf32> to vector<1x128xf32>
    %6 = vector.shape_cast %5 : vector<1x128xf32> to vector<1x1x128xf32>
    %cst_5 = arith.constant 3.906250e-03 : f32
    %7 = vector.broadcast %cst_5 : f32 to vector<1x1x128xf32>
    %8 = arith.mulf %6, %7 : vector<1x1x128xf32>
    %9 = vector.broadcast %8 : vector<1x1x128xf32> to vector<1x256x128xf32>
    %10 = arith.subf %4, %9 : vector<1x256x128xf32>
    %11 = arith.mulf %10, %10 : vector<1x256x128xf32>
    %cst_6 = arith.constant dense<0.000000e+00> : vector<1x128xf32>
    %12 = vector.multi_reduction <add>, %11, %cst_6 [1] : vector<1x256x128xf32> to vector<1x128xf32>
    %13 = vector.shape_cast %12 : vector<1x128xf32> to vector<1x1x128xf32>
    %cst_7 = arith.constant 3.906250e-03 : f32
    %14 = vector.broadcast %cst_7 : f32 to vector<1x1x128xf32>
    %15 = arith.mulf %13, %14 : vector<1x1x128xf32>
    %cst_8 = arith.constant 9.99999974E-6 : f32
    %16 = vector.broadcast %cst_8 : f32 to vector<1x1x128xf32>
    %17 = arith.addf %15, %16 : vector<1x1x128xf32>
    %18 = math.rsqrt %17 : vector<1x1x128xf32>
    %19 = vector.broadcast %18 : vector<1x1x128xf32> to vector<1x256x128xf32>
    %20 = arith.mulf %10, %19 : vector<1x256x128xf32>
    %c0_9 = arith.constant 0 : index
    %c0_10 = arith.constant 0 : index
    %21 = vector.load %arg4[%c0_9, %c0_10] : memref<1x128xf32, #tpu.memory_space<vmem>>, vector<1x128xf32>
    %22 = vector.shape_cast %21 : vector<1x128xf32> to vector<1x1x128xf32>
    %23 = vector.broadcast %22 : vector<1x1x128xf32> to vector<1x256x128xf32>
    %24 = arith.mulf %20, %23 : vector<1x256x128xf32>
    %c0_11 = arith.constant 0 : index
    %c0_12 = arith.constant 0 : index
    %25 = vector.load %arg6[%c0_11, %c0_12] : memref<1x128xf32, #tpu.memory_space<vmem>>, vector<1x128xf32>
    %26 = vector.shape_cast %25 : vector<1x128xf32> to vector<1x1x128xf32>
    %27 = vector.broadcast %26 : vector<1x1x128xf32> to vector<1x256x128xf32>
    %28 = arith.addf %24, %27 : vector<1x256x128xf32>
    %cst_13 = arith.constant 0.000000e+00 : f32
    %29 = vector.broadcast %cst_13 : f32 to vector<1x256x128xf32>
    %30 = arith.maximumf %28, %29 : vector<1x256x128xf32>
    %31 = vector.shape_cast %30 : vector<1x256x128xf32> to vector<1x16x16x128xf32>
    %32 = vector.shape_cast %31 : vector<1x16x16x128xf32> to vector<1x8x2x16x128xf32>
    %33 = vector.extract_strided_slice %32 {offsets = [0, 0, 0, 0, 0], sizes = [1, 8, 1, 16, 128], strides = [1, 1, 1, 1, 1]} : vector<1x8x2x16x128xf32> to vector<1x8x1x16x128xf32>
    %34 = vector.shape_cast %33 : vector<1x8x1x16x128xf32> to vector<1x8x16x128xf32>
    %35 = vector.extract_strided_slice %32 {offsets = [0, 0, 1, 0, 0], sizes = [1, 8, 1, 16, 128], strides = [1, 1, 1, 1, 1]} : vector<1x8x2x16x128xf32> to vector<1x8x1x16x128xf32>
    %36 = vector.shape_cast %35 : vector<1x8x1x16x128xf32> to vector<1x8x16x128xf32>
    %37 = arith.addf %34, %36 : vector<1x8x16x128xf32>
    %38 = vector.shape_cast %37 : vector<1x8x16x128xf32> to vector<64x2x128xf32>
    %39 = vector.extract_strided_slice %38 {offsets = [0, 0, 0], sizes = [64, 1, 128], strides = [1, 1, 1]} : vector<64x2x128xf32> to vector<64x1x128xf32>
    %40 = vector.shape_cast %39 : vector<64x1x128xf32> to vector<64x128xf32>
    %41 = vector.extract_strided_slice %38 {offsets = [0, 1, 0], sizes = [64, 1, 128], strides = [1, 1, 1]} : vector<64x2x128xf32> to vector<64x1x128xf32>
    %42 = vector.shape_cast %41 : vector<64x1x128xf32> to vector<64x128xf32>
    %43 = arith.addf %40, %42 : vector<64x128xf32>
    %cst_14 = arith.constant 2.500000e-01 : f32
    %44 = vector.broadcast %cst_14 : f32 to vector<64x128xf32>
    %45 = arith.mulf %43, %44 : vector<64x128xf32>
    %46 = vector.shape_cast %45 : vector<64x128xf32> to vector<1x8x8x128xf32>
    %cst_15 = arith.constant 0.000000e+00 : bf16
    %47 = vector.broadcast %cst_15 : bf16 to vector<1x10x10x128xbf16>
    %c0_16 = arith.constant 0 : index
    %c0_17 = arith.constant 0 : index
    %c0_18 = arith.constant 0 : index
    %c0_19 = arith.constant 0 : index
    %48 = vector.load %arg11[%c0_16, %c0_17, %c0_18, %c0_19] : memref<1x10x10x128xbf16, #tpu.memory_space<vmem>>, vector<1x10x10x128xbf16>
    tpu.vector_store %arg11[%c0_16, %c0_17, %c0_18, %c0_19], %47 {strides = array<i32>} : memref<1x10x10x128xbf16, #tpu.memory_space<vmem>>, vector<1x10x10x128xbf16>,
    %49 = arith.truncf %46 : vector<1x8x8x128xf32> to vector<1x8x8x128xbf16>
    %c0_20 = arith.constant 0 : index
    %c1 = arith.constant 1 : index
    %c1_21 = arith.constant 1 : index
    %c0_22 = arith.constant 0 : index
    %50 = vector.load %arg11[%c0_20, %c1, %c1_21, %c0_22] : memref<1x10x10x128xbf16, #tpu.memory_space<vmem>>, vector<1x8x8x128xbf16>
    tpu.vector_store %arg11[%c0_20, %c1, %c1_21, %c0_22], %49 {strides = array<i32>} : memref<1x10x10x128xbf16, #tpu.memory_space<vmem>>, vector<1x8x8x128xbf16>,
    %cst_23 = arith.constant 0.000000e+00 : f32
    %51 = vector.broadcast %cst_23 : f32 to vector<64x128xf32>
    %c0_24 = arith.constant 0 : index
    %c0_25 = arith.constant 0 : index
    %c0_26 = arith.constant 0 : index
    %c0_27 = arith.constant 0 : index
    %52 = vector.load %arg11[%c0_24, %c0_25, %c0_26, %c0_27] : memref<1x10x10x128xbf16, #tpu.memory_space<vmem>>, vector<1x8x8x128xbf16>
    %53 = vector.shape_cast %52 : vector<1x8x8x128xbf16> to vector<64x128xbf16>
    %c0_28 = arith.constant 0 : index
    %c0_29 = arith.constant 0 : index
    %54 = vector.load %arg3[%c0_28, %c0_29] : memref<1152x128xbf16, #tpu.memory_space<vmem>>, vector<128x128xbf16>
    %cst_30 = arith.constant dense<0.000000e+00> : vector<64x128xf32>
    %55 = tpu.matmul %53, %54, %cst_30 {dimension_numbers = #tpu.dot_dimension_numbers<[1], [0], [0], [1], [0, 0, 1, 1], [], []>} : vector<64x128xbf16>, vector<128x128xbf16>, vector<64x128xf32> -> vector<64x128xf32>
    %56 = arith.addf %51, %55 : vector<64x128xf32>
    %c0_31 = arith.constant 0 : index
    %c0_32 = arith.constant 0 : index
    %c1_33 = arith.constant 1 : index
    %c0_34 = arith.constant 0 : index
    %57 = vector.load %arg11[%c0_31, %c0_32, %c1_33, %c0_34] : memref<1x10x10x128xbf16, #tpu.memory_space<vmem>>, vector<1x8x8x128xbf16>
    %58 = vector.shape_cast %57 : vector<1x8x8x128xbf16> to vector<64x128xbf16>
    %c128 = arith.constant 128 : index
    %c0_35 = arith.constant 0 : index
    %59 = vector.load %arg3[%c128, %c0_35] : memref<1152x128xbf16, #tpu.memory_space<vmem>>, vector<128x128xbf16>
    %cst_36 = arith.constant dense<0.000000e+00> : vector<64x128xf32>
    %60 = tpu.matmul %58, %59, %cst_36 {dimension_numbers = #tpu.dot_dimension_numbers<[1], [0], [0], [1], [0, 0, 1, 1], [], []>} : vector<64x128xbf16>, vector<128x128xbf16>, vector<64x128xf32> -> vector<64x128xf32>
    %61 = arith.addf %56, %60 : vector<64x128xf32>
    %c0_37 = arith.constant 0 : index
    %c0_38 = arith.constant 0 : index
    %c2 = arith.constant 2 : index
    %c0_39 = arith.constant 0 : index
    %62 = vector.load %arg11[%c0_37, %c0_38, %c2, %c0_39] : memref<1x10x10x128xbf16, #tpu.memory_space<vmem>>, vector<1x8x8x128xbf16>
    %63 = vector.shape_cast %62 : vector<1x8x8x128xbf16> to vector<64x128xbf16>
    %c256 = arith.constant 256 : index
    %c0_40 = arith.constant 0 : index
    %64 = vector.load %arg3[%c256, %c0_40] : memref<1152x128xbf16, #tpu.memory_space<vmem>>, vector<128x128xbf16>
    %cst_41 = arith.constant dense<0.000000e+00> : vector<64x128xf32>
    %65 = tpu.matmul %63, %64, %cst_41 {dimension_numbers = #tpu.dot_dimension_numbers<[1], [0], [0], [1], [0, 0, 1, 1], [], []>} : vector<64x128xbf16>, vector<128x128xbf16>, vector<64x128xf32> -> vector<64x128xf32>
    %66 = arith.addf %61, %65 : vector<64x128xf32>
    %c0_42 = arith.constant 0 : index
    %c1_43 = arith.constant 1 : index
    %c0_44 = arith.constant 0 : index
    %c0_45 = arith.constant 0 : index
    %67 = vector.load %arg11[%c0_42, %c1_43, %c0_44, %c0_45] : memref<1x10x10x128xbf16, #tpu.memory_space<vmem>>, vector<1x8x8x128xbf16>
    %68 = vector.shape_cast %67 : vector<1x8x8x128xbf16> to vector<64x128xbf16>
    %c384 = arith.constant 384 : index
    %c0_46 = arith.constant 0 : index
    %69 = vector.load %arg3[%c384, %c0_46] : memref<1152x128xbf16, #tpu.memory_space<vmem>>, vector<128x128xbf16>
    %cst_47 = arith.constant dense<0.000000e+00> : vector<64x128xf32>
    %70 = tpu.matmul %68, %69, %cst_47 {dimension_numbers = #tpu.dot_dimension_numbers<[1], [0], [0], [1], [0, 0, 1, 1], [], []>} : vector<64x128xbf16>, vector<128x128xbf16>, vector<64x128xf32> -> vector<64x128xf32>
    %71 = arith.addf %66, %70 : vector<64x128xf32>
    %c0_48 = arith.constant 0 : index
    %c1_49 = arith.constant 1 : index
    %c1_50 = arith.constant 1 : index
    %c0_51 = arith.constant 0 : index
    %72 = vector.load %arg11[%c0_48, %c1_49, %c1_50, %c0_51] : memref<1x10x10x128xbf16, #tpu.memory_space<vmem>>, vector<1x8x8x128xbf16>
    %73 = vector.shape_cast %72 : vector<1x8x8x128xbf16> to vector<64x128xbf16>
    %c512 = arith.constant 512 : index
    %c0_52 = arith.constant 0 : index
    %74 = vector.load %arg3[%c512, %c0_52] : memref<1152x128xbf16, #tpu.memory_space<vmem>>, vector<128x128xbf16>
    %cst_53 = arith.constant dense<0.000000e+00> : vector<64x128xf32>
    %75 = tpu.matmul %73, %74, %cst_53 {dimension_numbers = #tpu.dot_dimension_numbers<[1], [0], [0], [1], [0, 0, 1, 1], [], []>} : vector<64x128xbf16>, vector<128x128xbf16>, vector<64x128xf32> -> vector<64x128xf32>
    %76 = arith.addf %71, %75 : vector<64x128xf32>
    %c0_54 = arith.constant 0 : index
    %c1_55 = arith.constant 1 : index
    %c2_56 = arith.constant 2 : index
    %c0_57 = arith.constant 0 : index
    %77 = vector.load %arg11[%c0_54, %c1_55, %c2_56, %c0_57] : memref<1x10x10x128xbf16, #tpu.memory_space<vmem>>, vector<1x8x8x128xbf16>
    %78 = vector.shape_cast %77 : vector<1x8x8x128xbf16> to vector<64x128xbf16>
    %c640 = arith.constant 640 : index
    %c0_58 = arith.constant 0 : index
    %79 = vector.load %arg3[%c640, %c0_58] : memref<1152x128xbf16, #tpu.memory_space<vmem>>, vector<128x128xbf16>
    %cst_59 = arith.constant dense<0.000000e+00> : vector<64x128xf32>
    %80 = tpu.matmul %78, %79, %cst_59 {dimension_numbers = #tpu.dot_dimension_numbers<[1], [0], [0], [1], [0, 0, 1, 1], [], []>} : vector<64x128xbf16>, vector<128x128xbf16>, vector<64x128xf32> -> vector<64x128xf32>
    %81 = arith.addf %76, %80 : vector<64x128xf32>
    %c0_60 = arith.constant 0 : index
    %c2_61 = arith.constant 2 : index
    %c0_62 = arith.constant 0 : index
    %c0_63 = arith.constant 0 : index
    %82 = vector.load %arg11[%c0_60, %c2_61, %c0_62, %c0_63] : memref<1x10x10x128xbf16, #tpu.memory_space<vmem>>, vector<1x8x8x128xbf16>
    %83 = vector.shape_cast %82 : vector<1x8x8x128xbf16> to vector<64x128xbf16>
    %c768 = arith.constant 768 : index
    %c0_64 = arith.constant 0 : index
    %84 = vector.load %arg3[%c768, %c0_64] : memref<1152x128xbf16, #tpu.memory_space<vmem>>, vector<128x128xbf16>
    %cst_65 = arith.constant dense<0.000000e+00> : vector<64x128xf32>
    %85 = tpu.matmul %83, %84, %cst_65 {dimension_numbers = #tpu.dot_dimension_numbers<[1], [0], [0], [1], [0, 0, 1, 1], [], []>} : vector<64x128xbf16>, vector<128x128xbf16>, vector<64x128xf32> -> vector<64x128xf32>
    %86 = arith.addf %81, %85 : vector<64x128xf32>
    %c0_66 = arith.constant 0 : index
    %c2_67 = arith.constant 2 : index
    %c1_68 = arith.constant 1 : index
    %c0_69 = arith.constant 0 : index
    %87 = vector.load %arg11[%c0_66, %c2_67, %c1_68, %c0_69] : memref<1x10x10x128xbf16, #tpu.memory_space<vmem>>, vector<1x8x8x128xbf16>
    %88 = vector.shape_cast %87 : vector<1x8x8x128xbf16> to vector<64x128xbf16>
    %c896 = arith.constant 896 : index
    %c0_70 = arith.constant 0 : index
    %89 = vector.load %arg3[%c896, %c0_70] : memref<1152x128xbf16, #tpu.memory_space<vmem>>, vector<128x128xbf16>
    %cst_71 = arith.constant dense<0.000000e+00> : vector<64x128xf32>
    %90 = tpu.matmul %88, %89, %cst_71 {dimension_numbers = #tpu.dot_dimension_numbers<[1], [0], [0], [1], [0, 0, 1, 1], [], []>} : vector<64x128xbf16>, vector<128x128xbf16>, vector<64x128xf32> -> vector<64x128xf32>
    %91 = arith.addf %86, %90 : vector<64x128xf32>
    %c0_72 = arith.constant 0 : index
    %c2_73 = arith.constant 2 : index
    %c2_74 = arith.constant 2 : index
    %c0_75 = arith.constant 0 : index
    %92 = vector.load %arg11[%c0_72, %c2_73, %c2_74, %c0_75] : memref<1x10x10x128xbf16, #tpu.memory_space<vmem>>, vector<1x8x8x128xbf16>
    %93 = vector.shape_cast %92 : vector<1x8x8x128xbf16> to vector<64x128xbf16>
    %c1024 = arith.constant 1024 : index
    %c0_76 = arith.constant 0 : index
    %94 = vector.load %arg3[%c1024, %c0_76] : memref<1152x128xbf16, #tpu.memory_space<vmem>>, vector<128x128xbf16>
    %cst_77 = arith.constant dense<0.000000e+00> : vector<64x128xf32>
    %95 = tpu.matmul %93, %94, %cst_77 {dimension_numbers = #tpu.dot_dimension_numbers<[1], [0], [0], [1], [0, 0, 1, 1], [], []>} : vector<64x128xbf16>, vector<128x128xbf16>, vector<64x128xf32> -> vector<64x128xf32>
    %96 = arith.addf %91, %95 : vector<64x128xf32>
    %97 = vector.shape_cast %96 : vector<64x128xf32> to vector<1x64x128xf32>
    %cst_78 = arith.constant dense<0.000000e+00> : vector<1x128xf32>
    %98 = vector.multi_reduction <add>, %97, %cst_78 [1] : vector<1x64x128xf32> to vector<1x128xf32>
    %99 = vector.shape_cast %98 : vector<1x128xf32> to vector<1x1x128xf32>
    %cst_79 = arith.constant 1.562500e-02 : f32
    %100 = vector.broadcast %cst_79 : f32 to vector<1x1x128xf32>
    %101 = arith.mulf %99, %100 : vector<1x1x128xf32>
    %102 = vector.broadcast %101 : vector<1x1x128xf32> to vector<1x64x128xf32>
    %103 = arith.subf %97, %102 : vector<1x64x128xf32>
    %104 = arith.mulf %103, %103 : vector<1x64x128xf32>
    %cst_80 = arith.constant dense<0.000000e+00> : vector<1x128xf32>
    %105 = vector.multi_reduction <add>, %104, %cst_80 [1] : vector<1x64x128xf32> to vector<1x128xf32>
    %106 = vector.shape_cast %105 : vector<1x128xf32> to vector<1x1x128xf32>
    %cst_81 = arith.constant 1.562500e-02 : f32
    %107 = vector.broadcast %cst_81 : f32 to vector<1x1x128xf32>
    %108 = arith.mulf %106, %107 : vector<1x1x128xf32>
    %cst_82 = arith.constant 9.99999974E-6 : f32
    %109 = vector.broadcast %cst_82 : f32 to vector<1x1x128xf32>
    %110 = arith.addf %108, %109 : vector<1x1x128xf32>
    %111 = math.rsqrt %110 : vector<1x1x128xf32>
    %112 = vector.broadcast %111 : vector<1x1x128xf32> to vector<1x64x128xf32>
    %113 = arith.mulf %103, %112 : vector<1x64x128xf32>
    %c0_83 = arith.constant 0 : index
    %c0_84 = arith.constant 0 : index
    %114 = vector.load %arg5[%c0_83, %c0_84] : memref<1x128xf32, #tpu.memory_space<vmem>>, vector<1x128xf32>
    %115 = vector.shape_cast %114 : vector<1x128xf32> to vector<1x1x128xf32>
    %116 = vector.broadcast %115 : vector<1x1x128xf32> to vector<1x64x128xf32>
    %117 = arith.mulf %113, %116 : vector<1x64x128xf32>
    %c0_85 = arith.constant 0 : index
    %c0_86 = arith.constant 0 : index
    %118 = vector.load %arg7[%c0_85, %c0_86] : memref<1x128xf32, #tpu.memory_space<vmem>>, vector<1x128xf32>
    %119 = vector.shape_cast %118 : vector<1x128xf32> to vector<1x1x128xf32>
    %120 = vector.broadcast %119 : vector<1x1x128xf32> to vector<1x64x128xf32>
    %121 = arith.addf %117, %120 : vector<1x64x128xf32>
    %cst_87 = arith.constant 0.000000e+00 : f32
    %122 = vector.broadcast %cst_87 : f32 to vector<1x64x128xf32>
    %123 = arith.maximumf %121, %122 : vector<1x64x128xf32>
    %124 = vector.shape_cast %123 : vector<1x64x128xf32> to vector<1x8x8x128xf32>
    %125 = vector.shape_cast %124 : vector<1x8x8x128xf32> to vector<1x4x2x8x128xf32>
    %126 = vector.extract_strided_slice %125 {offsets = [0, 0, 0, 0, 0], sizes = [1, 4, 1, 8, 128], strides = [1, 1, 1, 1, 1]} : vector<1x4x2x8x128xf32> to vector<1x4x1x8x128xf32>
    %127 = vector.shape_cast %126 : vector<1x4x1x8x128xf32> to vector<1x4x8x128xf32>
    %128 = vector.extract_strided_slice %125 {offsets = [0, 0, 1, 0, 0], sizes = [1, 4, 1, 8, 128], strides = [1, 1, 1, 1, 1]} : vector<1x4x2x8x128xf32> to vector<1x4x1x8x128xf32>
    %129 = vector.shape_cast %128 : vector<1x4x1x8x128xf32> to vector<1x4x8x128xf32>
    %130 = arith.addf %127, %129 : vector<1x4x8x128xf32>
    %131 = vector.shape_cast %130 : vector<1x4x8x128xf32> to vector<16x2x128xf32>
    %132 = vector.extract_strided_slice %131 {offsets = [0, 0, 0], sizes = [16, 1, 128], strides = [1, 1, 1]} : vector<16x2x128xf32> to vector<16x1x128xf32>
    %133 = vector.shape_cast %132 : vector<16x1x128xf32> to vector<16x128xf32>
    %134 = vector.extract_strided_slice %131 {offsets = [0, 1, 0], sizes = [16, 1, 128], strides = [1, 1, 1]} : vector<16x2x128xf32> to vector<16x1x128xf32>
    %135 = vector.shape_cast %134 : vector<16x1x128xf32> to vector<16x128xf32>
    %136 = arith.addf %133, %135 : vector<16x128xf32>
    %cst_88 = arith.constant 2.500000e-01 : f32
    %137 = vector.broadcast %cst_88 : f32 to vector<16x128xf32>
    %138 = arith.mulf %136, %137 : vector<16x128xf32>
    %139 = vector.shape_cast %138 : vector<16x128xf32> to vector<1x4x4x128xf32>
    %140 = vector.shape_cast %139 : vector<1x4x4x128xf32> to vector<1x16x128xf32>
    %cst_89 = arith.constant dense<0.000000e+00> : vector<1x128xf32>
    %141 = vector.multi_reduction <add>, %140, %cst_89 [1] : vector<1x16x128xf32> to vector<1x128xf32>
    %cst_90 = arith.constant 1.600000e+01 : f32
    %142 = vector.broadcast %cst_90 : f32 to vector<1x128xf32>
    %143 = arith.divf %141, %142 : vector<1x128xf32>
    %c0_91 = arith.constant 0 : index
    %c0_92 = arith.constant 0 : index
    %144 = vector.load %arg8[%c0_91, %c0_92] : memref<128x10xf32, #tpu.memory_space<vmem>>, vector<128x10xf32>
    %cst_93 = arith.constant dense<0.000000e+00> : vector<1x10xf32>
    %145 = tpu.matmul %143, %144, %cst_93 {dimension_numbers = #tpu.dot_dimension_numbers<[1], [0], [0], [1], [0, 0, 1, 1], [], []>} : vector<1x128xf32>, vector<128x10xf32>, vector<1x10xf32> -> vector<1x10xf32>
    %c0_94 = arith.constant 0 : index
    %c0_95 = arith.constant 0 : index
    %146 = vector.load %arg9[%c0_94, %c0_95] : memref<1x10xf32, #tpu.memory_space<vmem>>, vector<1x10xf32>
    %147 = arith.addf %145, %146 : vector<1x10xf32>
    %148 = vector.shape_cast %147 : vector<1x10xf32> to vector<1x1x10xf32>
    %c0_96 = arith.constant 0 : index
    %c0_97 = arith.constant 0 : index
    %c0_98 = arith.constant 0 : index
    %149 = vector.load %arg10[%c0_96, %c0_97, %c0_98] : memref<1x1x10xf32, #tpu.memory_space<vmem>>, vector<1x1x10xf32>
    tpu.vector_store %arg10[%c0_96, %c0_97, %c0_98], %148 {strides = array<i32>} : memref<1x1x10xf32, #tpu.memory_space<vmem>>, vector<1x1x10xf32>,
    return
  }
  func.func @transform_0(%arg0: i32) -> (i32, i32, i32) {
    %c0_i32 = arith.constant 0 : i32
    %c0_i32_0 = arith.constant 0 : i32
    %c0_i32_1 = arith.constant 0 : i32
    return %arg0, %c0_i32, %c0_i32_0 : i32, i32, i32
  }
  func.func @transform_1(%arg0: i32) -> (i32, i32) {
    %c0_i32 = arith.constant 0 : i32
    %c0_i32_0 = arith.constant 0 : i32
    %c0_i32_1 = arith.constant 0 : i32
    return %c0_i32, %c0_i32_0 : i32, i32
  }
  func.func @transform_2(%arg0: i32) -> (i32, i32) {
    %c0_i32 = arith.constant 0 : i32
    %c0_i32_0 = arith.constant 0 : i32
    %c0_i32_1 = arith.constant 0 : i32
    return %c0_i32, %c0_i32_0 : i32, i32
  }
  func.func @transform_3(%arg0: i32) -> (i32, i32) {
    %c0_i32 = arith.constant 0 : i32
    %c0_i32_0 = arith.constant 0 : i32
    %c0_i32_1 = arith.constant 0 : i32
    return %c0_i32, %c0_i32_0 : i32, i32
  }
  func.func @transform_4(%arg0: i32) -> (i32, i32) {
    %c0_i32 = arith.constant 0 : i32
    %c0_i32_0 = arith.constant 0 : i32
    %c0_i32_1 = arith.constant 0 : i32
    return %c0_i32, %c0_i32_0 : i32, i32
  }
  func.func @transform_5(%arg0: i32) -> (i32, i32) {
    %c0_i32 = arith.constant 0 : i32
    %c0_i32_0 = arith.constant 0 : i32
    %c0_i32_1 = arith.constant 0 : i32
    return %c0_i32, %c0_i32_0 : i32, i32
  }
  func.func @transform_6(%arg0: i32) -> (i32, i32) {
    %c0_i32 = arith.constant 0 : i32
    %c0_i32_0 = arith.constant 0 : i32
    %c0_i32_1 = arith.constant 0 : i32
    return %c0_i32, %c0_i32_0 : i32, i32
  }
  func.func @transform_7(%arg0: i32) -> (i32, i32) {
    %c0_i32 = arith.constant 0 : i32
    %c0_i32_0 = arith.constant 0 : i32
    %c0_i32_1 = arith.constant 0 : i32
    return %c0_i32, %c0_i32_0 : i32, i32
  }
  func.func @transform_8(%arg0: i32) -> (i32, i32) {
    %c0_i32 = arith.constant 0 : i32
    %c0_i32_0 = arith.constant 0 : i32
    %c0_i32_1 = arith.constant 0 : i32
    return %c0_i32, %c0_i32_0 : i32, i32
  }
  func.func @transform_9(%arg0: i32) -> (i32, i32, i32) {
    %c0_i32 = arith.constant 0 : i32
    %c0_i32_0 = arith.constant 0 : i32
    %c0_i32_1 = arith.constant 0 : i32
    return %arg0, %c0_i32, %c0_i32_0 : i32, i32, i32
  }
}

</mosaic_0001>

<bundles_post_ra>
// kernel: convnet_gap_forward.1
= control target key start
LH: loop header
LB: loop body
LE: loop exit
PB: predicated region body
PF: predicated region fallthrough
CT: control target
= control target key end

     0   :  { %14 = vsyncpa [#allocation4], 0  ;;  %s6393_s0 = inlined_call_operand.vmem [shape: bf16[2,256,32], index: 0, kind: input, shape index: {}]   ;;  %s6394_s1 = inlined_call_operand.vmem [shape: bf16[32,128], index: 1, kind: input, shape index: {}]   ;;  %s6395_s2 = inlined_call_operand.vmem [shape: bf16[1152,128], index: 2, kind: input, shape index: {}]   ;;  %s6396_s3 = inlined_call_operand.vmem [shape: f32[1,128], index: 3, kind: input, shape index: {}]   ;;  %s6397_s4 = inlined_call_operand.vmem [shape: f32[1,128], index: 4, kind: input, shape index: {}]   ;;  %s6398_s5 = inlined_call_operand.vmem [shape: f32[1,128], index: 5, kind: input, shape index: {}]   ;;  %s6399_s6 = inlined_call_operand.vmem [shape: f32[1,128], index: 6, kind: input, shape index: {}]   ;;  %s6400_s7 = inlined_call_operand.vmem [shape: f32[128,10], index: 7, kind: input, shape index: {}]   ;;  %s6401_s8 = inlined_call_operand.vmem [shape: f32[1,10], index: 8, kind: input, shape index: {}]   ;;  %s6402_s9 = inlined_call_operand.hbm [shape: f32[2,1,10], index: 9, kind: output, shape index: {}]  }
   0x1   :  { %16 = vsyncpa [#allocation4 + $0x1], 0  ;;  %s4563_s30 = smov 0   ;;  %s4565_s10 = smov 0  }
   0x2   :  { %s4567_s11 = smov 0   ;;  %s4569_s12 = smov 0  }
   0x3 LB: > { %s4584_s13 = sadd.s32 4294967295, %s4509_s12   ;;  %s3755_s14 = sadd.s32 4294967294, %s4509_s12   ;;  %s4509_s12 = sphi %s4569_s12, %s6578_s12   ;;  %s4505_s11 = sphi %s4567_s11, %s6577_s11   ;;  %s4501_s10 = sphi %s4565_s10, %s6576_s10   ;;  %s4497_s30 = sphi %s4563_s30, %s6575_s30  }
   0x4   : > { %s4588_s15 = sadd.s32 1, %s4509_s12   ;;  %s223_s16 = sadd.s32 1, %s4505_s11 }
   0x5   : > { %s220_s17 = ssub.s32 %s4509_s12, %s4588_s15  ;;  %p233_p0 = scmp.ne.s32.totalorder %s4505_s11, %s4501_s10 }
   0x6   : > { %p221_p1 = scmp.eq.s32.totalorder %s220_s17, 0  ;;  %p234_p2 = scmp.eq.s32.totalorder %s4584_s13, 1 }
   0x7   : > { %p239_p3 = scmp.ne.s32.totalorder %s4501_s10, %s4497_s30  ;;  %p240_p4 = scmp.eq.s32.totalorder %s3755_s14, 1 }
   0x8   : > { %s4599_s18 = scalar_select %p221_p1, %s4505_s11, %s223_s16  }
   0x9   : > { %p4601_p5 = por %p234_p2, %p233_p0  ;;  %p4605_p6 = por %p240_p4, %p239_p3 }
   0xa   : > { %p3758_p7 = scmp.ge.s32.totalorder %s4509_s12, 1  ;;  %p290_p8 = scmp.lt.s32.totalorder %s4509_s12, 3 }
   0xc   : > { %p291_p9 = pnand %p3758_p7, %p290_p8 }
   0xe   : > { %294 = sbr.rel (%p291_p9) target bundleno = 1257 (0x4e9), region = 56 }
  0x13   : > { %v4309_v0 = vld [vmem:[%s6394_s1 + $0x8] sm:$0xff]  ;;  %p325_p10 = scmp.lt.s32.totalorder %s4584_s13, 1  ;;  %v4308_v1 = vld [vmem:[%s6394_s1] sm:$0xff]  ;;  %vm459_vm0 = vcmask 261120   ;;  %v4511_v10 = vmov 0   ;;  %vm1693_vm4 = vcmask 1040384  }
  0x14   : > { %514 = vmatpush.bf16.msra.mxu0 %v4309_v0  ;;  %4394 = vmatpush.bf16.msra.mxu2 %v4309_v0  ;;  %1334 = vst [vmem:[#allocation2 + $0x8] sm:$0xf] %v4511_v10  ;;  %vm1694_vm5 = vsmask.f32 256  ;;  %vm1546_vm6 = vcmask 1042434   ;;  %vm1549_vm7 = vcmask 1043459  }
  0x15   : > { %s326_s25 = scalar_select %p325_p10, %s4584_s13, 1  ;;  %1335 = vst [vmem:[#allocation2 + $0xc] sm:$0x1] %v4511_v10  ;;  %vm1552_vm8 = vcmask 1044484   ;;  %vm1555_vm9 = vcmask 1045509   ;;  %vm1558_vm10 = vcmask 1046534   ;;  %vm5059_vm14 = vmand %vm1693_vm4, %vm1694_vm5 }
  0x16   : > { %1332 = vst [vmem:[#allocation2] sm:$0xf] %v4511_v10  ;;  %vm1561_vm11 = vcmask 1047559   ;;  %vm1687_vm12 = vcmask 1043456   ;;  %vm1688_vm13 = vsmask.f32 7938 }
  0x17   : > { %s4291_s26 = sshll.u32 %s326_s25, 7  ;;  %1333 = vst [vmem:[#allocation2 + $0x4] sm:$0x1] %v4511_v10  ;;  %vm5104_vm15 = vmand %vm1687_vm12, %vm1688_vm13  ;;  %vm1774_vm4 = vsmask.f32 7440  ;;  %s323_s22 = sand.u32 1, %s4501_s10  }
  0x18   : > { %s4622_s29 = scalar_lea.vmem %s6393_s0, %s4291_s26  ;;  %515 = vmatpush.bf16.msra.mxu0 %v4308_v1  ;;  %4395 = vmatpush.bf16.msra.mxu2 %v4308_v1  ;;  %1336 = vst [vmem:[#allocation2 + $0x10] sm:$0xf] %v4511_v10  ;;  %s3696_s25 = scalar_lea.hbm %s6402_s9, %s4584_s13 }
  0x19   : > { %v4292_v2 = vld [vmem:[%s4622_s29] sm:$0xff]  ;;  %v4293_v3 = vld [vmem:[%s4622_s29 + $0x8] sm:$0xff]  ;;  %v4294_v4 = vld [vmem:[%s4622_s29 + $0x10] sm:$0xff]  ;;  %1337 = vst [vmem:[#allocation2 + $0x14] sm:$0x1] %v4511_v10  ;;  %s324_s28 = scalar_lea.vmem [#allocation3], %s323_s22 }
  0x1a   : > { %v4295_v5 = vld [vmem:[%s4622_s29 + $0x18] sm:$0xff]  ;;  %v4296_v6 = vld [vmem:[%s4622_s29 + $0x20] sm:$0xff]  ;;  %v4297_v7 = vld [vmem:[%s4622_s29 + $0x28] sm:$0xff]  ;;  %1338 = vst [vmem:[#allocation2 + $0x18] sm:$0xf] %v4511_v10  ;;  %s3700_s14 = sshll.u32 %s3696_s25, 4  ;;  %s3701_s14 = int_to_ptr.hbm [resolvable:$true] %s3700_s14 }
  0x1b   : > { %3833 = vmatmul.msk.bf16.vlgmr.msra.gmra.mxu0 %vm459_vm0, %v4292_v2  ;;  %v4298_v8 = vld [vmem:[%s4622_s29 + $0x30] sm:$0xff]  ;;  %v4299_v9 = vld [vmem:[%s4622_s29 + $0x38] sm:$0xff]  ;;  %v4300_v11 = vld [vmem:[%s4622_s29 + $0x40] sm:$0xff]  ;;  %1339 = vst [vmem:[#allocation2 + $0x1c] sm:$0x1] %v4511_v10  ;;  %s3688_s16 = scalar_lea.sflag [#allocation4], %s323_s22 }
  0x1c   : > { %1340 = vst [vmem:[#allocation2 + $0x20] sm:$0xf] %v4511_v10  ;;  %v4301_v14 = vld [vmem:[%s4622_s29 + $0x48] sm:$0xff]  ;;  %v4306_v17 = vld [vmem:[%s4622_s29 + $0x70] sm:$0xff]  ;;  %v4307_v21 = vld [vmem:[%s4622_s29 + $0x78] sm:$0xff]  ;;  %s4461_s17 = sshra.s32 %s3701_s14, 4  ;;  %s4462_s17 = int_to_ptr.hbm [resolvable:$true] %s4461_s17 }
  0x1d   : > { %1341 = vst [vmem:[#allocation2 + $0x24] sm:$0x1] %v4511_v10  ;;  %3847 = vmatmul.msk.bf16.vlgmr.msra.gmra.mxu2 %vm459_vm0, %v4306_v17  ;;  %v4302_v18 = vld [vmem:[%s4622_s29 + $0x50] sm:$0xff]  ;;  %v4303_v22 = vld [vmem:[%s4622_s29 + $0x58] sm:$0xff]  ;;  %v4304_v25 = vld [vmem:[%s4622_s29 + $0x60] sm:$0xff]  ;;  %s4463_s21 = scalar_lea.hbm %s4462_s17, 1  ;;  %p4468_p0 = scmp.lt.s32.totalorder %s4462_s17, %s6402_s9 }
  0x1e   : > { %1342 = vst [vmem:[#allocation2 + $0x28] sm:$0xf] %v4511_v10  ;;  %v4305_v28 = vld [vmem:[%s4622_s29 + $0x68] sm:$0xff]  ;;  %s3698_s29 = sshll.u32 %s324_s28, 4  ;;  %p4464_p11 = scmp.ne.s32.totalorder %s4462_s17, %s4463_s21  ;;  %s3699_s29 = int_to_ptr.vmem [resolvable:$true] %s3698_s29 }
  0x1f   : > { %1343 = vst [vmem:[#allocation2 + $0x2c] sm:$0x1] %v4511_v10  ;;  %s4467_s24 = scalar_lea.hbm %s6402_s9, 2 }
  0x20   : > { %1344 = vst [vmem:[#allocation2 + $0x30] sm:$0xf] %v4511_v10  ;;  %p4465_p12 = pnand %p4464_p11, %p4601_p5  ;;  %p4469_p1 = scmp.lt.s32.totalorder %s4467_s24, %s4463_s21 }
  0x21   : > { %1345 = vst [vmem:[#allocation2 + $0x34] sm:$0x1] %v4511_v10 }
  0x22   : > { %1346 = vst [vmem:[#allocation2 + $0x38] sm:$0xf] %v4511_v10  ;;  %p4466_p13 = pneg %p4465_p12  ;;  %p4470_p2 = por %p4469_p1, %p4468_p0 }
  0x23   : > { %1347 = vst [vmem:[#allocation2 + $0x3c] sm:$0x1] %v4511_v10 }
  0x24   : > { %1348 = vst [vmem:[#allocation2 + $0x40] sm:$0xf] %v4511_v10  ;;  %p4471_p3 = pnand %p4470_p2, %p4466_p13 }
  0x25   : > { %1349 = vst [vmem:[#allocation2 + $0x44] sm:$0x1] %v4511_v10 }
  0x26   : > { %1350 = vst [vmem:[#allocation2 + $0x48] sm:$0xf] %v4511_v10 }
  0x27   : > { %1351 = vst [vmem:[#allocation2 + $0x4c] sm:$0x1] %v4511_v10 }
  0x2b   : > { %3834 = vmatmul.msk.bf16.gmra.mxu0 %vm459_vm0, %v4293_v3 }
  0x2d   : > { %3848 = vmatmul.msk.bf16.gmra.mxu2 %vm459_vm0, %v4307_v21 }
  0x3b   : > { %3835 = vmatmul.msk.bf16.gmra.mxu0 %vm459_vm0, %v4294_v4 }
  0x4b   : > { %3836 = vmatmul.msk.bf16.gmra.mxu0 %vm459_vm0, %v4295_v5 }
  0x5b   : > { %3837 = vmatmul.msk.bf16.gmra.mxu0 %vm459_vm0, %v4296_v6 }
  0x6b   : > { %3838 = vmatmul.msk.bf16.gmra.mxu0 %vm459_vm0, %v4297_v7 }
  0x7b   : > { %3839 = vmatmul.msk.bf16.gmra.mxu0 %vm459_vm0, %v4298_v8 }
  0x8b   : > { %3840 = vmatmul.msk.bf16.gmra.mxu0 %vm459_vm0, %v4299_v9 }
  0x98   : > { %v4641_v12 = vpop.f32.mrf.mxu0 }
  0x9b   : > { %3841 = vmatmul.msk.bf16.gmra.mxu0 %vm459_vm0, %v4300_v11 }
  0xa0   : > { %v4644_v13 = vpop.f32.mrf.mxu0  ;;  %v4722_v59 = vpop.f32.mrf.mxu2 }
  0xa1   : > { %v597_v40 = vadd.f32 %v4644_v13, %v4641_v12 }
  0xa8   : > { %v4647_v15 = vpop.f32.mrf.mxu0  ;;  %v4731_v2 = vpop.f32.mrf.mxu2 }
  0xa9   : > { %v598_v41 = vadd.f32 %v597_v40, %v4647_v15 }
  0xab   : > { %3842 = vmatmul.msk.bf16.gmra.mxu0 %vm459_vm0, %v4301_v14 }
  0xb0   : > { %v4650_v16 = vpop.f32.mrf.mxu0  ;;  %v4740_v9 = vpop.f32.mrf.mxu2 }
  0xb1   : > { %v599_v43 = vadd.f32 %v598_v41, %v4650_v16 }
  0xb8   : > { %v4655_v19 = vpop.f32.mrf.mxu0 }
  0xb9   : > { %v600_v44 = vadd.f32 %v599_v43, %v4655_v19 }
  0xbb   : > { %3843 = vmatmul.msk.bf16.gmra.mxu0 %vm459_vm0, %v4302_v18 }
  0xc0   : > { %v4658_v20 = vpop.f32.mrf.mxu0 }
  0xc1   : > { %v601_v45 = vadd.f32 %v600_v44, %v4658_v20 }
  0xc8   : > { %v4663_v23 = vpop.f32.mrf.mxu0 }
  0xc9   : > { %v602_v46 = vadd.f32 %v601_v45, %v4663_v23 }
  0xcb   : > { %3844 = vmatmul.msk.bf16.gmra.mxu0 %vm459_vm0, %v4303_v22  ;;  %v4749_v22 = vpop.f32.mrf.mxu2 }
  0xd0   : > { %v4666_v24 = vpop.f32.mrf.mxu0 }
  0xd1   : > { %v603_v48 = vadd.f32 %v602_v46, %v4666_v24 }
  0xd8   : > { %v4669_v26 = vpop.f32.mrf.mxu0 }
  0xd9   : > { %v604_v49 = vadd.f32 %v603_v48, %v4669_v26 }
  0xdb   : > { %3845 = vmatmul.msk.bf16.gmra.mxu0 %vm459_vm0, %v4304_v25 }
  0xe0   : > { %v4672_v27 = vpop.f32.mrf.mxu0 }
  0xe1   : > { %v605_v50 = vadd.f32 %v604_v49, %v4672_v27 }
  0xe8   : > { %v4675_v29 = vpop.f32.mrf.mxu0 }
  0xe9   : > { %v606_v51 = vadd.f32 %v605_v50, %v4675_v29 }
  0xeb   : > { %3846 = vmatmul.msk.bf16.gmra.mxu0 %vm459_vm0, %v4305_v28  ;;  %vm2122_vm0 = vcmask 1042432  }
  0xf0   : > { %v4678_v30 = vpop.f32.mrf.mxu0 }
  0xf1   : > { %v607_v53 = vadd.f32 %v606_v51, %v4678_v30 }
  0xf8   : > { %v4680_v31 = vpop.f32.mrf.mxu0 }
  0xf9   : > { %v608_v54 = vadd.f32 %v607_v53, %v4680_v31 }
 0x100   : > { %v4682_v32 = vpop.f32.mrf.mxu0 }
 0x101   : > { %v609_v55 = vadd.f32 %v608_v54, %v4682_v32 }
 0x108   : > { %v4684_v33 = vpop.f32.mrf.mxu0 }
 0x109   : > { %v610_v56 = vadd.f32 %v609_v55, %v4684_v33 }
 0x110   : > { %v4686_v34 = vpop.f32.mrf.mxu0 }
 0x111   : > { %v611_v58 = vadd.f32 %v610_v56, %v4686_v34 }
 0x118   : > { %v4688_v35 = vpop.f32.mrf.mxu0 }
 0x119   : > { %v612_v60 = vadd.f32 %v611_v58, %v4688_v35 }
 0x120   : > { %v4690_v36 = vpop.f32.mrf.mxu0 }
 0x121   : > { %v613_v61 = vadd.f32 %v612_v60, %v4690_v36 }
 0x128   : > { %v4692_v37 = vpop.f32.mrf.mxu0 }
 0x129   : > { %v614_v62 = vadd.f32 %v613_v61, %v4692_v37 }
 0x130   : > { %v4694_v38 = vpop.f32.mrf.mxu0 }
 0x131   : > { %v615_v0 = vadd.f32 %v614_v62, %v4694_v38 }
 0x138   : > { %v4696_v39 = vpop.f32.mrf.mxu0 }
 0x139   : > { %v616_v1 = vadd.f32 %v615_v0, %v4696_v39 }
 0x140   : > { %v4701_v42 = vpop.f32.mrf.mxu0 }
 0x141   : > { %v617_v3 = vadd.f32 %v616_v1, %v4701_v42 }
 0x148   : > { %v4707_v47 = vpop.f32.mrf.mxu0 }
 0x149   : > { %v618_v4 = vadd.f32 %v617_v3, %v4707_v47 }
 0x150   : > { %v4713_v52 = vpop.f32.mrf.mxu0 }
 0x151   : > { %v619_v6 = vadd.f32 %v618_v4, %v4713_v52 }
 0x158   : > { %v4719_v57 = vpop.f32.mrf.mxu0 }
 0x159   : > { %v620_v7 = vadd.f32 %v619_v6, %v4719_v57 }
 0x160   : > { %v4727_v63 = vpop.f32.mrf.mxu0 }
 0x161   : > { %v621_v8 = vadd.f32 %v620_v7, %v4727_v63 }
 0x168   : > { %v4735_v5 = vpop.f32.mrf.mxu0 }
 0x169   : > { %v622_v10 = vadd.f32 %v621_v8, %v4735_v5 }
 0x170   : > { %v4743_v11 = vpop.f32.mrf.mxu0 }
 0x171   : > { %v623_v14 = vadd.f32 %v622_v10, %v4743_v11 }
 0x173   : > { %v624_v17 = vadd.f32 %v623_v14, %v4722_v59 }
 0x175   : > { %v625_v18 = vadd.f32 %v624_v17, %v4731_v2 }
 0x177   : > { %v626_v21 = vadd.f32 %v625_v18, %v4740_v9 }
 0x179   : > { %v627_v25 = vadd.f32 %v626_v21, %v4749_v22 }
 0x17b   : > { %v628_v28 = vrot.slane %v627_v25, 4 }
 0x17d   : > { %v629_v40 = vadd.f32 %v628_v28, %v627_v25 }
 0x17f   : > { %v630_v41 = vrot.slane %v629_v40, 2 }
 0x181   : > { %v631_v43 = vadd.f32 %v630_v41, %v629_v40 }
 0x183   : > { %v632_v44 = vrot.slane %v631_v43, 1 }
 0x185   : > { %v633_v45 = vadd.f32 %v632_v44, %v631_v43 }
 0x187   : > { %v4752_v46 = vmul.f32 0.00390625, %v633_v45 }
 0x189   : > { %v4756_v48 = vsub.f32 %v4641_v12, %v4752_v46  ;;  %v4760_v49 = vsub.f32 %v4644_v13, %v4752_v46  ;;  %v4764_v50 = vsub.f32 %v4647_v15, %v4752_v46  ;;  %v4772_v54 = vsub.f32 %v4650_v16, %v4752_v46 }
 0x18a   : > { %v4776_v12 = vsub.f32 %v4655_v19, %v4752_v46  ;;  %v4782_v15 = vsub.f32 %v4658_v20, %v4752_v46  ;;  %v4788_v16 = vsub.f32 %v4663_v23, %v4752_v46  ;;  %v4794_v61 = vsub.f32 %v4666_v24, %v4752_v46 }
 0x18b   : > { %v667_v51 = vmul.f32 %v4756_v48, %v4756_v48  ;;  %v668_v53 = vmul.f32 %v4760_v49, %v4760_v49  ;;  %v669_v13 = vmul.f32 %v4764_v50, %v4764_v50  ;;  %v670_v56 = vmul.f32 %v4772_v54, %v4772_v54 }
 0x18c   : > { %v671_v19 = vmul.f32 %v4776_v12, %v4776_v12  ;;  %v672_v20 = vmul.f32 %v4782_v15, %v4782_v15  ;;  %v4800_v0 = vsub.f32 %v4669_v26, %v4752_v46  ;;  %v673_v23 = vmul.f32 %v4788_v16, %v4788_v16 }
 0x18d   : > { %v699_v55 = vadd.f32 %v668_v53, %v667_v51  ;;  %v4806_v3 = vsub.f32 %v4672_v27, %v4752_v46  ;;  %v674_v24 = vmul.f32 %v4794_v61, %v4794_v61  ;;  %v4812_v6 = vsub.f32 %v4675_v29, %v4752_v46 }
 0x18e   : > { %v675_v26 = vmul.f32 %v4800_v0, %v4800_v0  ;;  %v4818_v8 = vsub.f32 %v4678_v30, %v4752_v46  ;;  %v4824_v14 = vsub.f32 %v4680_v31, %v4752_v46  ;;  %v4830_v18 = vsub.f32 %v4682_v32, %v4752_v46 }
 0x18f   : > { %v700_v58 = vadd.f32 %v699_v55, %v669_v13  ;;  %v676_v27 = vmul.f32 %v4806_v3, %v4806_v3  ;;  %v677_v29 = vmul.f32 %v4812_v6, %v4812_v6  ;;  %v4836_v25 = vsub.f32 %v4684_v33, %v4752_v46 }
 0x190   : > { %v678_v30 = vmul.f32 %v4818_v8, %v4818_v8  ;;  %v679_v31 = vmul.f32 %v4824_v14, %v4824_v14  ;;  %v4842_v40 = vsub.f32 %v4686_v34, %v4752_v46  ;;  %v680_v32 = vmul.f32 %v4830_v18, %v4830_v18 }
 0x191   : > { %v701_v60 = vadd.f32 %v700_v58, %v670_v56  ;;  %v4848_v43 = vsub.f32 %v4688_v35, %v4752_v46  ;;  %v681_v33 = vmul.f32 %v4836_v25, %v4836_v25  ;;  %v4854_v45 = vsub.f32 %v4690_v36, %v4752_v46 }
 0x192   : > { %v682_v34 = vmul.f32 %v4842_v40, %v4842_v40  ;;  %v4860_v53 = vsub.f32 %v4692_v37, %v4752_v46  ;;  %v4866_v55 = vsub.f32 %v4694_v38, %v4752_v46  ;;  %v4872_v58 = vsub.f32 %v4696_v39, %v4752_v46 }
 0x193   : > { %v702_v62 = vadd.f32 %v701_v60, %v671_v19  ;;  %v683_v35 = vmul.f32 %v4848_v43, %v4848_v43  ;;  %v684_v36 = vmul.f32 %v4854_v45, %v4854_v45  ;;  %v4878_v60 = vsub.f32 %v4701_v42, %v4752_v46 }
 0x194   : > { %v685_v37 = vmul.f32 %v4860_v53, %v4860_v53  ;;  %v686_v38 = vmul.f32 %v4866_v55, %v4866_v55  ;;  %v687_v39 = vmul.f32 %v4872_v58, %v4872_v58 }
 0x195   : > { %v703_v1 = vadd.f32 %v702_v62, %v672_v20  ;;  %v4884_v62 = vsub.f32 %v4707_v47, %v4752_v46  ;;  %v688_v42 = vmul.f32 %v4878_v60, %v4878_v60 }
 0x197   : > { %v704_v4 = vadd.f32 %v703_v1, %v673_v23  ;;  %v4890_v1 = vsub.f32 %v4713_v52, %v4752_v46  ;;  %v689_v47 = vmul.f32 %v4884_v62, %v4884_v62 }
 0x199   : > { %v705_v7 = vadd.f32 %v704_v4, %v674_v24  ;;  %v4896_v4 = vsub.f32 %v4719_v57, %v4752_v46  ;;  %v690_v52 = vmul.f32 %v4890_v1, %v4890_v1 }
 0x19b   : > { %v706_v10 = vadd.f32 %v705_v7, %v675_v26  ;;  %v4902_v7 = vsub.f32 %v4727_v63, %v4752_v46  ;;  %v691_v57 = vmul.f32 %v4896_v4, %v4896_v4 }
 0x19d   : > { %v707_v17 = vadd.f32 %v706_v10, %v676_v27  ;;  %v4908_v10 = vsub.f32 %v4735_v5, %v4752_v46  ;;  %v692_v63 = vmul.f32 %v4902_v7, %v4902_v7 }
 0x19f   : > { %v708_v21 = vadd.f32 %v707_v17, %v677_v29  ;;  %v4914_v17 = vsub.f32 %v4743_v11, %v4752_v46  ;;  %v665_v11 = vsub.f32 %v4740_v9, %v4752_v46 }
 0x1a1   : > { %v709_v28 = vadd.f32 %v708_v21, %v678_v30  ;;  %v663_v21 = vsub.f32 %v4722_v59, %v4752_v46 }
 0x1a3   : > { %v710_v41 = vadd.f32 %v709_v28, %v679_v31  ;;  %v693_v31 = vmul.f32 %v4908_v10, %v4908_v10  ;;  %v664_v28 = vsub.f32 %v4731_v2, %v4752_v46 }
 0x1a5   : > { %v711_v44 = vadd.f32 %v710_v41, %v680_v32  ;;  %v694_v32 = vmul.f32 %v4914_v17, %v4914_v17  ;;  %v696_v59 = vmul.f32 %v664_v28, %v664_v28 }
 0x1a7   : > { %v712_v51 = vadd.f32 %v711_v44, %v681_v33  ;;  %v695_v33 = vmul.f32 %v663_v21, %v663_v21 }
 0x1a9   : > { %v713_v13 = vadd.f32 %v712_v51, %v682_v34  ;;  %v666_v34 = vsub.f32 %v4749_v22, %v4752_v46 }
 0x1ab   : > { %v714_v56 = vadd.f32 %v713_v13, %v683_v35  ;;  %v697_v35 = vmul.f32 %v665_v11, %v665_v11 }
 0x1ad   : > { %v715_v19 = vadd.f32 %v714_v56, %v684_v36  ;;  %v698_v36 = vmul.f32 %v666_v34, %v666_v34 }
 0x1af   : > { %v716_v20 = vadd.f32 %v715_v19, %v685_v37 }
 0x1b1   : > { %v717_v23 = vadd.f32 %v716_v20, %v686_v38 }
 0x1b3   : > { %v718_v24 = vadd.f32 %v717_v23, %v687_v39 }
 0x1b5   : > { %v719_v26 = vadd.f32 %v718_v24, %v688_v42 }
 0x1b7   : > { %v720_v27 = vadd.f32 %v719_v26, %v689_v47 }
 0x1b9   : > { %v721_v29 = vadd.f32 %v720_v27, %v690_v52  ;;  %v4933_v27 = vld [vmem:[%s6396_s3] ss:$0 sm:$0xff] }
 0x1bb   : > { %v722_v30 = vadd.f32 %v721_v29, %v691_v57  ;;  %v4940_v29 = vld [vmem:[%s6398_s5] ss:$0 sm:$0xff] }
 0x1bd   : > { %v723_v5 = vadd.f32 %v722_v30, %v692_v63 }
 0x1bf   : > { %v724_v41 = vadd.f32 %v723_v5, %v693_v31 }
 0x1c1   : > { %v725_v44 = vadd.f32 %v724_v41, %v694_v32 }
 0x1c3   : > { %v726_v51 = vadd.f32 %v725_v44, %v695_v33 }
 0x1c5   : > { %v727_v13 = vadd.f32 %v726_v51, %v696_v59  ;;  %v4320_v51 = vld [vmem:[%s6395_s2 + $0x30] sm:$0xff] }
 0x1c7   : > { %v728_v56 = vadd.f32 %v727_v13, %v697_v35 }
 0x1c9   : > { %v729_v37 = vadd.f32 %v728_v56, %v698_v36 }
 0x1cb   : > { %v730_v2 = vrot.slane %v729_v37, 4 }
 0x1cd   : > { %v731_v19 = vadd.f32 %v730_v2, %v729_v37 }
 0x1cf   : > { %v732_v38 = vrot.slane %v731_v19, 2 }
 0x1d1   : > { %v733_v20 = vadd.f32 %v732_v38, %v731_v19 }
 0x1d3   : > { %v734_v39 = vrot.slane %v733_v20, 1 }
 0x1d5   : > { %v735_v23 = vadd.f32 %v734_v39, %v733_v20 }
 0x1d7   : > { %v736_v42 = vmul.f32 0.00390625, %v735_v23 }
 0x1d9   : > { %v737_v9 = vadd.f32 1e-05, %v736_v42 }
 0x1db   : > { %4441 = vrsqrt.f32 %v737_v9  ;;  %vm744_vm2 = vweird.f32 %v737_v9 }
 0x1e1   : > { %v4442_v24 = vpop.eup %4441 }
 0x1e2   : > { %v739_v47 = vmul.f32 %v4442_v24, %v737_v9  ;;  %vm745_vm1 = vweird.f32 %v4442_v24 }
 0x1e3   : > { %vm746_vm3 = vmor %vm744_vm2, %vm745_vm1  ;;  %vm2123_vm1 = vcmask 1046532  }
 0x1e4   : > { %v740_v26 = vmul.f32 %v4442_v24, %v739_v47  ;;  %vm6042_vm2 = vmor %vm2122_vm0, %vm2123_vm1 }
 0x1e6   : > { %v741_v22 = vmul.f32 0.5, %v740_v26 }
 0x1e8   : > { %v742_v46 = vsub.f32 1.5, %v741_v22 }
 0x1ea   : > { %v743_v52 = vmul.f32 %v4442_v24, %v742_v46 }
 0x1ec   : > { %v4935_v57 = vsel %vm746_vm3, %v4442_v24, %v743_v52  ;;  %vm1773_vm3 = vsmask.f32 3328 }
 0x1ed   : > { %v776_v63 = vmul.f32 %v4935_v57, %v663_v21  ;;  %v777_v30 = vmul.f32 %v4935_v57, %v664_v28  ;;  %v778_v31 = vmul.f32 %v4935_v57, %v665_v11  ;;  %v779_v5 = vmul.f32 %v4935_v57, %v666_v34  ;;  %v4321_v28 = vld [vmem:[%s6395_s2 + $0x38] sm:$0xff]  ;;  %vm6056_vm5 = vmor %vm1773_vm3, %vm1774_vm4 }
 0x1ee   : > { %v4948_v32 = vmul.f32 %v4935_v57, %v4756_v48  ;;  %v4952_v41 = vmul.f32 %v4935_v57, %v4760_v49  ;;  %v4956_v33 = vmul.f32 %v4935_v57, %v4764_v50  ;;  %v4960_v21 = vmul.f32 %v4935_v57, %v4772_v54  ;;  %2069 = vmatpush.bf16.msrb.mxu2 %v4321_v28 }
 0x1ef   : > { %v812_v11 = vmul.f32 %v4933_v27, %v776_v63  ;;  %v813_v48 = vmul.f32 %v4933_v27, %v777_v30  ;;  %v814_v44 = vmul.f32 %v4933_v27, %v778_v31  ;;  %v815_v49 = vmul.f32 %v4933_v27, %v779_v5 }
 0x1f0   : > { %v4971_v50 = vmul.f32 %v4935_v57, %v4776_v12  ;;  %v4975_v54 = vmul.f32 %v4935_v57, %v4782_v15  ;;  %v4979_v34 = vmul.f32 %v4935_v57, %v4788_v16  ;;  %v4983_v59 = vmul.f32 %v4935_v57, %v4794_v61 }
 0x1f1   : > { %v848_v12 = vadd.f32 %v4940_v29, %v812_v11  ;;  %v849_v35 = vadd.f32 %v4940_v29, %v813_v48  ;;  %v850_v15 = vadd.f32 %v4940_v29, %v814_v44  ;;  %v851_v13 = vadd.f32 %v4940_v29, %v815_v49 }
 0x1f2   : > { %v4994_v16 = vmul.f32 %v4935_v57, %v4800_v0  ;;  %v4998_v61 = vmul.f32 %v4935_v57, %v4806_v3  ;;  %v5002_v36 = vmul.f32 %v4935_v57, %v4812_v6  ;;  %v5006_v56 = vmul.f32 %v4935_v57, %v4818_v8  ;;  %2070 = vmatpush.bf16.msrb.mxu2 %v4320_v51 }
 0x1f3   : > { %v880_v37 = vmax.f32 %v848_v12, 0.0  ;;  %v881_v2 = vmax.f32 %v849_v35, 0.0  ;;  %v882_v19 = vmax.f32 %v850_v15, 0.0  ;;  %v883_v38 = vmax.f32 %v851_v13, 0.0 }
 0x1f4   : > { %v5010_v0 = vmul.f32 %v4935_v57, %v4824_v14  ;;  %v5014_v3 = vmul.f32 %v4935_v57, %v4830_v18  ;;  %v5018_v6 = vmul.f32 %v4935_v57, %v4836_v25  ;;  %v5022_v8 = vmul.f32 %v4935_v57, %v4842_v40 }
 0x1f5   : > { %v898_v20 = vadd.f32 %v882_v19, %v880_v37  ;;  %v899_v39 = vadd.f32 %v883_v38, %v881_v2  ;;  %v5026_v23 = vmul.f32 %v4935_v57, %v4848_v43  ;;  %v5030_v14 = vmul.f32 %v4935_v57, %v4854_v45  ;;  %v4337_v45 = vld [vmem:[%s6395_s2 + $0xb8] sm:$0xff]  ;;  %v4319_v19 = vld [vmem:[%s6395_s2 + $0x28] sm:$0xff] }
 0x1f6   : > { %v5034_v18 = vmul.f32 %v4935_v57, %v4860_v53  ;;  %v5038_v25 = vmul.f32 %v4935_v57, %v4866_v55  ;;  %v5042_v40 = vmul.f32 %v4935_v57, %v4872_v58  ;;  %v5046_v43 = vmul.f32 %v4935_v57, %v4878_v60  ;;  %2237 = vmatpush.bf16.msra.mxu3 %v4337_v45 }
 0x1f7   : > { %v958_v42 = vrot.slane %v898_v20, 2  ;;  %v959_v9 = vrot.slane %v898_v20, 4  ;;  %v960_v53 = vrot.slane %v898_v20, 6  ;;  %v961_v24 = vrot.slane %v899_v39, 2  ;;  %2071 = vmatpush.bf16.msrb.mxu2 %v4319_v19 }
 0x1f8   : > { %v962_v55 = vrot.slane %v899_v39, 4  ;;  %v963_v47 = vrot.slane %v899_v39, 6  ;;  %v3905_v26 = vrot.slane %v898_v20, 9  ;;  %v3909_v22 = vrot.slane %v899_v39, 9 }
 0x1f9   : > { %v3906_v58 = vrot.slane %v958_v42, 9  ;;  %v3907_v46 = vrot.slane %v959_v9, 9  ;;  %v3908_v52 = vrot.slane %v960_v53, 9  ;;  %v3910_v60 = vrot.slane %v961_v24, 9 }
 0x1fa   : > { %v3911_v63 = vrot.slane %v962_v55, 9  ;;  %v3912_v30 = vrot.slane %v963_v47, 9  ;;  %v1260_v31 = vadd.f32 %v3905_v26, %v898_v20  ;;  %v1264_v5 = vadd.f32 %v3909_v22, %v899_v39 }
 0x1fb   : > { %v1261_v28 = vadd.f32 %v3906_v58, %v958_v42  ;;  %v1262_v11 = vadd.f32 %v3907_v46, %v959_v9  ;;  %v1263_v48 = vadd.f32 %v3908_v52, %v960_v53  ;;  %v1265_v44 = vadd.f32 %v3910_v60, %v961_v24  ;;  %v4336_v58 = vld [vmem:[%s6395_s2 + $0xb0] sm:$0xff] }
 0x1fc   : > { %v1266_v49 = vadd.f32 %v3911_v63, %v962_v55  ;;  %v1267_v51 = vadd.f32 %v3912_v30, %v963_v47  ;;  %v1324_v12 = vmul.f32 0.25, %v1260_v31  ;;  %v1328_v35 = vmul.f32 0.25, %v1264_v5  ;;  %2238 = vmatpush.bf16.msra.mxu3 %v4336_v58 }
 0x1fd   : > { %v1325_v15 = vmul.f32 0.25, %v1261_v28  ;;  %v1326_v13 = vmul.f32 0.25, %v1262_v11  ;;  %v1327_v37 = vmul.f32 0.25, %v1263_v48  ;;  %v1329_v2 = vmul.f32 0.25, %v1265_v44 }
 0x1fe   : > { %v1330_v38 = vmul.f32 0.25, %v1266_v49  ;;  %v1331_v20 = vmul.f32 0.25, %v1267_v51  ;;  %v1408_v39 = vpack.c.bf16 %v1324_v12, %v1324_v12  ;;  %v1412_v45 = vpack.c.bf16 %v1328_v35, %v1328_v35  ;;  %v1738_v12 = vld [vmem:[#allocation2 + $0x44] sm:$0x1] }
 0x1ff   : > { %v1409_v42 = vpack.c.bf16 %v1325_v15, %v1325_v15  ;;  %v1410_v9 = vpack.c.bf16 %v1326_v13, %v1326_v13  ;;  %v1411_v53 = vpack.c.bf16 %v1327_v37, %v1327_v37  ;;  %v1413_v24 = vpack.c.bf16 %v1329_v2, %v1329_v2 }
 0x200   : > { %v1414_v55 = vpack.c.bf16 %v1330_v38, %v1330_v38  ;;  %v1415_v47 = vpack.c.bf16 %v1331_v20, %v1331_v20  ;;  %v1536_v26 = vunpack.c.l.b16 %v1408_v39  ;;  %v1540_v22 = vunpack.c.l.b16 %v1412_v45 }
 0x201   : > { %v1537_v46 = vunpack.c.l.b16 %v1409_v42  ;;  %v1538_v52 = vunpack.c.l.b16 %v1410_v9  ;;  %v1539_v60 = vunpack.c.l.b16 %v1411_v53  ;;  %v1541_v63 = vunpack.c.l.b16 %v1413_v24 }
 0x202   : > { %v1542_v30 = vunpack.c.l.b16 %v1414_v55  ;;  %v1543_v31 = vunpack.c.l.b16 %v1415_v47  ;;  %v1641_v5 = vrot.slane %v1536_v26, 7  ;;  %v1648_v28 = vrot.slane %v1540_v22, 3 }
 0x203   : > { %v6468_v11 = vmov 0  ;;  %v1642_v48 = vrot.slane %v1537_v46, 6  ;;  %v1644_v44 = vrot.slane %v1538_v52, 5  ;;  %v1646_v49 = vrot.slane %v1539_v60, 4 }
 0x204   : > { %v6469_v11 = vsel %vm5059_vm14, 4294967295, %v6468_v11  ;;  %v1650_v51 = vrot.slane %v1541_v63, 2  ;;  %v1652_v35 = vrot.slane %v1542_v30, 1  ;;  %v1669_v15 = vpack.c.b16 %v1543_v31, %v1543_v31 }
 0x205   : > { %6470 = vst [vmem:[#allocation6_spill] sm:$0xff] %v6469_v11  ;;  %v770_v13 = vmul.f32 %v4935_v57, %v4884_v62  ;;  %v771_v37 = vmul.f32 %v4935_v57, %v4890_v1  ;;  %v1643_v2 = vsel %vm1546_vm6, %v1642_v48, %v1641_v5  ;;  %v772_v19 = vmul.f32 %v4935_v57, %v4896_v4 }
 0x206   : > { %v773_v38 = vmul.f32 %v4935_v57, %v4902_v7  ;;  %v774_v20 = vmul.f32 %v4935_v57, %v4908_v10  ;;  %v1645_v39 = vsel %vm1549_vm7, %v1644_v44, %v1643_v2  ;;  %v1739_v45 = vsel %vm5059_vm14, %v1669_v15, %v1738_v12 }
 0x207   : > { %v775_v62 = vmul.f32 %v4935_v57, %v4914_v17  ;;  %v784_v1 = vmul.f32 %v4933_v27, %v4948_v32  ;;  %v1647_v42 = vsel %vm1552_vm8, %v1646_v49, %v1645_v39  ;;  %1740 = vst [vmem:[#allocation2 + $0x44] sm:$0x1] %v1739_v45  ;;  %v785_v4 = vmul.f32 %v4933_v27, %v4952_v41 }
 0x208   : > { %v786_v7 = vmul.f32 %v4933_v27, %v4956_v33  ;;  %v787_v10 = vmul.f32 %v4933_v27, %v4960_v21  ;;  %v1649_v9 = vsel %vm1555_vm9, %v1648_v28, %v1647_v42  ;;  %v788_v17 = vmul.f32 %v4933_v27, %v4971_v50 }
 0x209   : > { %v789_v57 = vmul.f32 %v4933_v27, %v4975_v54  ;;  %v790_v32 = vmul.f32 %v4933_v27, %v4979_v34  ;;  %v1651_v53 = vsel %vm1558_vm10, %v1650_v51, %v1649_v9  ;;  %v791_v41 = vmul.f32 %v4933_v27, %v4983_v59  ;;  %v1735_v34 = vld [vmem:[#allocation2 + $0x40] sm:$0xf] }
 0x20a   : > { %v792_v33 = vmul.f32 %v4933_v27, %v4994_v16  ;;  %v793_v21 = vmul.f32 %v4933_v27, %v4998_v61  ;;  %v6471_v50 = vmov 0  ;;  %v1653_v54 = vsel %vm1561_vm11, %v1652_v35, %v1651_v53 }
 0x20b   : > { %v6472_v50 = vsel %vm5104_vm15, 4294967295, %v6471_v50  ;;  %v794_v24 = vmul.f32 %v4933_v27, %v5002_v36  ;;  %v795_v59 = vmul.f32 %v4933_v27, %v5006_v56  ;;  %v796_v16 = vmul.f32 %v4933_v27, %v5010_v0 }
 0x20c   : > { %6473 = vst [vmem:[#allocation7_spill] sm:$0xff] %v6472_v50  ;;  %v1668_v55 = vpack.c.b16 %v1653_v54, %v1653_v54  ;;  %v797_v61 = vmul.f32 %v4933_v27, %v5014_v3  ;;  %v798_v47 = vmul.f32 %v4933_v27, %v5018_v6  ;;  %v799_v26 = vmul.f32 %v4933_v27, %v5022_v8 }
 0x20d   : > { %v800_v22 = vmul.f32 %v4933_v27, %v5026_v23  ;;  %v801_v36 = vmul.f32 %v4933_v27, %v5030_v14  ;;  %v802_v56 = vmul.f32 %v4933_v27, %v5034_v18  ;;  %v803_v0 = vmul.f32 %v4933_v27, %v5038_v25 }
 0x20e   : > { %v1736_v3 = vsel %vm5104_vm15, %v1668_v55, %v1735_v34  ;;  %v804_v6 = vmul.f32 %v4933_v27, %v5042_v40  ;;  %v805_v8 = vmul.f32 %v4933_v27, %v5046_v43  ;;  %v806_v23 = vmul.f32 %v4933_v27, %v770_v13 }
 0x20f   : > { %1737 = vst [vmem:[#allocation2 + $0x40] sm:$0xf] %v1736_v3  ;;  %v807_v14 = vmul.f32 %v4933_v27, %v771_v37  ;;  %v808_v58 = vmul.f32 %v4933_v27, %v772_v19  ;;  %v809_v18 = vmul.f32 %v4933_v27, %v773_v38  ;;  %v810_v25 = vmul.f32 %v4933_v27, %v774_v20 }
 0x210   : > { %v811_v46 = vmul.f32 %v4933_v27, %v775_v62  ;;  %v820_v52 = vadd.f32 %v4940_v29, %v784_v1  ;;  %v821_v40 = vadd.f32 %v4940_v29, %v785_v4  ;;  %v822_v60 = vadd.f32 %v4940_v29, %v786_v7 }
 0x211   : > { %v823_v43 = vadd.f32 %v4940_v29, %v787_v10  ;;  %v824_v63 = vadd.f32 %v4940_v29, %v788_v17  ;;  %v825_v30 = vadd.f32 %v4940_v29, %v789_v57  ;;  %v826_v31 = vadd.f32 %v4940_v29, %v790_v32 }
 0x212   : > { %v827_v5 = vadd.f32 %v4940_v29, %v791_v41  ;;  %v828_v28 = vadd.f32 %v4940_v29, %v792_v33  ;;  %v829_v27 = vadd.f32 %v4940_v29, %v793_v21  ;;  %v830_v48 = vadd.f32 %v4940_v29, %v794_v24 }
 0x213   : > { %v831_v44 = vadd.f32 %v4940_v29, %v795_v59  ;;  %v832_v49 = vadd.f32 %v4940_v29, %v796_v16  ;;  %v833_v51 = vadd.f32 %v4940_v29, %v797_v61  ;;  %v834_v12 = vadd.f32 %v4940_v29, %v798_v47 }
 0x214   : > { %v835_v35 = vadd.f32 %v4940_v29, %v799_v26  ;;  %v836_v15 = vadd.f32 %v4940_v29, %v800_v22  ;;  %v837_v13 = vadd.f32 %v4940_v29, %v801_v36  ;;  %v838_v37 = vadd.f32 %v4940_v29, %v802_v56 }
 0x215   : > { %v839_v2 = vadd.f32 %v4940_v29, %v803_v0  ;;  %v840_v19 = vadd.f32 %v4940_v29, %v804_v6  ;;  %v841_v38 = vadd.f32 %v4940_v29, %v805_v8  ;;  %v842_v20 = vadd.f32 %v4940_v29, %v806_v23 }
 0x216   : > { %v843_v39 = vadd.f32 %v4940_v29, %v807_v14  ;;  %v844_v45 = vadd.f32 %v4940_v29, %v808_v58  ;;  %v845_v62 = vadd.f32 %v4940_v29, %v809_v18  ;;  %v846_v1 = vadd.f32 %v4940_v29, %v810_v25 }
 0x217   : > { %v847_v42 = vadd.f32 %v4940_v29, %v811_v46  ;;  %v852_v4 = vmax.f32 %v820_v52, 0.0  ;;  %v853_v7 = vmax.f32 %v821_v40, 0.0  ;;  %v854_v10 = vmax.f32 %v822_v60, 0.0 }
 0x218   : > { %v855_v9 = vmax.f32 %v823_v43, 0.0  ;;  %v856_v17 = vmax.f32 %v824_v63, 0.0  ;;  %v857_v57 = vmax.f32 %v825_v30, 0.0  ;;  %v858_v32 = vmax.f32 %v826_v31, 0.0 }
 0x219   : > { %v859_v53 = vmax.f32 %v827_v5, 0.0  ;;  %v860_v41 = vmax.f32 %v828_v28, 0.0  ;;  %v861_v33 = vmax.f32 %v829_v27, 0.0  ;;  %v862_v21 = vmax.f32 %v830_v48, 0.0 }
 0x21a   : > { %v863_v54 = vmax.f32 %v831_v44, 0.0  ;;  %v864_v34 = vmax.f32 %v832_v49, 0.0  ;;  %v865_v24 = vmax.f32 %v833_v51, 0.0  ;;  %v866_v59 = vmax.f32 %v834_v12, 0.0 }
 0x21b   : > { %v867_v16 = vmax.f32 %v835_v35, 0.0  ;;  %v868_v55 = vmax.f32 %v836_v15, 0.0  ;;  %v869_v61 = vmax.f32 %v837_v13, 0.0  ;;  %v870_v47 = vmax.f32 %v838_v37, 0.0 }
 0x21c   : > { %v871_v29 = vmax.f32 %v839_v2, 0.0  ;;  %v872_v26 = vmax.f32 %v840_v19, 0.0  ;;  %v873_v22 = vmax.f32 %v841_v38, 0.0  ;;  %v874_v36 = vmax.f32 %v842_v20, 0.0 }
 0x21d   : > { %v875_v56 = vmax.f32 %v843_v39, 0.0  ;;  %v876_v0 = vmax.f32 %v844_v45, 0.0  ;;  %v877_v3 = vmax.f32 %v845_v62, 0.0  ;;  %v878_v6 = vmax.f32 %v846_v1, 0.0 }
 0x21e   : > { %v879_v8 = vmax.f32 %v847_v42, 0.0  ;;  %v5169_v23 = vadd.f32 %v854_v10, %v852_v4  ;;  %v5171_v14 = vadd.f32 %v855_v9, %v853_v7  ;;  %v5173_v58 = vadd.f32 %v858_v32, %v856_v17 }
 0x21f   : > { %v5175_v18 = vadd.f32 %v859_v53, %v857_v57  ;;  %v5177_v25 = vadd.f32 %v862_v21, %v860_v41  ;;  %v5179_v46 = vadd.f32 %v863_v54, %v861_v33  ;;  %v5181_v52 = vadd.f32 %v866_v59, %v864_v34 }
 0x220   : > { %v5183_v40 = vadd.f32 %v867_v16, %v865_v24  ;;  %v5185_v60 = vadd.f32 %v870_v47, %v868_v55  ;;  %v5187_v43 = vadd.f32 %v871_v29, %v869_v61  ;;  %v5189_v63 = vadd.f32 %v874_v36, %v872_v26 }
 0x221   : > { %6474 = vst [vmem:[#allocation8_spill] sm:$0xff] %v5179_v46  ;;  %v5191_v30 = vadd.f32 %v875_v56, %v873_v22  ;;  %v5193_v31 = vadd.f32 %v878_v6, %v876_v0  ;;  %v5195_v5 = vadd.f32 %v879_v8, %v877_v3  ;;  %v6433_v28 = vrot.slane %v5169_v23, 2 }
 0x222   : > { %6475 = vst [vmem:[#allocation9_spill] sm:$0xff] %v5181_v52  ;;  %v6431_v27 = vrot.slane %v5169_v23, 4  ;;  %v6429_v48 = vrot.slane %v5169_v23, 6  ;;  %v6403_v44 = vrot.slane %v5171_v14, 2  ;;  %v6404_v49 = vrot.slane %v5171_v14, 4 }
 0x223   : > { %6476 = vst [vmem:[#allocation10_spill] sm:$0xff] %v5183_v40  ;;  %v6405_v51 = vrot.slane %v5171_v14, 6  ;;  %v6406_v12 = vrot.slane %v5173_v58, 2  ;;  %v6407_v35 = vrot.slane %v5173_v58, 4  ;;  %v6408_v15 = vrot.slane %v5173_v58, 6 }
 0x224   : > { %6477 = vst [vmem:[#allocation11_spill] sm:$0xff] %v5185_v60  ;;  %v6409_v13 = vrot.slane %v5175_v18, 2  ;;  %v6410_v37 = vrot.slane %v5175_v18, 4  ;;  %v6411_v2 = vrot.slane %v5175_v18, 6  ;;  %v6412_v19 = vrot.slane %v5177_v25, 2 }
 0x225   : > { %6478 = vst [vmem:[#allocation12_spill] sm:$0xff] %v5187_v43  ;;  %v6413_v38 = vrot.slane %v5177_v25, 4  ;;  %v6414_v20 = vrot.slane %v5177_v25, 6  ;;  %v6415_v39 = vrot.slane %v5179_v46, 2  ;;  %v6416_v45 = vrot.slane %v5179_v46, 4 }
 0x226   : > { %6479 = vst [vmem:[#allocation13_spill] sm:$0xff] %v5189_v63  ;;  %v6417_v62 = vrot.slane %v5179_v46, 6  ;;  %v6418_v1 = vrot.slane %v5181_v52, 2  ;;  %v6419_v42 = vrot.slane %v5181_v52, 4  ;;  %v6420_v4 = vrot.slane %v5181_v52, 6 }
 0x227   : > { %6480 = vst [vmem:[#allocation14_spill] sm:$0xff] %v5191_v30  ;;  %v6421_v7 = vrot.slane %v5183_v40, 2  ;;  %v6422_v10 = vrot.slane %v5183_v40, 4  ;;  %v6423_v9 = vrot.slane %v5183_v40, 6  ;;  %v6424_v17 = vrot.slane %v5185_v60, 2 }
 0x228   : > { %6481 = vst [vmem:[#allocation15_spill] sm:$0xff] %v5193_v31  ;;  %v6425_v57 = vrot.slane %v5185_v60, 4  ;;  %v6426_v32 = vrot.slane %v5185_v60, 6  ;;  %v6427_v53 = vrot.slane %v5187_v43, 2  ;;  %v6428_v41 = vrot.slane %v5187_v43, 4 }
 0x229   : > { %6482 = vst [vmem:[#allocation16_spill] sm:$0xff] %v5195_v5  ;;  %v6430_v33 = vrot.slane %v5187_v43, 6  ;;  %v6432_v21 = vrot.slane %v5189_v63, 2  ;;  %v6434_v54 = vrot.slane %v5189_v63, 4  ;;  %v6437_v34 = vrot.slane %v5189_v63, 6 }
 0x22a   : > { %v6440_v24 = vrot.slane %v5191_v30, 2  ;;  %v6443_v59 = vrot.slane %v5191_v30, 4  ;;  %v3849_v36 = vrot.slane %v5169_v23, 9  ;;  %v3853_v56 = vrot.slane %v5171_v14, 9 }
 0x22b   : > { %v3857_v0 = vrot.slane %v5173_v58, 9  ;;  %v3850_v6 = vrot.slane %v6433_v28, 9  ;;  %v3851_v47 = vrot.slane %v6431_v27, 9  ;;  %v3852_v29 = vrot.slane %v6429_v48, 9 }
 0x22c   : > { %v3854_v22 = vrot.slane %v6403_v44, 9  ;;  %v3855_v61 = vrot.slane %v6404_v49, 9  ;;  %v3856_v16 = vrot.slane %v6405_v51, 9  ;;  %v3858_v3 = vrot.slane %v6406_v12, 9 }
 0x22d   : > { %v3859_v55 = vrot.slane %v6407_v35, 9  ;;  %v3860_v26 = vrot.slane %v6408_v15, 9  ;;  %v3862_v8 = vrot.slane %v6409_v13, 9  ;;  %v3863_v44 = vrot.slane %v6410_v37, 9 }
 0x22e   : > { %v3864_v49 = vrot.slane %v6411_v2, 9  ;;  %v3866_v51 = vrot.slane %v6412_v19, 9  ;;  %v3867_v12 = vrot.slane %v6413_v38, 9  ;;  %v3868_v35 = vrot.slane %v6414_v20, 9 }
 0x22f   : > { %v3870_v15 = vrot.slane %v6415_v39, 9  ;;  %v3871_v13 = vrot.slane %v6416_v45, 9  ;;  %v3872_v37 = vrot.slane %v6417_v62, 9  ;;  %v3874_v2 = vrot.slane %v6418_v1, 9 }
 0x230   : > { %v3875_v19 = vrot.slane %v6419_v42, 9  ;;  %v3876_v38 = vrot.slane %v6420_v4, 9  ;;  %v3878_v20 = vrot.slane %v6421_v7, 9  ;;  %v3879_v39 = vrot.slane %v6422_v10, 9 }
 0x231   : > { %v3880_v45 = vrot.slane %v6423_v9, 9  ;;  %v3882_v62 = vrot.slane %v6424_v17, 9  ;;  %v3883_v1 = vrot.slane %v6425_v57, 9  ;;  %v3884_v42 = vrot.slane %v6426_v32, 9 }
 0x232   : > { %v3886_v4 = vrot.slane %v6427_v53, 9  ;;  %v3887_v7 = vrot.slane %v6428_v41, 9  ;;  %v3888_v10 = vrot.slane %v6430_v33, 9  ;;  %v3890_v9 = vrot.slane %v6432_v21, 9 }
 0x233   : > { %v3891_v17 = vrot.slane %v6434_v54, 9  ;;  %v3892_v57 = vrot.slane %v6437_v34, 9  ;;  %v3894_v32 = vrot.slane %v6440_v24, 9  ;;  %v3895_v53 = vrot.slane %v6443_v59, 9 }
 0x234   : > { %v6483_v41 = vrot.slane %v5191_v30, 6  ;;  %v6484_v33 = vrot.slane %v5193_v31, 2  ;;  %v6485_v21 = vrot.slane %v5193_v31, 4  ;;  %v6486_v54 = vrot.slane %v5193_v31, 6 }
 0x235   : > { %v6487_v34 = vrot.slane %v5195_v5, 2  ;;  %v6488_v24 = vrot.slane %v5195_v5, 4  ;;  %v6489_v59 = vrot.slane %v5195_v5, 6  ;;  %v6490_v30 = vrot.slane %v5169_v23, 2 }
 0x236   : > { %v3896_v48 = vrot.slane %v6483_v41, 9  ;;  %v3898_v27 = vrot.slane %v6484_v33, 9  ;;  %v3899_v28 = vrot.slane %v6485_v21, 9  ;;  %v3900_v50 = vrot.slane %v6486_v54, 9 }
 0x237   : > { %v3902_v11 = vrot.slane %v6487_v34, 9  ;;  %v3903_v63 = vrot.slane %v6488_v24, 9  ;;  %v3904_v43 = vrot.slane %v6489_v59, 9  ;;  %v1204_v41 = vadd.f32 %v3849_v36, %v5169_v23 }
 0x238   : > { %v1205_v33 = vadd.f32 %v3850_v6, %v6490_v30  ;;  %v6491_v60 = vrot.slane %v5169_v23, 4  ;;  %v6492_v31 = vrot.slane %v5169_v23, 6  ;;  %v1208_v40 = vadd.f32 %v3853_v56, %v5171_v14 }
 0x239   : > { %v6493_v34 = vrot.slane %v5171_v14, 2  ;;  %v6494_v24 = vrot.slane %v5171_v14, 4  ;;  %v6495_v59 = vrot.slane %v5171_v14, 6  ;;  %v1212_v46 = vadd.f32 %v3857_v0, %v5173_v58 }
 0x23a   : > { %v1206_v21 = vadd.f32 %v3851_v47, %v6491_v60  ;;  %v1207_v54 = vadd.f32 %v3852_v29, %v6492_v31  ;;  %v6496_v30 = vrot.slane %v5173_v58, 2  ;;  %v6497_v60 = vrot.slane %v5173_v58, 4 }
 0x23b   : > { %v1209_v52 = vadd.f32 %v3854_v22, %v6493_v34  ;;  %v1210_v5 = vadd.f32 %v3855_v61, %v6494_v24  ;;  %v1211_v36 = vadd.f32 %v3856_v16, %v6495_v59  ;;  %v6498_v31 = vrot.slane %v5173_v58, 6 }
 0x23c   : > { %v1213_v6 = vadd.f32 %v3858_v3, %v6496_v30  ;;  %v1214_v23 = vadd.f32 %v3859_v55, %v6497_v60  ;;  %v6499_v29 = vrot.slane %v5175_v18, 9  ;;  %v6500_v61 = vrot.slane %v5175_v18, 2 }
 0x23d   : > { %v1215_v47 = vadd.f32 %v3860_v26, %v6498_v31  ;;  %v6501_v14 = vrot.slane %v5175_v18, 4  ;;  %v6502_v0 = vrot.slane %v5175_v18, 6  ;;  %v6503_v3 = vrot.slane %v5177_v25, 9 }
 0x23e   : > { %v1216_v22 = vadd.f32 %v6499_v29, %v5175_v18  ;;  %v1217_v56 = vadd.f32 %v3862_v8, %v6500_v61  ;;  %v6504_v58 = vrot.slane %v5177_v25, 2  ;;  %v6505_v24 = vrot.slane %v5177_v25, 4  ;;  %v6507_v8 = vld [vmem:[#allocation8_spill] sm:$0xff] }
 0x23f   : > { %v1218_v16 = vadd.f32 %v3863_v44, %v6501_v14  ;;  %v1219_v34 = vadd.f32 %v3864_v49, %v6502_v0  ;;  %v1220_v55 = vadd.f32 %v6503_v3, %v5177_v25  ;;  %v6506_v30 = vrot.slane %v5177_v25, 6 }
 0x240   : > { %v1221_v26 = vadd.f32 %v3866_v51, %v6504_v58  ;;  %v1222_v59 = vadd.f32 %v3867_v12, %v6505_v24  ;;  %v6508_v31 = vrot.slane %v6507_v8, 9  ;;  %v6509_v18 = vrot.slane %v6507_v8, 2  ;;  %v6512_v51 = vld [vmem:[#allocation9_spill] sm:$0xff] }
 0x241   : > { %v1223_v60 = vadd.f32 %v3868_v35, %v6506_v30  ;;  %v6510_v29 = vrot.slane %v6507_v8, 4  ;;  %v6511_v14 = vrot.slane %v6507_v8, 6  ;;  %v6513_v3 = vrot.slane %v6512_v51, 9 }
 0x242   : > { %v1224_v44 = vadd.f32 %v6508_v31, %v6507_v8  ;;  %v1225_v49 = vadd.f32 %v3870_v15, %v6509_v18  ;;  %v6514_v25 = vrot.slane %v6512_v51, 2  ;;  %v6515_v58 = vrot.slane %v6512_v51, 4  ;;  %v6517_v15 = vld [vmem:[#allocation10_spill] sm:$0xff] }
 0x243   : > { %v1226_v61 = vadd.f32 %v3871_v13, %v6510_v29  ;;  %v1227_v0 = vadd.f32 %v3872_v37, %v6511_v14  ;;  %v1228_v12 = vadd.f32 %v6513_v3, %v6512_v51  ;;  %v6516_v30 = vrot.slane %v6512_v51, 6 }
 0x244   : > { %v1229_v35 = vadd.f32 %v3874_v2, %v6514_v25  ;;  %v1230_v24 = vadd.f32 %v3875_v19, %v6515_v58  ;;  %v6518_v18 = vrot.slane %v6517_v15, 9  ;;  %v6519_v8 = vrot.slane %v6517_v15, 2  ;;  %v6522_v25 = vld [vmem:[#allocation11_spill] sm:$0xff] }
 0x245   : > { %v1231_v31 = vadd.f32 %v3876_v38, %v6516_v30  ;;  %v6520_v29 = vrot.slane %v6517_v15, 4  ;;  %v6521_v3 = vrot.slane %v6517_v15, 6  ;;  %v6523_v19 = vrot.slane %v6522_v25, 9 }
 0x246   : > { %v1232_v13 = vadd.f32 %v6518_v18, %v6517_v15  ;;  %v1233_v37 = vadd.f32 %v3878_v20, %v6519_v8  ;;  %v6524_v51 = vrot.slane %v6522_v25, 2  ;;  %v6525_v30 = vrot.slane %v6522_v25, 4 }
 0x247   : > { %v1234_v14 = vadd.f32 %v3879_v39, %v6520_v29  ;;  %v1235_v2 = vadd.f32 %v3880_v45, %v6521_v3  ;;  %v1236_v58 = vadd.f32 %v6523_v19, %v6522_v25  ;;  %v6526_v8 = vrot.slane %v6522_v25, 6  ;;  %v6527_v29 = vld [vmem:[#allocation12_spill] sm:$0xff] }
 0x248   : > { %v1237_v38 = vadd.f32 %v3882_v62, %v6524_v51  ;;  %v1238_v18 = vadd.f32 %v3883_v1, %v6525_v30  ;;  %v6528_v39 = vrot.slane %v6527_v29, 9  ;;  %v6529_v3 = vrot.slane %v6527_v29, 2  ;;  %v6532_v30 = vld [vmem:[#allocation13_spill] sm:$0xff] }
 0x249   : > { %v1239_v20 = vadd.f32 %v3884_v42, %v6526_v8  ;;  %v6530_v19 = vrot.slane %v6527_v29, 4  ;;  %v6531_v62 = vrot.slane %v6527_v29, 6  ;;  %v6533_v25 = vrot.slane %v6532_v30, 9 }
 0x24a   : > { %v1240_v15 = vadd.f32 %v6528_v39, %v6527_v29  ;;  %v1241_v45 = vadd.f32 %v3886_v4, %v6529_v3  ;;  %v6534_v42 = vrot.slane %v6532_v30, 2  ;;  %v6535_v3 = vrot.slane %v6532_v30, 4  ;;  %v6537_v29 = vld [vmem:[#allocation14_spill] sm:$0xff] }
 0x24b   : > { %v1242_v51 = vadd.f32 %v3887_v7, %v6530_v19  ;;  %v1243_v1 = vadd.f32 %v3888_v10, %v6531_v62  ;;  %v1244_v8 = vadd.f32 %v6533_v25, %v6532_v30  ;;  %v6536_v7 = vrot.slane %v6532_v30, 6 }
 0x24c   : > { %v1245_v39 = vadd.f32 %v3890_v9, %v6534_v42  ;;  %v1246_v4 = vadd.f32 %v3891_v17, %v6535_v3  ;;  %v6538_v10 = vrot.slane %v6537_v29, 9  ;;  %v6539_v25 = vrot.slane %v6537_v29, 2 }
 0x24d   : > { %v1247_v19 = vadd.f32 %v3892_v57, %v6536_v7  ;;  %v6540_v42 = vrot.slane %v6537_v29, 4  ;;  %v6541_v17 = vrot.slane %v6537_v29, 6  ;;  %v6542_v7 = vld [vmem:[#allocation15_spill] sm:$0xff] }
 0x24e   : > { %v1248_v62 = vadd.f32 %v6538_v10, %v6537_v29  ;;  %v1249_v9 = vadd.f32 %v3894_v32, %v6539_v25  ;;  %v6543_v57 = vrot.slane %v6542_v7, 9  ;;  %v6544_v25 = vrot.slane %v6542_v7, 2 }
 0x24f   : > { %v1250_v3 = vadd.f32 %v3895_v53, %v6540_v42  ;;  %v1251_v30 = vadd.f32 %v3896_v48, %v6541_v17  ;;  %v6545_v42 = vrot.slane %v6542_v7, 4  ;;  %v6546_v29 = vrot.slane %v6542_v7, 6  ;;  %v6547_v48 = vld [vmem:[#allocation16_spill] sm:$0xff] }
 0x250   : > { %v1252_v10 = vadd.f32 %v6543_v57, %v6542_v7  ;;  %v1253_v32 = vadd.f32 %v3898_v27, %v6544_v25  ;;  %v6548_v57 = vrot.slane %v6547_v48, 9  ;;  %v6549_v27 = vrot.slane %v6547_v48, 2 }
 0x251   : > { %v1254_v53 = vadd.f32 %v3899_v28, %v6545_v42  ;;  %v1255_v17 = vadd.f32 %v3900_v50, %v6546_v29  ;;  %v6550_v42 = vrot.slane %v6547_v48, 4  ;;  %v6551_v29 = vrot.slane %v6547_v48, 6 }
 0x252   : > { %v1256_v25 = vadd.f32 %v6548_v57, %v6547_v48  ;;  %v1257_v28 = vadd.f32 %v3902_v11, %v6549_v27  ;;  %v5457_v57 = vmul.f32 0.25, %v1204_v41  ;;  %v5459_v11 = vmul.f32 0.25, %v1205_v33 }
 0x253   : > { %v1258_v7 = vadd.f32 %v3903_v63, %v6550_v42  ;;  %v1259_v50 = vadd.f32 %v3904_v43, %v6551_v29  ;;  %v5461_v27 = vmul.f32 0.25, %v1206_v21  ;;  %v5463_v42 = vmul.f32 0.25, %v1207_v54 }
 0x254   : > { %6552 = vst [vmem:[#allocation8_spill] sm:$0xff] %v5457_v57  ;;  %v5465_v63 = vmul.f32 0.25, %v1208_v40  ;;  %v5467_v48 = vmul.f32 0.25, %v1209_v52  ;;  %v5469_v29 = vmul.f32 0.25, %v1210_v5  ;;  %v5471_v43 = vmul.f32 0.25, %v1211_v36 }
 0x255   : > { %6553 = vst [vmem:[#allocation9_spill] sm:$0xff] %v5459_v11  ;;  %v5473_v41 = vmul.f32 0.25, %v1212_v46  ;;  %v5475_v57 = vmul.f32 0.25, %v1213_v6  ;;  %v5477_v33 = vmul.f32 0.25, %v1214_v23  ;;  %v5479_v11 = vmul.f32 0.25, %v1215_v47 }
 0x256   : > { %v5481_v21 = vmul.f32 0.25, %v1216_v22  ;;  %v5483_v54 = vmul.f32 0.25, %v1217_v56  ;;  %v5485_v40 = vmul.f32 0.25, %v1218_v16  ;;  %v5487_v52 = vmul.f32 0.25, %v1219_v34 }
 0x257   : > { %v5489_v5 = vmul.f32 0.25, %v1220_v55  ;;  %v5491_v36 = vmul.f32 0.25, %v1221_v26  ;;  %v5493_v46 = vmul.f32 0.25, %v1222_v59  ;;  %v5495_v6 = vmul.f32 0.25, %v1223_v60 }
 0x258   : > { %v5497_v23 = vmul.f32 0.25, %v1224_v44  ;;  %v5499_v47 = vmul.f32 0.25, %v1225_v49  ;;  %v5501_v22 = vmul.f32 0.25, %v1226_v61  ;;  %v5503_v56 = vmul.f32 0.25, %v1227_v0 }
 0x259   : > { %v5505_v16 = vmul.f32 0.25, %v1228_v12  ;;  %v5507_v34 = vmul.f32 0.25, %v1229_v35  ;;  %v5509_v55 = vmul.f32 0.25, %v1230_v24  ;;  %v5511_v26 = vmul.f32 0.25, %v1231_v31 }
 0x25a   : > { %v5513_v59 = vmul.f32 0.25, %v1232_v13  ;;  %v5515_v60 = vmul.f32 0.25, %v1233_v37  ;;  %v5517_v44 = vmul.f32 0.25, %v1234_v14  ;;  %v5519_v49 = vmul.f32 0.25, %v1235_v2 }
 0x25b   : > { %v5521_v61 = vmul.f32 0.25, %v1236_v58  ;;  %v5523_v0 = vmul.f32 0.25, %v1237_v38  ;;  %v5525_v12 = vmul.f32 0.25, %v1238_v18  ;;  %v5527_v35 = vmul.f32 0.25, %v1239_v20 }
 0x25c   : > { %v5529_v24 = vmul.f32 0.25, %v1240_v15  ;;  %v5531_v31 = vmul.f32 0.25, %v1241_v45  ;;  %v5533_v13 = vmul.f32 0.25, %v1242_v51  ;;  %v5535_v37 = vmul.f32 0.25, %v1243_v1 }
 0x25d   : > { %v5537_v14 = vmul.f32 0.25, %v1244_v8  ;;  %v5539_v2 = vmul.f32 0.25, %v1245_v39  ;;  %v5541_v58 = vmul.f32 0.25, %v1246_v4  ;;  %v5543_v38 = vmul.f32 0.25, %v1247_v19 }
 0x25e   : > { %v5545_v18 = vmul.f32 0.25, %v1248_v62  ;;  %v5547_v20 = vmul.f32 0.25, %v1249_v9  ;;  %v5549_v15 = vmul.f32 0.25, %v1250_v3  ;;  %v5551_v45 = vmul.f32 0.25, %v1251_v30  ;;  %v6558_v3 = vld [vmem:[#allocation8_spill] sm:$0xff] }
 0x25f   : > { %v5553_v51 = vmul.f32 0.25, %v1252_v10  ;;  %v5555_v1 = vmul.f32 0.25, %v1253_v32  ;;  %v5557_v8 = vmul.f32 0.25, %v1254_v53  ;;  %v5559_v39 = vmul.f32 0.25, %v1255_v17 }
 0x260   : > { %6554 = vst [vmem:[#allocation10_spill] sm:$0xff] %v5551_v45  ;;  %v5561_v4 = vmul.f32 0.25, %v1256_v25  ;;  %v5563_v19 = vmul.f32 0.25, %v1257_v28  ;;  %v5565_v62 = vmul.f32 0.25, %v1258_v7  ;;  %v5567_v9 = vmul.f32 0.25, %v1259_v50  ;;  %v6559_v45 = vld [vmem:[#allocation9_spill] sm:$0xff] }
 0x261   : > { %v1352_v30 = vpack.c.bf16 %v6558_v3, %v6558_v3  ;;  %v1353_v10 = vpack.c.bf16 %v6559_v45, %v6559_v45  ;;  %v1354_v32 = vpack.c.bf16 %v5461_v27, %v5461_v27  ;;  %v1355_v53 = vpack.c.bf16 %v5463_v42, %v5463_v42 }
 0x262   : > { %6555 = vst [vmem:[#allocation11_spill] sm:$0xff] %v5563_v19  ;;  %v1356_v17 = vpack.c.bf16 %v5465_v63, %v5465_v63  ;;  %v1357_v25 = vpack.c.bf16 %v5467_v48, %v5467_v48  ;;  %v1358_v28 = vpack.c.bf16 %v5469_v29, %v5469_v29  ;;  %v1359_v7 = vpack.c.bf16 %v5471_v43, %v5471_v43 }
 0x263   : > { %6556 = vst [vmem:[#allocation12_spill] sm:$0xff] %v5565_v62  ;;  %v1360_v50 = vpack.c.bf16 %v5473_v41, %v5473_v41  ;;  %v1361_v27 = vpack.c.bf16 %v5475_v57, %v5475_v57  ;;  %v1362_v42 = vpack.c.bf16 %v5477_v33, %v5477_v33  ;;  %v1363_v63 = vpack.c.bf16 %v5479_v11, %v5479_v11 }
 0x264   : > { %6557 = vst [vmem:[#allocation13_spill] sm:$0xff] %v5567_v9  ;;  %v1364_v48 = vpack.c.bf16 %v5481_v21, %v5481_v21  ;;  %v1365_v29 = vpack.c.bf16 %v5483_v54, %v5483_v54  ;;  %v1366_v43 = vpack.c.bf16 %v5485_v40, %v5485_v40  ;;  %v1367_v41 = vpack.c.bf16 %v5487_v52, %v5487_v52 }
 0x265   : > { %v1368_v57 = vpack.c.bf16 %v5489_v5, %v5489_v5  ;;  %v1369_v33 = vpack.c.bf16 %v5491_v36, %v5491_v36  ;;  %v1370_v11 = vpack.c.bf16 %v5493_v46, %v5493_v46  ;;  %v1371_v21 = vpack.c.bf16 %v5495_v6, %v5495_v6 }
 0x266   : > { %v1372_v54 = vpack.c.bf16 %v5497_v23, %v5497_v23  ;;  %v1373_v40 = vpack.c.bf16 %v5499_v47, %v5499_v47  ;;  %v1374_v52 = vpack.c.bf16 %v5501_v22, %v5501_v22  ;;  %v1375_v5 = vpack.c.bf16 %v5503_v56, %v5503_v56 }
 0x267   : > { %v1376_v36 = vpack.c.bf16 %v5505_v16, %v5505_v16  ;;  %v1377_v46 = vpack.c.bf16 %v5507_v34, %v5507_v34  ;;  %v1378_v6 = vpack.c.bf16 %v5509_v55, %v5509_v55  ;;  %v1379_v23 = vpack.c.bf16 %v5511_v26, %v5511_v26  ;;  %v6560_v45 = vld [vmem:[#allocation10_spill] sm:$0xff] }
 0x268   : > { %v1380_v47 = vpack.c.bf16 %v5513_v59, %v5513_v59  ;;  %v1381_v22 = vpack.c.bf16 %v5515_v60, %v5515_v60  ;;  %v1382_v56 = vpack.c.bf16 %v5517_v44, %v5517_v44  ;;  %v1383_v16 = vpack.c.bf16 %v5519_v49, %v5519_v49 }
 0x269   : > { %v1384_v34 = vpack.c.bf16 %v5521_v61, %v5521_v61  ;;  %v1385_v55 = vpack.c.bf16 %v5523_v0, %v5523_v0  ;;  %v1386_v26 = vpack.c.bf16 %v5525_v12, %v5525_v12  ;;  %v1387_v59 = vpack.c.bf16 %v5527_v35, %v5527_v35 }
 0x26a   : > { %v1388_v60 = vpack.c.bf16 %v5529_v24, %v5529_v24  ;;  %v1389_v44 = vpack.c.bf16 %v5531_v31, %v5531_v31  ;;  %v1390_v49 = vpack.c.bf16 %v5533_v13, %v5533_v13  ;;  %v1391_v61 = vpack.c.bf16 %v5535_v37, %v5535_v37 }
 0x26b   : > { %v1392_v0 = vpack.c.bf16 %v5537_v14, %v5537_v14  ;;  %v1393_v12 = vpack.c.bf16 %v5539_v2, %v5539_v2  ;;  %v1394_v35 = vpack.c.bf16 %v5541_v58, %v5541_v58  ;;  %v1395_v24 = vpack.c.bf16 %v5543_v38, %v5543_v38 }
 0x26c   : > { %v1396_v31 = vpack.c.bf16 %v5545_v18, %v5545_v18  ;;  %v1397_v13 = vpack.c.bf16 %v5547_v20, %v5547_v20  ;;  %v1398_v37 = vpack.c.bf16 %v5549_v15, %v5549_v15  ;;  %v1399_v14 = vpack.c.bf16 %v6560_v45, %v6560_v45 }
 0x26d   : > { %v1400_v2 = vpack.c.bf16 %v5553_v51, %v5553_v51  ;;  %v1401_v58 = vpack.c.bf16 %v5555_v1, %v5555_v1  ;;  %v1402_v38 = vpack.c.bf16 %v5557_v8, %v5557_v8  ;;  %v1403_v18 = vpack.c.bf16 %v5559_v39, %v5559_v39 }
 0x26e   : > { %v1404_v20 = vpack.c.bf16 %v5561_v4, %v5561_v4  ;;  %v5681_v45 = vunpack.c.l.b16 %v1352_v30  ;;  %v5683_v1 = vunpack.c.l.b16 %v1353_v10  ;;  %v5685_v8 = vunpack.c.l.b16 %v1354_v32 }
 0x26f   : > { %v5687_v39 = vunpack.c.l.b16 %v1355_v53  ;;  %v5689_v4 = vunpack.c.l.b16 %v1356_v17  ;;  %v5691_v15 = vunpack.c.l.b16 %v1357_v25  ;;  %v5693_v19 = vunpack.c.l.b16 %v1358_v28 }
 0x270   : > { %v5695_v3 = vunpack.c.l.b16 %v1359_v7  ;;  %v5697_v62 = vunpack.c.l.b16 %v1360_v50  ;;  %v5699_v9 = vunpack.c.l.b16 %v1361_v27  ;;  %v5701_v30 = vunpack.c.l.b16 %v1362_v42 }
 0x271   : > { %v5703_v10 = vunpack.c.l.b16 %v1363_v63  ;;  %v5705_v32 = vunpack.c.l.b16 %v1364_v48  ;;  %v5707_v53 = vunpack.c.l.b16 %v1365_v29  ;;  %v5709_v17 = vunpack.c.l.b16 %v1366_v43 }
 0x272   : > { %v5711_v25 = vunpack.c.l.b16 %v1367_v41  ;;  %v5713_v28 = vunpack.c.l.b16 %v1368_v57  ;;  %v5715_v7 = vunpack.c.l.b16 %v1369_v33  ;;  %v5717_v50 = vunpack.c.l.b16 %v1370_v11 }
 0x273   : > { %v5719_v27 = vunpack.c.l.b16 %v1371_v21  ;;  %v5721_v42 = vunpack.c.l.b16 %v1372_v54  ;;  %v5723_v63 = vunpack.c.l.b16 %v1373_v40  ;;  %v5725_v48 = vunpack.c.l.b16 %v1374_v52 }
 0x274   : > { %v5727_v29 = vunpack.c.l.b16 %v1375_v5  ;;  %v5729_v43 = vunpack.c.l.b16 %v1376_v36  ;;  %v5731_v41 = vunpack.c.l.b16 %v1377_v46  ;;  %v5733_v57 = vunpack.c.l.b16 %v1378_v6 }
 0x275   : > { %v5735_v33 = vunpack.c.l.b16 %v1379_v23  ;;  %v5737_v11 = vunpack.c.l.b16 %v1380_v47  ;;  %v5739_v21 = vunpack.c.l.b16 %v1381_v22  ;;  %v5741_v54 = vunpack.c.l.b16 %v1382_v56 }
 0x276   : > { %v5743_v40 = vunpack.c.l.b16 %v1383_v16  ;;  %v5745_v52 = vunpack.c.l.b16 %v1384_v34  ;;  %v5747_v5 = vunpack.c.l.b16 %v1385_v55  ;;  %v5749_v36 = vunpack.c.l.b16 %v1386_v26  ;;  %v4329_v26 = vld [vmem:[%s6395_s2 + $0x78] sm:$0xff] }
 0x277   : > { %v5751_v46 = vunpack.c.l.b16 %v1387_v59  ;;  %v5753_v6 = vunpack.c.l.b16 %v1388_v60  ;;  %v5755_v23 = vunpack.c.l.b16 %v1389_v44  ;;  %v5757_v47 = vunpack.c.l.b16 %v1390_v49  ;;  %1968 = vmatpush.bf16.msra.mxu1 %v4329_v26 }
 0x278   : > { %v5759_v22 = vunpack.c.l.b16 %v1391_v61  ;;  %v5761_v56 = vunpack.c.l.b16 %v1392_v0  ;;  %v5763_v16 = vunpack.c.l.b16 %v1393_v12  ;;  %v5765_v34 = vunpack.c.l.b16 %v1394_v35  ;;  %v4318_v61 = vld [vmem:[%s6395_s2 + $0x20] sm:$0xff] }
 0x279   : > { %v5767_v55 = vunpack.c.l.b16 %v1395_v24  ;;  %v5772_v59 = vunpack.c.l.b16 %v1396_v31  ;;  %v5774_v60 = vunpack.c.l.b16 %v1397_v13  ;;  %v5776_v44 = vunpack.c.l.b16 %v1398_v37  ;;  %v4335_v31 = vld [vmem:[%s6395_s2 + $0xa8] sm:$0xff]  ;;  %2072 = vmatpush.bf16.msrb.mxu2 %v4318_v61 }
 0x27a   : > { %v5778_v49 = vunpack.c.l.b16 %v1399_v14  ;;  %v5783_v0 = vunpack.c.l.b16 %v1400_v2  ;;  %v5785_v12 = vunpack.c.l.b16 %v1401_v58  ;;  %v5787_v35 = vunpack.c.l.b16 %v1402_v38  ;;  %v6562_v58 = vld [vmem:[#allocation11_spill] sm:$0xff]  ;;  %2239 = vmatpush.bf16.msra.mxu3 %v4335_v31 }
 0x27b   : > { %v5789_v24 = vunpack.c.l.b16 %v1403_v18  ;;  %v5794_v13 = vunpack.c.l.b16 %v1404_v20  ;;  %v1544_v37 = vrot.slane %v5681_v45, 7  ;;  %v1545_v14 = vrot.slane %v5683_v1, 6  ;;  %v4328_v20 = vld [vmem:[%s6395_s2 + $0x70] sm:$0xff] }
 0x27c   : > { %6561 = vst [vmem:[#allocation14_spill] sm:$0xff] %v5778_v49  ;;  %v1548_v2 = vrot.slane %v5685_v8, 5  ;;  %v6563_v38 = vpack.c.bf16 %v6562_v58, %v6562_v58  ;;  %v1551_v18 = vrot.slane %v5687_v39, 4  ;;  %v1554_v26 = vrot.slane %v5689_v4, 3  ;;  %v4317_v39 = vld [vmem:[%s6395_s2 + $0x18] sm:$0xff]  ;;  %1969 = vmatpush.bf16.msra.mxu1 %v4328_v20 }
 0x27d   : > { %v1557_v49 = vrot.slane %v5691_v15, 2  ;;  %v1547_v45 = vsel %vm1546_vm6, %v1545_v14, %v1544_v37  ;;  %v1563_v1 = vrot.slane %v5697_v62, 7  ;;  %v1564_v8 = vrot.slane %v5699_v9, 6  ;;  %v4334_v62 = vld [vmem:[%s6395_s2 + $0xa0] sm:$0xff]  ;;  %2073 = vmatpush.bf16.msrb.mxu2 %v4317_v39 }
 0x27e   : > { %v5802_v51 = vunpack.c.l.b16 %v6563_v38  ;;  %v1566_v61 = vrot.slane %v5701_v30, 5  ;;  %v1550_v4 = vsel %vm1549_vm7, %v1548_v2, %v1547_v45  ;;  %v1560_v15 = vrot.slane %v5693_v19, 1  ;;  %2240 = vmatpush.bf16.msra.mxu3 %v4334_v62  ;;  %v4327_v38 = vld [vmem:[%s6395_s2 + $0x68] sm:$0xff]  ;;  %v4326_v39 = vld [vmem:[%s6395_s2 + $0x60] sm:$0xff] }
 0x27f   : > { %v1568_v31 = vrot.slane %v5703_v10, 4  ;;  %v1570_v58 = vrot.slane %v5705_v32, 3  ;;  %v1553_v9 = vsel %vm1552_vm8, %v1551_v18, %v1550_v4  ;;  %v1565_v30 = vsel %vm1546_vm6, %v1564_v8, %v1563_v1 }
 0x280   : > { %v1572_v37 = vrot.slane %v5707_v53, 2  ;;  %v1576_v14 = vrot.slane %v5713_v28, 7  ;;  %v1556_v19 = vsel %vm1555_vm9, %v1554_v26, %v1553_v9  ;;  %v1567_v10 = vsel %vm1549_vm7, %v1566_v61, %v1565_v30  ;;  %v4316_v26 = vld [vmem:[%s6395_s2 + $0x10] sm:$0xff]  ;;  %1970 = vmatpush.bf16.msra.mxu1 %v4327_v38 }
 0x281   : > { %v1577_v32 = vrot.slane %v5715_v7, 6  ;;  %v1579_v2 = vrot.slane %v5717_v50, 5  ;;  %v1559_v18 = vsel %vm1558_vm10, %v1557_v49, %v1556_v19  ;;  %v1569_v53 = vsel %vm1552_vm8, %v1568_v31, %v1567_v10  ;;  %2074 = vmatpush.bf16.msrb.mxu2 %v4316_v26 }
 0x282   : > { %v1574_v28 = vrot.slane %v5709_v17, 1  ;;  %v1581_v20 = vrot.slane %v5719_v27, 4  ;;  %v5843_v7 = vsel %vm1561_vm11, %v1560_v15, %v1559_v18  ;;  %v1571_v50 = vsel %vm1555_vm9, %v1570_v58, %v1569_v53  ;;  %v4333_v17 = vld [vmem:[%s6395_s2 + $0x98] sm:$0xff]  ;;  %v6564_v58 = vld [vmem:[#allocation12_spill] sm:$0xff] }
 0x283   : > { %v1578_v45 = vsel %vm1546_vm6, %v1577_v32, %v1576_v14  ;;  %v1583_v1 = vrot.slane %v5721_v42, 3  ;;  %v1573_v27 = vsel %vm1558_vm10, %v1572_v37, %v1571_v50  ;;  %v1585_v8 = vrot.slane %v5723_v63, 2  ;;  %v4315_v42 = vld [vmem:[%s6395_s2 + $0x8] sm:$0xff]  ;;  %2241 = vmatpush.bf16.msra.mxu3 %v4333_v17  ;;  %v4325_v32 = vld [vmem:[%s6395_s2 + $0x58] sm:$0xff] }
 0x284   : > { %v1580_v49 = vsel %vm1549_vm7, %v1579_v2, %v1578_v45  ;;  %v1589_v61 = vrot.slane %v5729_v43, 7  ;;  %v5862_v4 = vsel %vm1561_vm11, %v1574_v28, %v1573_v27  ;;  %v1590_v31 = vrot.slane %v5731_v41, 6  ;;  %v4332_v43 = vld [vmem:[%s6395_s2 + $0x90] sm:$0xff]  ;;  %1971 = vmatpush.bf16.msra.mxu1 %v4326_v39 }
 0x285   : > { %v1582_v15 = vsel %vm1552_vm8, %v1581_v20, %v1580_v49  ;;  %v1592_v63 = vrot.slane %v5733_v57, 5  ;;  %v6565_v62 = vpack.c.bf16 %v6564_v58, %v6564_v58  ;;  %v1587_v37 = vrot.slane %v5725_v48, 1  ;;  %2075 = vmatpush.bf16.msrb.mxu2 %v4315_v42 }
 0x286   : > { %v1584_v30 = vsel %vm1555_vm9, %v1583_v1, %v1582_v15  ;;  %v1594_v14 = vrot.slane %v5735_v33, 4  ;;  %v1591_v57 = vsel %vm1546_vm6, %v1590_v31, %v1589_v61  ;;  %v1596_v19 = vrot.slane %v5737_v11, 3  ;;  %v4314_v11 = vld [vmem:[%s6395_s2] sm:$0xff]  ;;  %v4324_v1 = vld [vmem:[%s6395_s2 + $0x50] sm:$0xff] }
 0x287   : > { %v5873_v9 = vunpack.c.l.b16 %v6565_v62  ;;  %v1586_v41 = vsel %vm1558_vm10, %v1585_v8, %v1584_v30  ;;  %v1602_v10 = vrot.slane %v5745_v52, 7  ;;  %v1593_v48 = vsel %vm1549_vm7, %v1592_v63, %v1591_v57  ;;  %2242 = vmatpush.bf16.msra.mxu3 %v4332_v43  ;;  %v4330_v61 = vld [vmem:[%s6395_s2 + $0x80] sm:$0xff] }
 0x288   : > { %v5886_v2 = vsel %vm1561_vm11, %v1587_v37, %v1586_v41  ;;  %v1603_v33 = vrot.slane %v5747_v5, 6  ;;  %v1605_v38 = vrot.slane %v5749_v36, 5  ;;  %v1595_v52 = vsel %vm1552_vm8, %v1594_v14, %v1593_v48  ;;  %v4331_v5 = vld [vmem:[%s6395_s2 + $0x88] sm:$0xff]  ;;  %1972 = vmatpush.bf16.msra.mxu1 %v4325_v32 }
 0x289   : > { %v1598_v18 = vrot.slane %v5739_v21, 2  ;;  %v1600_v53 = vrot.slane %v5741_v54, 1  ;;  %v1607_v28 = vrot.slane %v5751_v46, 4  ;;  %v1597_v36 = vsel %vm1555_vm9, %v1596_v19, %v1595_v52  ;;  %2076 = vmatpush.bf16.msrb.mxu2 %v4314_v11  ;;  %v6566_v37 = vld [vmem:[#allocation13_spill] sm:$0xff]  ;;  %v1702_v11 = vld [vmem:[#allocation2 + $0x14] sm:$0x1] }
 0x28a   : > { %v1604_v20 = vsel %vm1546_vm6, %v1603_v33, %v1602_v10  ;;  %v1609_v26 = vrot.slane %v5753_v6, 3  ;;  %v1615_v50 = vrot.slane %v5761_v56, 7  ;;  %v1616_v54 = vrot.slane %v5763_v16, 6  ;;  %v1696_v32 = vld [vmem:[#allocation2 + $0xc] sm:$0x1] }
 0x28b   : > { %v1599_v45 = vsel %vm1558_vm10, %v1598_v18, %v1597_v36  ;;  %v1606_v21 = vsel %vm1549_vm7, %v1605_v38, %v1604_v20  ;;  %v1618_v46 = vrot.slane %v5765_v34, 5  ;;  %v1611_v56 = vrot.slane %v5755_v23, 2  ;;  %2243 = vmatpush.bf16.msra.mxu3 %v4331_v5  ;;  %v4357_v23 = vld [vmem:[%s6395_s2 + $0x138] sm:$0xff]  ;;  %v1690_v36 = vld [vmem:[#allocation2 + $0x8] sm:$0xf] }
 0x28c   : > { %v5913_v17 = vsel %vm1561_vm11, %v1600_v53, %v1599_v45  ;;  %v1608_v6 = vsel %vm1552_vm8, %v1607_v28, %v1606_v21  ;;  %v1613_v27 = vrot.slane %v5757_v47, 1  ;;  %v1617_v16 = vsel %vm1546_vm6, %v1616_v54, %v1615_v50  ;;  %1973 = vmatpush.bf16.msra.mxu1 %v4324_v1  ;;  %v1708_v52 = vld [vmem:[#allocation2 + $0x1c] sm:$0x1]  ;;  %v1714_v53 = vld [vmem:[#allocation2 + $0x24] sm:$0x1] }
 0x28d   : > { %v1610_v49 = vsel %vm1555_vm9, %v1609_v26, %v1608_v6  ;;  %v1620_v34 = vrot.slane %v5767_v55, 4  ;;  %v1622_v8 = vrot.slane %v5772_v59, 3  ;;  %v1619_v39 = vsel %vm1549_vm7, %v1618_v46, %v1617_v16  ;;  %v4365_v55 = vld [vmem:[%s6395_s2 + $0x178] sm:$0xff]  ;;  %2615 = vmatpush.bf16.msra.mxu2 %v4357_v23  ;;  %v1726_v20 = vld [vmem:[#allocation2 + $0x34] sm:$0x1] }
 0x28e   : > { %v1612_v47 = vsel %vm1558_vm10, %v1611_v56, %v1610_v49  ;;  %v1628_v42 = vrot.slane %v5783_v0, 7  ;;  %v1629_v15 = vrot.slane %v5785_v12, 6  ;;  %v1624_v63 = vrot.slane %v5774_v60, 2  ;;  %v4323_v0 = vld [vmem:[%s6395_s2 + $0x48] sm:$0xff]  ;;  %v1732_v21 = vld [vmem:[#allocation2 + $0x3c] sm:$0x1] }
 0x28f   : > { %v5936_v59 = vsel %vm1561_vm11, %v1613_v27, %v1612_v47  ;;  %v1621_v31 = vsel %vm1552_vm8, %v1620_v34, %v1619_v39  ;;  %v1631_v43 = vrot.slane %v5787_v35, 5  ;;  %v1626_v58 = vrot.slane %v5776_v44, 1  ;;  %2244 = vmatpush.bf16.msra.mxu3 %v4330_v61  ;;  %v4349_v1 = vld [vmem:[%s6395_s2 + $0xf8] sm:$0xff]  ;;  %v1699_v6 = vld [vmem:[#allocation2 + $0x10] sm:$0xf] }
 0x290   : > { %v1623_v12 = vsel %vm1555_vm9, %v1622_v8, %v1621_v31  ;;  %v1630_v62 = vsel %vm1546_vm6, %v1629_v15, %v1628_v42  ;;  %v1633_v30 = vrot.slane %v5789_v24, 4  ;;  %v6567_v14 = vpack.c.bf16 %v6566_v37, %v6566_v37  ;;  %1974 = vmatpush.bf16.msra.mxu1 %v4323_v0  ;;  %v4364_v49 = vld [vmem:[%s6395_s2 + $0x170] sm:$0xff]  ;;  %v1705_v16 = vld [vmem:[#allocation2 + $0x18] sm:$0xf]  ;;  %v1741_v61 = vld [vmem:[#allocation2] sm:$0xf] }
 0x291   : > { %v1625_v35 = vsel %vm1558_vm10, %v1624_v63, %v1623_v12  ;;  %v1632_v41 = vsel %vm1549_vm7, %v1631_v43, %v1630_v62  ;;  %v1635_v57 = vrot.slane %v5794_v13, 3  ;;  %v1637_v10 = vrot.slane %v5802_v51, 2  ;;  %v4356_v51 = vld [vmem:[%s6395_s2 + $0x130] sm:$0xff]  ;;  %v1711_v23 = vld [vmem:[#allocation2 + $0x20] sm:$0xf]  ;;  %v4361_v15 = vld [vmem:[%s6395_s2 + $0x158] sm:$0xff] }
 0x292   : > { %v1535_v60 = vunpack.c.l.b16 %v6567_v14  ;;  %v5955_v19 = vsel %vm1561_vm11, %v1626_v58, %v1625_v35  ;;  %v1634_v44 = vsel %vm1552_vm8, %v1633_v30, %v1632_v41  ;;  %v1655_v24 = vpack.c.b16 %v5695_v3, %v5695_v3  ;;  %2616 = vmatpush.bf16.msra.mxu2 %v4356_v51  ;;  %v1717_v47 = vld [vmem:[#allocation2 + $0x28] sm:$0xf]  ;;  %v1723_v42 = vld [vmem:[#allocation2 + $0x30] sm:$0xf]  ;;  %v1729_v63 = vld [vmem:[#allocation2 + $0x38] sm:$0xf] }
 0x293   : > { %2788 = vmatpush.bf16.msrb.mxu3 %v4365_v55  ;;  %v1636_v48 = vsel %vm1555_vm9, %v1635_v57, %v1634_v44  ;;  %v1639_v33 = vrot.slane %v5873_v9, 1  ;;  %v1657_v13 = vpack.c.b16 %v5711_v25, %v5711_v25  ;;  %v1659_v38 = vpack.c.b16 %v5727_v29, %v5727_v29  ;;  %v1720_v9 = vld [vmem:[#allocation2 + $0x2c] sm:$0x1]  ;;  %v6568_v29 = vld [vmem:[#allocation14_spill] sm:$0xff]  ;;  %v1765_v0 = vld [vmem:[#allocation2 + $0x4] sm:$0x1] }
 0x294   : > { %v1638_v3 = vsel %vm1558_vm10, %v1637_v10, %v1636_v48  ;;  %v1661_v18 = vpack.c.b16 %v5743_v40, %v5743_v40  ;;  %v1663_v25 = vpack.c.b16 %v5759_v22, %v5759_v22  ;;  %v1665_v5 = vpack.c.b16 %v6568_v29, %v6568_v29  ;;  %v4322_v40 = vld [vmem:[%s6395_s2 + $0x40] sm:$0xff]  ;;  %v4348_v31 = vld [vmem:[%s6395_s2 + $0xf0] sm:$0xff]  ;;  %v4355_v14 = vld [vmem:[%s6395_s2 + $0x128] sm:$0xff] }
 0x295   : > { %v5974_v28 = vsel %vm1561_vm11, %v1639_v33, %v1638_v3  ;;  %v1667_v26 = vpack.c.b16 %v1535_v60, %v1535_v60  ;;  %v1697_v45 = vsel %vm5059_vm14, %v1655_v24, %v1696_v32  ;;  %v1654_v54 = vpack.c.b16 %v5843_v7, %v5843_v7  ;;  %1975 = vmatpush.bf16.msra.mxu1 %v4322_v40  ;;  %v2098_v37 = vld [vmem:[#allocation2] sm:$0xe]  ;;  %v4363_v60 = vld [vmem:[%s6395_s2 + $0x168] sm:$0xff] }
 0x296   : > { %1698 = vst [vmem:[#allocation2 + $0xc] sm:$0x1] %v1697_v45  ;;  %v1703_v22 = vsel %vm5059_vm14, %v1657_v13, %v1702_v11  ;;  %v1709_v46 = vsel %vm5059_vm14, %v1659_v38, %v1708_v52  ;;  %v1656_v56 = vpack.c.b16 %v5862_v4, %v5862_v4  ;;  %v1715_v27 = vsel %vm5059_vm14, %v1661_v18, %v1714_v53  ;;  %v3947_v38 = vld [vmem:[#allocation2] sm:$0xf]  ;;  %v4347_v51 = vld [vmem:[%s6395_s2 + $0xe8] sm:$0xff] }
 0x297   : > { %1704 = vst [vmem:[#allocation2 + $0x14] sm:$0x1] %v1703_v22  ;;  %v1721_v7 = vsel %vm5059_vm14, %v1663_v25, %v1720_v9  ;;  %v1658_v34 = vpack.c.b16 %v5886_v2, %v5886_v2  ;;  %v1660_v8 = vpack.c.b16 %v5913_v17, %v5913_v17  ;;  %v1727_v4 = vsel %vm5059_vm14, %v1665_v5, %v1726_v20  ;;  %v4354_v11 = vld [vmem:[%s6395_s2 + $0x120] sm:$0xff] }
 0x298   : > { %1710 = vst [vmem:[#allocation2 + $0x1c] sm:$0x1] %v1709_v46  ;;  %v1733_v39 = vsel %vm5059_vm14, %v1667_v26, %v1732_v21  ;;  %2789 = vmatpush.bf16.msrb.mxu3 %v4364_v49  ;;  %v1662_v2 = vpack.c.b16 %v5936_v59, %v5936_v59  ;;  %v1664_v17 = vpack.c.b16 %v5955_v19, %v5955_v19  ;;  %v1777_v12 = vshrl.u32 %v1741_v61, 16 }
 0x299   : > { %1716 = vst [vmem:[#allocation2 + $0x24] sm:$0x1] %v1715_v27  ;;  %v1691_v55 = vsel %vm5104_vm15, %v1654_v54, %v1690_v36  ;;  %2370 = vmatpush.bf16.msrb.mxu1 %v4349_v1  ;;  %v1700_v43 = vsel %vm5104_vm15, %v1656_v56, %v1699_v6  ;;  %v1780_v59 = vshll.u32 %v1741_v61, 16  ;;  %v1666_v58 = vpack.c.b16 %v5974_v28, %v5974_v28  ;;  %v4362_v27 = vld [vmem:[%s6395_s2 + $0x160] sm:$0xff] }
 0x29a   : > { %1722 = vst [vmem:[#allocation2 + $0x2c] sm:$0x1] %v1721_v7  ;;  %v1706_v62 = vsel %vm5104_vm15, %v1658_v34, %v1705_v16  ;;  %v1712_v30 = vsel %vm5104_vm15, %v1660_v8, %v1711_v23  ;;  %v1779_v35 = vrot.slane %v1777_v12, 4  ;;  %v1718_v57 = vsel %vm5104_vm15, %v1662_v2, %v1717_v47  ;;  %2617 = vmatpush.bf16.msra.mxu2 %v4355_v14  ;;  %v4346_v8 = vld [vmem:[%s6395_s2 + $0xe0] sm:$0xff] }
 0x29b   : > { %1728 = vst [vmem:[#allocation2 + $0x34] sm:$0x1] %v1727_v4  ;;  %v1782_v41 = vrot.slane %v1780_v59, 5  ;;  %v1724_v19 = vsel %vm5104_vm15, %v1664_v17, %v1723_v42  ;;  %v3993_v44 = vrot.slane %v2098_v37, 9  ;;  %v2127_v10 = vrot.slane %v1765_v0, 5  ;;  %v4353_v17 = vld [vmem:[%s6395_s2 + $0x118] sm:$0xff] }
 0x29c   : > { %1734 = vst [vmem:[#allocation2 + $0x3c] sm:$0x1] %v1733_v39  ;;  %v1786_v32 = vshll.u32 %v1765_v0, 16  ;;  %2790 = vmatpush.bf16.msrb.mxu3 %v4363_v60  ;;  %v1730_v48 = vsel %vm5104_vm15, %v1666_v58, %v1729_v63  ;;  %vm3616_vm15 = vcmask 1041409  }
 0x29d   : > { %1692 = vst [vmem:[#allocation2 + $0x8] sm:$0xf] %v1691_v55  ;;  %2371 = vmatpush.bf16.msrb.mxu1 %v4348_v31  ;;  %v1783_v24 = vor.u32 %v1782_v41, %v1779_v35  ;;  %v1766_v33 = vld [vmem:[#allocation2 + $0xc] sm:$0x1]  ;;  %v2128_v52 = vsel %vm6042_vm2, %v3993_v44, %v2127_v10  ;;  %v4352_v44 = vld [vmem:[%s6395_s2 + $0x110] sm:$0xff] }
 0x29e   : > { %1701 = vst [vmem:[#allocation2 + $0x10] sm:$0xf] %v1700_v43  ;;  %v2131_v3 = vrot.slane %v1766_v33, 5  ;;  %v1788_v53 = vrot.slane %v1786_v32, 5  ;;  %2618 = vmatpush.bf16.msra.mxu2 %v4354_v11  ;;  %v2173_v50 = vunpack.c.l.b16 %v2128_v52  ;;  %v1800_v45 = vshll.u32 %v1766_v33, 16 }
 0x29f   : > { %1707 = vst [vmem:[#allocation2 + $0x18] sm:$0xf] %v1706_v62  ;;  %v1784_v18 = vrot.slane %v1783_v24, 4  ;;  %v1767_v12 = vld [vmem:[#allocation2 + $0x14] sm:$0x1] }
 0x2a0   : > { %1713 = vst [vmem:[#allocation2 + $0x20] sm:$0xf] %v1712_v30  ;;  %2791 = vmatpush.bf16.msrb.mxu3 %v4362_v27  ;;  %v1802_v23 = vrot.slane %v1800_v45, 5  ;;  %v1768_v59 = vld [vmem:[#allocation2 + $0x1c] sm:$0x1]  ;;  %v2135_v14 = vrot.slane %v1767_v12, 5 }
 0x2a1   : > { %1719 = vst [vmem:[#allocation2 + $0x28] sm:$0xf] %v1718_v57  ;;  %2372 = vmatpush.bf16.msrb.mxu1 %v4347_v51  ;;  %v1789_v6 = vsel %vm6056_vm5, %v1784_v18, %v1788_v53  ;;  %v2139_v60 = vrot.slane %v1768_v59, 5  ;;  %v1814_v32 = vshll.u32 %v1767_v12, 16  ;;  %v4359_v27 = vld [vmem:[%s6395_s2 + $0x148] sm:$0xff] }
 0x2a2   : > { %1725 = vst [vmem:[#allocation2 + $0x30] sm:$0xf] %v1724_v19  ;;  %v1904_v39 = vunpack.c.l.b16 %v1789_v6  ;;  %2619 = vmatpush.bf16.msra.mxu2 %v4353_v17  ;;  %v4345_v19 = vld [vmem:[%s6395_s2 + $0xd8] sm:$0xff] }
 0x2a3   : > { %1731 = vst [vmem:[#allocation2 + $0x38] sm:$0xf] %v1730_v48  ;;  %v1828_v48 = vshll.u32 %v1768_v59, 16  ;;  %v1816_v53 = vrot.slane %v1814_v32, 5 }
 0x2a4   : > { %v4310_v9 = vld [vmem:[#allocation2 + $0x4] sm:$0xf0]  ;;  %2792 = vmatpush.bf16.msrb.mxu3 %v4361_v15 }
 0x2a5   : > { %v2099_v28 = vld [vmem:[#allocation2 + $0x8] sm:$0xe]  ;;  %v3948_v29 = vor.u32 %v4310_v9, %v3947_v38  ;;  %v1743_v22 = vld [vmem:[#allocation2 + $0x10] sm:$0xf]  ;;  %2373 = vmatpush.bf16.msrb.mxu1 %v4346_v8  ;;  %v1830_v9 = vrot.slane %v1828_v48, 5 }
 0x2a6   : > { %v1742_v25 = vld [vmem:[#allocation2 + $0x8] sm:$0xf]  ;;  %v3994_v5 = vrot.slane %v2099_v28, 9  ;;  %v1744_v46 = vld [vmem:[#allocation2 + $0x18] sm:$0xf]  ;;  %v1805_v56 = vshrl.u32 %v1743_v22, 16  ;;  %2620 = vmatpush.bf16.msra.mxu2 %v4352_v44 }
 0x2a7   : > { %v1791_v20 = vshrl.u32 %v1742_v25, 16  ;;  %v1794_v26 = vshll.u32 %v1742_v25, 16  ;;  %2077 = vmatmul.bf16.vlgmr.msrb.gmra.mxu2 %v3948_v29  ;;  %v1808_v49 = vshll.u32 %v1743_v22, 16  ;;  %v1819_v16 = vshrl.u32 %v1744_v46, 16  ;;  %v2100_v47 = vld [vmem:[#allocation2 + $0x10] sm:$0xe] }
 0x2a8   : > { %v2132_v40 = vsel %vm6042_vm2, %v3994_v5, %v2131_v3  ;;  %v1822_v34 = vshll.u32 %v1744_v46, 16  ;;  %v2101_v42 = vld [vmem:[#allocation2 + $0x18] sm:$0xe]  ;;  %v1807_v2 = vrot.slane %v1805_v56, 4  ;;  %v3995_v58 = vrot.slane %v2100_v47, 9  ;;  %v4360_v28 = vld [vmem:[%s6395_s2 + $0x150] sm:$0xff] }
 0x2a9   : > { %v1793_v21 = vrot.slane %v1791_v20, 4  ;;  %v1796_v54 = vrot.slane %v1794_v26, 5  ;;  %v2174_v1 = vunpack.c.l.b16 %v2132_v40  ;;  %v1810_v31 = vrot.slane %v1808_v49, 5  ;;  %v3951_v37 = vld [vmem:[#allocation2 + $0x10] sm:$0xf]  ;;  %2374 = vmatpush.bf16.msrb.mxu1 %v4345_v19  ;;  %2793 = vmatpush.bf16.msrb.mxu3 %v4360_v28  ;;  %v4351_v56 = vld [vmem:[%s6395_s2 + $0x108] sm:$0xff] }
 0x2aa   : > { %v1821_v63 = vrot.slane %v1819_v16, 4  ;;  %v1824_v43 = vrot.slane %v1822_v34, 5  ;;  %v3996_v62 = vrot.slane %v2101_v42, 9  ;;  %v4311_v57 = vld [vmem:[#allocation2 + $0x14] sm:$0xf0]  ;;  %v2136_v10 = vsel %vm6042_vm2, %v3995_v58, %v2135_v14  ;;  %v4344_v25 = vld [vmem:[%s6395_s2 + $0xd0] sm:$0xff]  ;;  %2621 = vmatpush.bf16.msra.mxu2 %v4351_v56 }
 0x2ab   : > { %v1797_v7 = vor.u32 %v1796_v54, %v1793_v21  ;;  %v2181_v4 = vpack.c.b16 %v2174_v1, %v2173_v50  ;;  %v1811_v35 = vor.u32 %v1810_v31, %v1807_v2  ;;  %v3952_v33 = vor.u32 %v4311_v57, %v3951_v37  ;;  %v1745_v11 = vld [vmem:[#allocation2 + $0x20] sm:$0xf]  ;;  %v1746_v18 = vld [vmem:[#allocation2 + $0x28] sm:$0xf]  ;;  %v1769_v16 = vld [vmem:[#allocation2 + $0x24] sm:$0x1] }
 0x2ac   : > { %v1825_v41 = vor.u32 %v1824_v43, %v1821_v63  ;;  %v2140_v24 = vsel %vm6042_vm2, %v3996_v62, %v2139_v60  ;;  %v2175_v52 = vunpack.c.l.b16 %v2136_v10  ;;  %v1833_v29 = vshrl.u32 %v1745_v11, 16  ;;  %v2102_v21 = vld [vmem:[#allocation2 + $0x20] sm:$0xe]  ;;  %v2103_v46 = vld [vmem:[#allocation2 + $0x28] sm:$0xe] }
 0x2ad   : > { %v1798_v61 = vrot.slane %v1797_v7, 4  ;;  %2245 = vmatmul.bf16.vlgmr.msra.gmra.mxu3 %v2181_v4  ;;  %v1812_v38 = vrot.slane %v1811_v35, 4  ;;  %v2176_v3 = vunpack.c.l.b16 %v2140_v24  ;;  %v1836_v5 = vshll.u32 %v1745_v11, 16  ;;  %2375 = vmatpush.bf16.msrb.mxu1 %v4344_v25  ;;  %v1770_v34 = vld [vmem:[#allocation2 + $0x2c] sm:$0x1]  ;;  %v4350_v31 = vld [vmem:[%s6395_s2 + $0x100] sm:$0xff] }
 0x2ae   : > { %v1826_v51 = vrot.slane %v1825_v41, 4  ;;  %v1847_v50 = vshrl.u32 %v1746_v18, 16  ;;  %v1850_v45 = vshll.u32 %v1746_v18, 16  ;;  %v1835_v1 = vrot.slane %v1833_v29, 4  ;;  %2794 = vmatpush.bf16.msrb.mxu3 %v4359_v27  ;;  %v3955_v47 = vld [vmem:[#allocation2 + $0x20] sm:$0xf]  ;;  %2622 = vmatpush.bf16.msra.mxu2 %v4350_v31 }
 0x2af   : > { %v1803_v55 = vsel %vm6056_vm5, %v1798_v61, %v1802_v23  ;;  %v1817_v20 = vsel %vm6056_vm5, %v1812_v38, %v1816_v53  ;;  %v2182_v40 = vpack.c.b16 %v2176_v3, %v2175_v52  ;;  %v1838_v6 = vrot.slane %v1836_v5, 5  ;;  %v4312_v17 = vld [vmem:[#allocation2 + $0x24] sm:$0xf0]  ;;  %v1747_v62 = vld [vmem:[#allocation2 + $0x30] sm:$0xf]  ;;  %v4358_v41 = vld [vmem:[%s6395_s2 + $0x140] sm:$0xff] }
 0x2b0   : > { %v1905_v0 = vunpack.c.l.b16 %v1803_v55  ;;  %v1831_v26 = vsel %vm6056_vm5, %v1826_v51, %v1830_v9  ;;  %v1906_v54 = vunpack.c.l.b16 %v1817_v20  ;;  %v1849_v7 = vrot.slane %v1847_v50, 4  ;;  %v4343_v55 = vld [vmem:[%s6395_s2 + $0xc8] sm:$0xff]  ;;  %v1748_v60 = vld [vmem:[#allocation2 + $0x38] sm:$0xf]  ;;  %v4342_v57 = vld [vmem:[%s6395_s2 + $0xc0] sm:$0xff] }
 0x2b1   : > { %v1907_v22 = vunpack.c.l.b16 %v1831_v26  ;;  %v1852_v49 = vrot.slane %v1850_v45, 5  ;;  %v3997_v8 = vrot.slane %v2102_v21, 9  ;;  %v3998_v4 = vrot.slane %v2103_v46, 9  ;;  %2376 = vmatpush.bf16.msrb.mxu1 %v4343_v55  ;;  %v2104_v38 = vld [vmem:[#allocation2 + $0x30] sm:$0xe]  ;;  %v4385_v53 = vld [vmem:[%s6395_s2 + $0x1f8] sm:$0xff] }
 0x2b2   : > { %v1912_v30 = vpack.c.b16 %v1905_v0, %v1904_v39  ;;  %v1839_v23 = vor.u32 %v1838_v6, %v1835_v1  ;;  %v2143_v39 = vrot.slane %v1769_v16, 5  ;;  %v2147_v42 = vrot.slane %v1770_v34, 5  ;;  %2795 = vmatpush.bf16.msrb.mxu3 %v4358_v41  ;;  %v2407_v51 = vld [vmem:[#allocation2 + $0x8] sm:$0xf]  ;;  %v2409_v11 = vld [vmem:[#allocation2 + $0x10] sm:$0xf]  ;;  %3167 = vmatpush.bf16.msrb.mxu2 %v4385_v53 }
 0x2b3   : > { %v1913_v61 = vpack.c.b16 %v1907_v22, %v1906_v54  ;;  %v1853_v2 = vor.u32 %v1852_v49, %v1849_v7  ;;  %v1842_v15 = vshll.u32 %v1769_v16, 16  ;;  %v1856_v0 = vshll.u32 %v1770_v34, 16  ;;  %v2105_v18 = vld [vmem:[#allocation2 + $0x38] sm:$0xe]  ;;  %v1771_v28 = vld [vmem:[#allocation2 + $0x34] sm:$0x1] }
 0x2b4   : > { %1976 = vmatmul.bf16.vlgmr.msra.gmra.mxu1 %v1912_v30  ;;  %v2144_v63 = vsel %vm6042_vm2, %v3997_v8, %v2143_v39  ;;  %v2148_v43 = vsel %vm6042_vm2, %v3998_v4, %v2147_v42  ;;  %v1840_v12 = vrot.slane %v1839_v23, 4  ;;  %v3956_v59 = vor.u32 %v4312_v17, %v3955_v47  ;;  %v4393_v9 = vld [vmem:[%s6395_s2 + $0x238] sm:$0xff]  ;;  %v3959_v1 = vld [vmem:[#allocation2 + $0x30] sm:$0xf]  ;;  %v2408_v31 = vld [vmem:[#allocation2 + $0xc] sm:$0x1] }
 0x2b5   : > { %v1854_v58 = vrot.slane %v1853_v2, 4  ;;  %v2177_v30 = vunpack.c.l.b16 %v2144_v63  ;;  %v2178_v37 = vunpack.c.l.b16 %v2148_v43  ;;  %v1844_v14 = vrot.slane %v1842_v15, 5  ;;  %2377 = vmatpush.bf16.msrb.mxu1 %v4342_v57  ;;  %v1772_v26 = vld [vmem:[#allocation2 + $0x3c] sm:$0x1]  ;;  %v4313_v6 = vld [vmem:[#allocation2 + $0x34] sm:$0xf0] }
 0x2b6   : > { %v1858_v35 = vrot.slane %v1856_v0, 5  ;;  %v1861_v44 = vshrl.u32 %v1747_v62, 16  ;;  %v1864_v24 = vshll.u32 %v1747_v62, 16  ;;  %v1875_v32 = vshrl.u32 %v1748_v60, 16  ;;  %3340 = vmatpush.bf16.msra.mxu3 %v4393_v9  ;;  %v4384_v23 = vld [vmem:[%s6395_s2 + $0x1f0] sm:$0xff] }
 0x2b7   : > { %2082 = vmatmul.bf16.gmra.mxu2 %v3952_v33  ;;  %v1845_v19 = vsel %vm6056_vm5, %v1840_v12, %v1844_v14  ;;  %v1878_v48 = vshll.u32 %v1748_v60, 16  ;;  %v2183_v33 = vpack.c.b16 %v2178_v37, %v2177_v30  ;;  %v2424_v50 = vshrl.u32 %v2407_v51, 16  ;;  %v2410_v63 = vld [vmem:[#allocation2 + $0x14] sm:$0x1] }
 0x2b8   : > { %v1859_v10 = vsel %vm6056_vm5, %v1854_v58, %v1858_v35  ;;  %v1908_v52 = vunpack.c.l.b16 %v1845_v19  ;;  %v1863_v25 = vrot.slane %v1861_v44, 4  ;;  %v1866_v29 = vrot.slane %v1864_v24, 5  ;;  %3168 = vmatpush.bf16.msrb.mxu2 %v4384_v23  ;;  %v4392_v30 = vld [vmem:[%s6395_s2 + $0x230] sm:$0xff]  ;;  %v2652_v24 = vld [vmem:[#allocation2 + $0x8] sm:$0xe] }
 0x2b9   : > { %v1909_v3 = vunpack.c.l.b16 %v1859_v10  ;;  %v1877_v5 = vrot.slane %v1875_v32, 4  ;;  %v1880_v20 = vrot.slane %v1878_v48, 5  ;;  %v2427_v45 = vshll.u32 %v2407_v51, 16  ;;  %v4376_v37 = vld [vmem:[%s6395_s2 + $0x1b0] sm:$0xff]  ;;  %v2411_v10 = vld [vmem:[#allocation2 + $0x18] sm:$0xf] }
 0x2ba   : > { %v2441_v21 = vshll.u32 %v2409_v11, 16  ;;  %v3999_v54 = vrot.slane %v2104_v38, 9  ;;  %v4000_v22 = vrot.slane %v2105_v18, 9  ;;  %v2151_v56 = vrot.slane %v1771_v28, 5  ;;  %3341 = vmatpush.bf16.msra.mxu3 %v4392_v30  ;;  %v2413_v32 = vld [vmem:[#allocation2 + $0x20] sm:$0xf] }
 0x2bb   : > { %v1914_v46 = vpack.c.b16 %v1909_v3, %v1908_v52  ;;  %v2155_v27 = vrot.slane %v1772_v26, 5  ;;  %v1867_v7 = vor.u32 %v1866_v29, %v1863_v25  ;;  %v1881_v49 = vor.u32 %v1880_v20, %v1877_v5  ;;  %v4383_v52 = vld [vmem:[%s6395_s2 + $0x1e8] sm:$0xff] }
 0x2bc   : > { %v2426_v16 = vrot.slane %v2424_v50, 4  ;;  %v2429_v34 = vrot.slane %v2427_v45, 5  ;;  %v2443_v4 = vrot.slane %v2441_v21, 5  ;;  %v2152_v47 = vsel %vm6042_vm2, %v3999_v54, %v2151_v56  ;;  %v4391_v3 = vld [vmem:[%s6395_s2 + $0x228] sm:$0xff]  ;;  %3169 = vmatpush.bf16.msrb.mxu2 %v4383_v52  ;;  %v4382_v56 = vld [vmem:[%s6395_s2 + $0x1e0] sm:$0xff] }
 0x2bd   : > { %2250 = vmatmul.bf16.gmra.mxu3 %v2182_v40  ;;  %v2438_v40 = vshrl.u32 %v2409_v11, 16  ;;  %v2156_v39 = vsel %vm6042_vm2, %v4000_v22, %v2155_v27  ;;  %v1870_v42 = vshll.u32 %v1771_v28, 16  ;;  %v1884_v2 = vshll.u32 %v1772_v26, 16  ;;  %v2653_v11 = vld [vmem:[#allocation2 + $0x10] sm:$0xe] }
 0x2be   : > { %v3960_v17 = vor.u32 %v4313_v6, %v3959_v1  ;;  %v1868_v15 = vrot.slane %v1867_v7, 4  ;;  %v1882_v55 = vrot.slane %v1881_v49, 4  ;;  %v2179_v43 = vunpack.c.l.b16 %v2152_v47  ;;  %3342 = vmatpush.bf16.msra.mxu3 %v4391_v3  ;;  %v4375_v6 = vld [vmem:[%s6395_s2 + $0x1a8] sm:$0xff]  ;;  %v2412_v49 = vld [vmem:[#allocation2 + $0x1c] sm:$0x1] }
 0x2bf   : > { %v2440_v8 = vrot.slane %v2438_v40, 4  ;;  %v2180_v0 = vunpack.c.l.b16 %v2156_v39  ;;  %v2430_v12 = vor.u32 %v2429_v34, %v2426_v16  ;;  %v1872_v58 = vrot.slane %v1870_v42, 5  ;;  %v2414_v34 = vld [vmem:[#allocation2 + $0x24] sm:$0x1]  ;;  %v4035_v30 = vld [vmem:[#allocation2 + $0x8] sm:$0xf] }
 0x2c0   : > { %v1886_v62 = vrot.slane %v1884_v2, 5  ;;  %v2433_v14 = vshll.u32 %v2408_v31, 16  ;;  %v2447_v60 = vshll.u32 %v2410_v63, 16  ;;  %v2452_v18 = vshrl.u32 %v2411_v10, 16  ;;  %3170 = vmatpush.bf16.msrb.mxu2 %v4382_v56  ;;  %v4390_v39 = vld [vmem:[%s6395_s2 + $0x220] sm:$0xff] }
 0x2c1   : > { %v1873_v35 = vsel %vm6056_vm5, %v1868_v15, %v1872_v58  ;;  %v2184_v57 = vpack.c.b16 %v2180_v0, %v2179_v43  ;;  %v2431_v19 = vrot.slane %v2430_v12, 4  ;;  %v2455_v53 = vshll.u32 %v2411_v10, 16  ;;  %v4374_v42 = vld [vmem:[%s6395_s2 + $0x1a0] sm:$0xff]  ;;  %v2654_v43 = vld [vmem:[#allocation2 + $0x18] sm:$0xe] }
 0x2c2   : > { %v1887_v41 = vsel %vm6056_vm5, %v1882_v55, %v1886_v62  ;;  %v1910_v48 = vunpack.c.l.b16 %v1873_v35  ;;  %v2435_v38 = vrot.slane %v2433_v14, 5  ;;  %v2449_v51 = vrot.slane %v2447_v60, 5  ;;  %3343 = vmatpush.bf16.msra.mxu3 %v4390_v39  ;;  %v2417_v0 = vld [vmem:[#allocation2 + $0x30] sm:$0xf]  ;;  %v4381_v58 = vld [vmem:[%s6395_s2 + $0x1d8] sm:$0xff] }
 0x2c3   : > { %v2466_v25 = vshrl.u32 %v2413_v32, 16  ;;  %v2469_v29 = vshll.u32 %v2413_v32, 16  ;;  %v4113_v5 = vrot.slane %v2652_v24, 9  ;;  %v4114_v20 = vrot.slane %v2653_v11, 9  ;;  %v4389_v62 = vld [vmem:[%s6395_s2 + $0x218] sm:$0xff] }
 0x2c4   : > { %1981 = vmatmul.bf16.gmra.mxu1 %v1913_v61  ;;  %v4377_v61 = vld [vmem:[%s6395_s2 + $0x1b8] sm:$0xff]  ;;  %v2436_v9 = vsel %vm6056_vm5, %v2431_v19, %v2435_v38  ;;  %v2678_v50 = vrot.slane %v2408_v31, 5  ;;  %v2682_v45 = vrot.slane %v2410_v63, 5  ;;  %v2454_v54 = vrot.slane %v2452_v18, 4  ;;  %v2415_v31 = vld [vmem:[#allocation2 + $0x28] sm:$0xf]  ;;  %3171 = vmatpush.bf16.msrb.mxu2 %v4381_v58 }
 0x2c5   : > { %2922 = vmatpush.bf16.msra.mxu1 %v4377_v61  ;;  %v2551_v40 = vunpack.c.l.b16 %v2436_v9  ;;  %v2457_v22 = vrot.slane %v2455_v53, 5  ;;  %v2471_v1 = vrot.slane %v2469_v29, 5  ;;  %v2461_v47 = vshll.u32 %v2412_v49, 16  ;;  %v4373_v18 = vld [vmem:[%s6395_s2 + $0x198] sm:$0xff]  ;;  %v4380_v53 = vld [vmem:[%s6395_s2 + $0x1d0] sm:$0xff] }
 0x2c6   : > { %v2679_v27 = vsel %vm6042_vm2, %v4113_v5, %v2678_v50  ;;  %v2683_v7 = vsel %vm6042_vm2, %v4114_v20, %v2682_v45  ;;  %v2475_v2 = vshll.u32 %v2414_v34, 16  ;;  %v2480_v60 = vshrl.u32 %v2415_v31, 16  ;;  %3344 = vmatpush.bf16.msra.mxu3 %v4389_v62  ;;  %v2416_v29 = vld [vmem:[#allocation2 + $0x2c] sm:$0x1]  ;;  %v2418_v5 = vld [vmem:[#allocation2 + $0x34] sm:$0x1] }
 0x2c7   : > { %2087 = vmatmul.bf16.gmra.mxu2 %v3956_v59  ;;  %v2444_v59 = vor.u32 %v2443_v4, %v2440_v8  ;;  %v2458_v8 = vor.u32 %v2457_v22, %v2454_v54  ;;  %v2724_v4 = vunpack.c.l.b16 %v2679_v27  ;;  %v2725_v61 = vunpack.c.l.b16 %v2683_v7  ;;  %v2419_v56 = vld [vmem:[#allocation2 + $0x38] sm:$0xf]  ;;  %v2656_v27 = vld [vmem:[#allocation2 + $0x28] sm:$0xe]  ;;  %v2421_v7 = vld [vmem:[#allocation2 + $0x40] sm:$0xf] }
 0x2c8   : > { %v2463_v63 = vrot.slane %v2461_v47, 5  ;;  %v2477_v12 = vrot.slane %v2475_v2, 5  ;;  %v2497_v19 = vshll.u32 %v2417_v0, 16  ;;  %v2690_v38 = vrot.slane %v2414_v34, 5  ;;  %3172 = vmatpush.bf16.msrb.mxu2 %v4380_v53  ;;  %v2657_v34 = vld [vmem:[#allocation2 + $0x30] sm:$0xe] }
 0x2c9   : > { %2923 = vmatpush.bf16.msra.mxu1 %v4376_v37  ;;  %v2445_v44 = vrot.slane %v2444_v59, 4  ;;  %v2732_v15 = vpack.c.b16 %v2725_v61, %v2724_v4  ;;  %v2655_v59 = vld [vmem:[#allocation2 + $0x20] sm:$0xe]  ;;  %v4338_v37 = vld [vmem:[#allocation2 + $0xc] sm:$0xf0]  ;;  %v2489_v54 = vshll.u32 %v2416_v29, 16 }
 0x2ca   : > { %v4116_v10 = vrot.slane %v2655_v59, 9  ;;  %v4036_v24 = vor.u32 %v4338_v37, %v4035_v30  ;;  %v2499_v3 = vrot.slane %v2497_v19, 5  ;;  %v2503_v22 = vshll.u32 %v2418_v5, 16  ;;  %v4387_v4 = vld [vmem:[%s6395_s2 + $0x208] sm:$0xff]  ;;  %v4039_v61 = vld [vmem:[#allocation2 + $0x18] sm:$0xf] }
 0x2cb   : > { %v2450_v28 = vsel %vm6056_vm5, %v2445_v44, %v2449_v51  ;;  %v4115_v44 = vrot.slane %v2654_v43, 9  ;;  %v2482_v51 = vrot.slane %v2480_v60, 4  ;;  %v2508_v47 = vshrl.u32 %v2419_v56, 16  ;;  %v4378_v60 = vld [vmem:[%s6395_s2 + $0x1c0] sm:$0xff]  ;;  %v2420_v19 = vld [vmem:[#allocation2 + $0x3c] sm:$0x1] }
 0x2cc   : > { %v2552_v21 = vunpack.c.l.b16 %v2450_v28  ;;  %v2691_v28 = vsel %vm6042_vm2, %v4116_v10, %v2690_v38  ;;  %v2511_v39 = vshll.u32 %v2419_v56, 16  ;;  %v2698_v59 = vrot.slane %v2418_v5, 5  ;;  %v4370_v53 = vld [vmem:[%s6395_s2 + $0x180] sm:$0xff] }
 0x2cd   : > { %2255 = vmatmul.bf16.gmra.mxu3 %v2183_v33  ;;  %v1911_v33 = vunpack.c.l.b16 %v1887_v41  ;;  %2924 = vmatpush.bf16.msra.mxu1 %v4375_v6  ;;  %v2483_v41 = vshll.u32 %v2415_v31, 16  ;;  %v4118_v31 = vrot.slane %v2657_v34, 9  ;;  %v2510_v58 = vrot.slane %v2508_v47, 4  ;;  %v2659_v5 = vld [vmem:[#allocation2 + $0x40] sm:$0xe] }
 0x2ce   : > { %v2559_v16 = vpack.c.b16 %v2552_v21, %v2551_v40  ;;  %v4388_v40 = vld [vmem:[%s6395_s2 + $0x210] sm:$0xff]  ;;  %v2513_v62 = vrot.slane %v2511_v39, 5  ;;  %v2517_v38 = vshll.u32 %v2420_v19, 16 }
 0x2cf   : > { %v1915_v26 = vpack.c.b16 %v1911_v33, %v1910_v48  ;;  %v2686_v33 = vrot.slane %v2412_v49, 5  ;;  %v2485_v11 = vrot.slane %v2483_v41, 5  ;;  %v4372_v21 = vld [vmem:[%s6395_s2 + $0x190] sm:$0xff]  ;;  %3345 = vmatpush.bf16.msra.mxu3 %v4388_v40  ;;  %v2491_v49 = vrot.slane %v2489_v54, 5 }
 0x2d0   : > { %v2699_v41 = vsel %vm6042_vm2, %v4118_v31, %v2698_v59  ;;  %v2960_v39 = vld [vmem:[#allocation2 + $0x14] sm:$0x1]  ;;  %v2963_v59 = vld [vmem:[#allocation2 + $0x20] sm:$0xf] }
 0x2d1   : > { %2925 = vmatpush.bf16.msra.mxu1 %v4374_v42  ;;  %v2687_v9 = vsel %vm6042_vm2, %v4115_v44, %v2686_v33  ;;  %v2486_v50 = vor.u32 %v2485_v11, %v2482_v51  ;;  %v2422_v44 = vld [vmem:[#allocation2 + $0x44] sm:$0x1]  ;;  %v2985_v31 = vshll.u32 %v2960_v39, 16 }
 0x2d2   : > { %v2726_v20 = vunpack.c.l.b16 %v2687_v9  ;;  %v4386_v33 = vld [vmem:[%s6395_s2 + $0x200] sm:$0xff]  ;;  %v2531_v51 = vshll.u32 %v2422_v44, 16  ;;  %v2961_v9 = vld [vmem:[#allocation2 + $0x18] sm:$0xf] }
 0x2d3   : > { %3346 = vmatpush.bf16.msra.mxu3 %v4387_v4  ;;  %v2990_v54 = vshrl.u32 %v2961_v9, 16 }
 0x2d4   : > { %1986 = vmatmul.bf16.gmra.mxu1 %v1914_v46  ;;  %v2468_v46 = vrot.slane %v2466_v25, 4 }
 0x2d5   : > { %2926 = vmatpush.bf16.msra.mxu1 %v4373_v18  ;;  %v2959_v18 = vld [vmem:[#allocation2 + $0x10] sm:$0xf] }
 0x2d6   : > { %v2472_v23 = vor.u32 %v2471_v1, %v2468_v46  ;;  %v2487_v1 = vrot.slane %v2486_v50, 4  ;;  %v2976_v50 = vshrl.u32 %v2959_v18, 16 }
 0x2d7   : > { %2092 = vmatmul.bf16.gmra.mxu2 %v3960_v17  ;;  %v2459_v17 = vrot.slane %v2458_v8, 4  ;;  %v4379_v8 = vld [vmem:[%s6395_s2 + $0x1c8] sm:$0xff]  ;;  %3347 = vmatpush.bf16.msra.mxu3 %v4386_v33 }
 0x2d8   : > { %v2473_v55 = vrot.slane %v2472_v23, 4  ;;  %v4339_v23 = vld [vmem:[#allocation2 + $0x1c] sm:$0xf0]  ;;  %v2492_v42 = vsel %vm6056_vm5, %v2487_v1, %v2491_v49  ;;  %3173 = vmatpush.bf16.msrb.mxu2 %v4379_v8  ;;  %v4120_v1 = vrot.slane %v2659_v5, 9  ;;  %v2706_v49 = vrot.slane %v2422_v44, 5 }
 0x2d9   : > { %v2464_v14 = vsel %vm6056_vm5, %v2459_v17, %v2463_v63  ;;  %2927 = vmatpush.bf16.msra.mxu1 %v4372_v21  ;;  %v2522_v17 = vshrl.u32 %v2421_v7, 16  ;;  %v4040_v63 = vor.u32 %v4339_v23, %v4039_v61  ;;  %v2555_v43 = vunpack.c.l.b16 %v2492_v42  ;;  %v2962_v42 = vld [vmem:[#allocation2 + $0x1c] sm:$0x1] }
 0x2da   : > { %v2478_v35 = vsel %vm6056_vm5, %v2473_v55, %v2477_v12  ;;  %v2553_v32 = vunpack.c.l.b16 %v2464_v14  ;;  %v4117_v55 = vrot.slane %v2656_v27, 9  ;;  %v2694_v12 = vrot.slane %v2416_v29, 5  ;;  %v4371_v14 = vld [vmem:[%s6395_s2 + $0x188] sm:$0xff]  ;;  %v2658_v29 = vld [vmem:[#allocation2 + $0x38] sm:$0xe] }
 0x2db   : > { %v2554_v48 = vunpack.c.l.b16 %v2478_v35  ;;  %v2524_v30 = vrot.slane %v2522_v17, 4  ;;  %v2992_v8 = vrot.slane %v2990_v54, 4  ;;  %v2707_v23 = vsel %vm6042_vm2, %v4120_v1, %v2706_v49 }
 0x2dc   : > { %v2695_v35 = vsel %vm6042_vm2, %v4117_v55, %v2694_v12  ;;  %3174 = vmatpush.bf16.msrb.mxu2 %v4378_v60  ;;  %v2731_v17 = vunpack.c.l.b16 %v2707_v23  ;;  %v4047_v60 = vld [vmem:[#allocation2 + $0x38] sm:$0xf] }
 0x2dd   : > { %2260 = vmatmul.bf16.gmra.mxu3 %v2184_v57  ;;  %v2494_v57 = vshrl.u32 %v2417_v0, 16  ;;  %v2560_v25 = vpack.c.b16 %v2554_v48, %v2553_v32  ;;  %2928 = vmatpush.bf16.msra.mxu1 %v4371_v14  ;;  %v2728_v10 = vunpack.c.l.b16 %v2695_v35  ;;  %v2514_v32 = vor.u32 %v2513_v62, %v2510_v58  ;;  %v2965_v58 = vld [vmem:[#allocation2 + $0x28] sm:$0xf]  ;;  %v3205_v14 = vld [vmem:[#allocation2 + $0x18] sm:$0xe] }
 0x2de   : > { %v2987_v62 = vrot.slane %v2985_v31, 5  ;;  %v4341_v35 = vld [vmem:[#allocation2 + $0x3c] sm:$0xf0] }
 0x2df   : > { %v2496_v52 = vrot.slane %v2494_v57, 4  ;;  %v4048_v33 = vor.u32 %v4341_v35, %v4047_v60 }
 0x2e1   : > { %v2500_v45 = vor.u32 %v2499_v3, %v2496_v52  ;;  %v2515_v52 = vrot.slane %v2514_v32, 4  ;;  %2929 = vmatpush.bf16.msra.mxu1 %v4370_v53 }
 0x2e3   : > { %v2501_v6 = vrot.slane %v2500_v45, 4  ;;  %v2979_v45 = vshll.u32 %v2959_v18, 16 }
 0x2e4   : > { %1991 = vmatmul.bf16.gmra.mxu1 %v1915_v26  ;;  %v2727_v26 = vunpack.c.l.b16 %v2691_v28  ;;  %v2519_v28 = vrot.slane %v2517_v38, 5  ;;  %v3230_v38 = vrot.slane %v2960_v39, 5 }
 0x2e5   : > { %v2981_v34 = vrot.slane %v2979_v45, 5 }
 0x2e6   : > { %v2733_v46 = vpack.c.b16 %v2727_v26, %v2726_v20  ;;  %v4043_v20 = vld [vmem:[#allocation2 + $0x28] sm:$0xf]  ;;  %v4340_v26 = vld [vmem:[#allocation2 + $0x2c] sm:$0xf0]  ;;  %v2520_v40 = vsel %vm6056_vm5, %v2515_v52, %v2519_v28 }
 0x2e7   : > { %2623 = vmatmul.bf16.vlgmr.msra.gmra.mxu2 %v2559_v16  ;;  %v2505_v16 = vrot.slane %v2503_v22, 5  ;;  %v2993_v22 = vshll.u32 %v2961_v9, 16  ;;  %v2557_v56 = vunpack.c.l.b16 %v2520_v40 }
 0x2e9   : > { %v2506_v2 = vsel %vm6056_vm5, %v2501_v6, %v2505_v16  ;;  %v4044_v6 = vor.u32 %v4340_v26, %v4043_v20  ;;  %v2978_v16 = vrot.slane %v2976_v50, 4  ;;  %v2995_v4 = vrot.slane %v2993_v22, 5  ;;  %v2966_v20 = vld [vmem:[#allocation2 + $0x2c] sm:$0x1] }
 0x2ea   : > { %v2556_v0 = vunpack.c.l.b16 %v2506_v2  ;;  %v3027_v54 = vshll.u32 %v2966_v20, 16 }
 0x2eb   : > { %v2996_v55 = vor.u32 %v2995_v4, %v2992_v8  ;;  %v4155_v8 = vld [vmem:[#allocation2 + $0x10] sm:$0xf]  ;;  %v4366_v4 = vld [vmem:[#allocation2 + $0x14] sm:$0xf0] }
 0x2ec   : > { %v2561_v57 = vpack.c.b16 %v2556_v0, %v2555_v43  ;;  %v3029_v49 = vrot.slane %v3027_v54, 5  ;;  %v4367_v54 = vld [vmem:[#allocation2 + $0x24] sm:$0xf0] }
 0x2ed   : > { %2796 = vmatmul.bf16.vlgmr.msrb.gmra.mxu3 %v2732_v15  ;;  %v2525_v15 = vshll.u32 %v2421_v7, 16  ;;  %v2702_v7 = vrot.slane %v2420_v19, 5  ;;  %v2997_v12 = vrot.slane %v2996_v55, 4 }
 0x2ef   : > { %v2527_v37 = vrot.slane %v2525_v15, 5  ;;  %v2982_v15 = vor.u32 %v2981_v34, %v2978_v16  ;;  %v3206_v16 = vld [vmem:[#allocation2 + $0x20] sm:$0xe]  ;;  %v3207_v34 = vld [vmem:[#allocation2 + $0x28] sm:$0xe] }
 0x2f0   : > { %v4235_v55 = vrot.slane %v3206_v16, 9  ;;  %v4236_v31 = vrot.slane %v3207_v34, 9 }
 0x2f1   : > { %v2528_v48 = vor.u32 %v2527_v37, %v2524_v30  ;;  %v2983_v0 = vrot.slane %v2982_v15, 4  ;;  %v3204_v37 = vld [vmem:[#allocation2 + $0x10] sm:$0xe] }
 0x2f2   : > { %v4233_v32 = vrot.slane %v3204_v37, 9 }
 0x2f3   : > { %v2529_v3 = vrot.slane %v2528_v48, 4  ;;  %v2988_v19 = vsel %vm6056_vm5, %v2983_v0, %v2987_v62  ;;  %v4234_v48 = vrot.slane %v3205_v14, 9 }
 0x2f4   : > { %2378 = vmatmul.bf16.vlgmr.msrb.gmra.mxu1 %v4036_v24  ;;  %v2729_v24 = vunpack.c.l.b16 %v2699_v41  ;;  %v3004_v41 = vshrl.u32 %v2963_v59, 16  ;;  %v3231_v28 = vsel %vm6042_vm2, %v4233_v32, %v3230_v38 }
 0x2f5   : > { %v3276_v50 = vunpack.c.l.b16 %v3231_v28 }
 0x2f6   : > { %v2734_v11 = vpack.c.b16 %v2729_v24, %v2728_v10  ;;  %v3018_v10 = vshrl.u32 %v2965_v58, 16  ;;  %v3021_v24 = vshll.u32 %v2965_v58, 16  ;;  %v3242_v58 = vrot.slane %v2966_v20, 5  ;;  %v2971_v20 = vld [vmem:[#allocation2 + $0x40] sm:$0xf] }
 0x2f7   : > { %2628 = vmatmul.bf16.gmra.mxu2 %v2560_v25  ;;  %v2533_v25 = vrot.slane %v2531_v51, 5  ;;  %v3234_v51 = vrot.slane %v2962_v42, 5 }
 0x2f8   : > { %v3020_v53 = vrot.slane %v3018_v10, 4  ;;  %v3023_v9 = vrot.slane %v3021_v24, 5  ;;  %v2970_v10 = vld [vmem:[#allocation2 + $0x3c] sm:$0x1] }
 0x2f9   : > { %v2534_v21 = vsel %vm6056_vm5, %v2529_v3, %v2533_v25  ;;  %v3006_v3 = vrot.slane %v3004_v41, 4  ;;  %v3235_v25 = vsel %vm6042_vm2, %v4234_v48, %v3234_v51 }
 0x2fa   : > { %v2558_v27 = vunpack.c.l.b16 %v2534_v21  ;;  %v3277_v45 = vunpack.c.l.b16 %v3235_v25  ;;  %v3024_v40 = vor.u32 %v3023_v9, %v3020_v53 }
 0x2fc   : > { %v2562_v47 = vpack.c.b16 %v2558_v27, %v2557_v56  ;;  %v3284_v1 = vpack.c.b16 %v3277_v45, %v3276_v50  ;;  %v2967_v56 = vld [vmem:[#allocation2 + $0x30] sm:$0xf]  ;;  %v4159_v50 = vld [vmem:[#allocation2 + $0x20] sm:$0xf] }
 0x2fd   : > { %2801 = vmatmul.bf16.gmra.mxu3 %v2733_v46  ;;  %v4119_v46 = vrot.slane %v2658_v29, 9  ;;  %v2964_v29 = vld [vmem:[#allocation2 + $0x24] sm:$0x1]  ;;  %v3032_v23 = vshrl.u32 %v2967_v56, 16  ;;  %v3035_v39 = vshll.u32 %v2967_v56, 16 }
 0x2fe   : > { %v3013_v21 = vshll.u32 %v2964_v29, 16  ;;  %v3238_v0 = vrot.slane %v2964_v29, 5 }
 0x2ff   : > { %v2703_v61 = vsel %vm6042_vm2, %v4119_v46, %v2702_v7  ;;  %v2969_v7 = vld [vmem:[#allocation2 + $0x38] sm:$0xf]  ;;  %v3034_v62 = vrot.slane %v3032_v23, 4  ;;  %v3037_v14 = vrot.slane %v3035_v39, 5 }
 0x300   : > { %v2730_v2 = vunpack.c.l.b16 %v2703_v61  ;;  %v3015_v27 = vrot.slane %v3013_v21, 5  ;;  %v3239_v41 = vsel %vm6042_vm2, %v4235_v55, %v3238_v0 }
 0x301   : > { %v3278_v24 = vunpack.c.l.b16 %v3239_v41  ;;  %v3038_v48 = vor.u32 %v3037_v14, %v3034_v62 }
 0x302   : > { %v2735_v43 = vpack.c.b16 %v2731_v17, %v2730_v2  ;;  %v3049_v2 = vshll.u32 %v2969_v7, 16 }
 0x303   : > { %v3039_v25 = vrot.slane %v3038_v48, 4 }
 0x304   : > { %2383 = vmatmul.bf16.gmra.mxu1 %v4040_v63  ;;  %v2999_v63 = vshll.u32 %v2962_v42, 16  ;;  %v3046_v42 = vshrl.u32 %v2969_v7, 16  ;;  %v3051_v35 = vrot.slane %v3049_v2, 5 }
 0x306   : > { %v3001_v30 = vrot.slane %v2999_v63, 5  ;;  %v3048_v60 = vrot.slane %v3046_v42, 4 }
 0x307   : > { %2633 = vmatmul.bf16.gmra.mxu2 %v2561_v57  ;;  %v3007_v57 = vshll.u32 %v2963_v59, 16 }
 0x308   : > { %v3002_v44 = vsel %vm6056_vm5, %v2997_v12, %v3001_v30 }
 0x309   : > { %v3104_v52 = vunpack.c.l.b16 %v3002_v44  ;;  %v3009_v18 = vrot.slane %v3007_v57, 5  ;;  %v3243_v57 = vsel %vm6042_vm2, %v4236_v31, %v3242_v58  ;;  %v2968_v44 = vld [vmem:[#allocation2 + $0x34] sm:$0x1]  ;;  %v2974_v58 = vld [vmem:[#allocation2 + $0x4c] sm:$0x1] }
 0x30a   : > { %v3279_v32 = vunpack.c.l.b16 %v3243_v57  ;;  %v3083_v14 = vshll.u32 %v2974_v58, 16 }
 0x30b   : > { %v3010_v26 = vor.u32 %v3009_v18, %v3006_v3  ;;  %v3055_v3 = vshll.u32 %v2970_v10, 16  ;;  %v3208_v18 = vld [vmem:[#allocation2 + $0x30] sm:$0xe] }
 0x30c   : > { %v3285_v28 = vpack.c.b16 %v3279_v32, %v3278_v24  ;;  %v4237_v21 = vrot.slane %v3208_v18, 9  ;;  %v3085_v48 = vrot.slane %v3083_v14, 5 }
 0x30d   : > { %2806 = vmatmul.bf16.gmra.mxu3 %v2734_v11  ;;  %v3103_v11 = vunpack.c.l.b16 %v2988_v19  ;;  %v3011_v22 = vrot.slane %v3010_v26, 4  ;;  %v2973_v26 = vld [vmem:[#allocation2 + $0x48] sm:$0xf] }
 0x30e   : > { %v3074_v7 = vshrl.u32 %v2973_v26, 16 }
 0x30f   : > { %v3111_v5 = vpack.c.b16 %v3104_v52, %v3103_v11  ;;  %v3016_v61 = vsel %vm6056_vm5, %v3011_v22, %v3015_v27  ;;  %v3041_v52 = vshll.u32 %v2968_v44, 16  ;;  %v3246_v22 = vrot.slane %v2968_v44, 5 }
 0x310   : > { %v3105_v12 = vunpack.c.l.b16 %v3016_v61  ;;  %v4160_v61 = vor.u32 %v4367_v54, %v4159_v50  ;;  %v3076_v31 = vrot.slane %v3074_v7, 4 }
 0x311   : > { %v3043_v45 = vrot.slane %v3041_v52, 5  ;;  %v3247_v23 = vsel %vm6042_vm2, %v4237_v21, %v3246_v22  ;;  %v4368_v52 = vld [vmem:[#allocation2 + $0x34] sm:$0xf0] }
 0x312   : > { %v3280_v0 = vunpack.c.l.b16 %v3247_v23 }
 0x313   : > { %v3044_v56 = vsel %vm6056_vm5, %v3039_v25, %v3043_v45 }
 0x314   : > { %2388 = vmatmul.bf16.gmra.mxu1 %v4044_v6  ;;  %v3025_v6 = vrot.slane %v3024_v40, 4  ;;  %v3057_v40 = vrot.slane %v3055_v3, 5 }
 0x317   : > { %2638 = vmatmul.bf16.gmra.mxu2 %v2562_v47  ;;  %v3030_v47 = vsel %vm6056_vm5, %v3025_v6, %v3029_v49  ;;  %v3063_v6 = vshll.u32 %v2971_v20, 16  ;;  %v3077_v49 = vshll.u32 %v2973_v26, 16 }
 0x318   : > { %v3106_v59 = vunpack.c.l.b16 %v3030_v47  ;;  %v3107_v47 = vunpack.c.l.b16 %v3044_v56 }
 0x319   : > { %v3065_v55 = vrot.slane %v3063_v6, 5 }
 0x31a   : > { %v3112_v19 = vpack.c.b16 %v3106_v59, %v3105_v12  ;;  %v2972_v59 = vld [vmem:[#allocation2 + $0x44] sm:$0x1] }
 0x31b   : > { %v3069_v57 = vshll.u32 %v2972_v59, 16 }
 0x31d   : > { %2811 = vmatmul.bf16.gmra.mxu3 %v2735_v43  ;;  %v4156_v43 = vor.u32 %v4366_v4, %v4155_v8  ;;  %v3250_v8 = vrot.slane %v2970_v10, 5 }
 0x324   : > { %2393 = vmatmul.bf16.gmra.mxu1 %v4048_v33  ;;  %v3052_v33 = vor.u32 %v3051_v35, %v3048_v60 }
 0x326   : > { %v3053_v29 = vrot.slane %v3052_v33, 4  ;;  %v3071_v33 = vrot.slane %v3069_v57, 5 }
 0x327   : > { %3175 = vmatmul.bf16.vlgmr.msrb.gmra.mxu2 %v3111_v5  ;;  %v3209_v5 = vld [vmem:[#allocation2 + $0x38] sm:$0xe] }
 0x328   : > { %v3058_v27 = vsel %vm6056_vm5, %v3053_v29, %v3057_v40  ;;  %v3254_v40 = vrot.slane %v2972_v59, 5 }
 0x329   : > { %v3108_v39 = vunpack.c.l.b16 %v3058_v27 }
 0x32a   : > { %v2078_v46 = vpop.f32.mrf.mxu2 }
 0x32d   : > { %3348 = vmatmul.bf16.vlgmr.msra.gmra.mxu3 %v3284_v1  ;;  %v3060_v1 = vshrl.u32 %v2971_v20, 16 }
 0x32f   : > { %v3062_v2 = vrot.slane %v3060_v1, 4 }
 0x330   : > { %v2246_v15 = vpop.f32.mrf.mxu3 }
 0x331   : > { %v1977_v17 = vpop.f32.mrf.mxu1  ;;  %v3066_v62 = vor.u32 %v3065_v55, %v3062_v2 }
 0x332   : > { %v2079_v63 = vadd.f32 %v2078_v46, %v1977_v17  ;;  %v2080_v37 = vpop.f32.mrf.mxu2  ;;  %v4238_v46 = vrot.slane %v3209_v5, 9  ;;  %v3258_v5 = vrot.slane %v2974_v58, 5 }
 0x333   : > { %v3067_v24 = vrot.slane %v3066_v62, 4 }
 0x334   : > { %v6248_v30 = vadd.f32 %v2246_v15, %v2079_v63  ;;  %2930 = vmatmul.bf16.vlgmr.msra.gmra.mxu1 %v4156_v43  ;;  %v3251_v42 = vsel %vm6042_vm2, %v4238_v46, %v3250_v8  ;;  %v3079_v63 = vrot.slane %v3077_v49, 5  ;;  %v3113_v43 = vpack.c.b16 %v3108_v39, %v3107_v47  ;;  %v4167_v8 = vld [vmem:[#allocation2 + $0x40] sm:$0xf] }
 0x335   : > { %v3281_v12 = vunpack.c.l.b16 %v3251_v42  ;;  %v3072_v3 = vsel %vm6056_vm5, %v3067_v24, %v3071_v33 }
 0x336   : > { %v3109_v50 = vunpack.c.l.b16 %v3072_v3 }
 0x337   : > { %3180 = vmatmul.bf16.gmra.mxu2 %v3112_v19  ;;  %v3286_v19 = vpack.c.b16 %v3281_v12, %v3280_v0 }
 0x338   : > { %v2248_v51 = vpop.f32.mrf.mxu3 }
 0x339   : > { %v1979_v38 = vpop.f32.mrf.mxu1 }
 0x33a   : > { %v2081_v11 = vadd.f32 %v2080_v37, %v1979_v38  ;;  %v2083_v9 = vpop.f32.mrf.mxu2  ;;  %v3080_v37 = vor.u32 %v3079_v63, %v3076_v31  ;;  %v3210_v38 = vld [vmem:[#allocation2 + $0x40] sm:$0xe] }
 0x33b   : > { %v4239_v25 = vrot.slane %v3210_v38, 9 }
 0x33c   : > { %v6254_v53 = vadd.f32 %v2248_v51, %v2081_v11  ;;  %v3081_v32 = vrot.slane %v3080_v37, 4  ;;  %v3211_v51 = vld [vmem:[#allocation2 + $0x48] sm:$0xe]  ;;  %v4163_v11 = vld [vmem:[#allocation2 + $0x30] sm:$0xf] }
 0x33d   : > { %3353 = vmatmul.bf16.gmra.mxu3 %v3285_v28  ;;  %v4240_v29 = vrot.slane %v3211_v51, 9  ;;  %v4164_v26 = vor.u32 %v4368_v52, %v4163_v11  ;;  %v3255_v22 = vsel %vm6042_vm2, %v4239_v25, %v3254_v40 }
 0x33e   : > { %v3086_v18 = vsel %vm6056_vm5, %v3081_v32, %v3085_v48  ;;  %v3282_v1 = vunpack.c.l.b16 %v3255_v22 }
 0x33f   : > { %v3110_v45 = vunpack.c.l.b16 %v3086_v18  ;;  %v3259_v36 = vsel %vm6042_vm2, %v4240_v29, %v3258_v5 }
 0x340   : > { %v2251_v34 = vpop.f32.mrf.mxu3  ;;  %v3283_v6 = vunpack.c.l.b16 %v3259_v36 }
 0x341   : > { %v1982_v16 = vpop.f32.mrf.mxu1  ;;  %v3114_v46 = vpack.c.b16 %v3110_v45, %v3109_v50 }
 0x342   : > { %v2084_v4 = vadd.f32 %v2083_v9, %v1982_v16  ;;  %v2085_v15 = vpop.f32.mrf.mxu2 }
 0x344   : > { %v6264_v17 = vadd.f32 %v2251_v34, %v2084_v4  ;;  %2935 = vmatmul.bf16.gmra.mxu1 %v4160_v61  ;;  %v3287_v34 = vpack.c.b16 %v3283_v6, %v3282_v1  ;;  %v4369_v4 = vld [vmem:[#allocation2 + $0x44] sm:$0xf0] }
 0x345   : > { %v4168_v39 = vor.u32 %v4369_v4, %v4167_v8 }
 0x347   : > { %3185 = vmatmul.bf16.gmra.mxu2 %v3113_v43 }
 0x348   : > { %v2253_v35 = vpop.f32.mrf.mxu3 }
 0x349   : > { %v1984_v60 = vpop.f32.mrf.mxu1 }
 0x34a   : > { %v2086_v41 = vadd.f32 %v2085_v15, %v1984_v60  ;;  %v2088_v10 = vpop.f32.mrf.mxu2 }
 0x34c   : > { %v6266_v44 = vadd.f32 %v2253_v35, %v2086_v41 }
 0x34d   : > { %3358 = vmatmul.bf16.gmra.mxu3 %v3286_v19 }
 0x350   : > { %v2256_v28 = vpop.f32.mrf.mxu3 }
 0x351   : > { %v1987_v9 = vpop.f32.mrf.mxu1 }
 0x352   : > { %v2089_v20 = vadd.f32 %v2088_v10, %v1987_v9  ;;  %v2090_v54 = vpop.f32.mrf.mxu2 }
 0x354   : > { %v2270_v21 = vadd.f32 %v2256_v28, %v2089_v20  ;;  %2940 = vmatmul.bf16.gmra.mxu1 %v4164_v26 }
 0x357   : > { %3190 = vmatmul.bf16.gmra.mxu2 %v3114_v46 }
 0x358   : > { %v2258_v27 = vpop.f32.mrf.mxu3 }
 0x359   : > { %v1989_v56 = vpop.f32.mrf.mxu1 }
 0x35a   : > { %v2091_v7 = vadd.f32 %v2090_v54, %v1989_v56  ;;  %v2093_v16 = vpop.f32.mrf.mxu2 }
 0x35c   : > { %v2271_v49 = vadd.f32 %v2258_v27, %v2091_v7 }
 0x35d   : > { %3363 = vmatmul.bf16.gmra.mxu3 %v3287_v34 }
 0x360   : > { %v2261_v23 = vpop.f32.mrf.mxu3 }
 0x361   : > { %v1992_v61 = vpop.f32.mrf.mxu1 }
 0x362   : > { %v2094_v47 = vadd.f32 %v2093_v16, %v1992_v61  ;;  %v2095_v13 = vpop.f32.mrf.mxu2 }
 0x364   : > { %v2272_v42 = vadd.f32 %v2261_v23, %v2094_v47  ;;  %2945 = vmatmul.bf16.gmra.mxu1 %v4168_v39 }
 0x368   : > { %v2263_v15 = vpop.f32.mrf.mxu3 }
 0x369   : > { %v1994_v2 = vpop.f32.mrf.mxu1 }
 0x36a   : > { %v2096_v55 = vadd.f32 %v2095_v13, %v1994_v2  ;;  %v2624_v63 = vpop.f32.mrf.mxu2 }
 0x36c   : > { %v6276_v31 = vadd.f32 %v2263_v15, %v2096_v55 }
 0x370   : > { %v2797_v0 = vpop.f32.mrf.mxu3 }
 0x371   : > { %v2379_v43 = vpop.f32.mrf.mxu1 }
 0x372   : > { %v2399_v12 = vadd.f32 %v2379_v43, %v6248_v30  ;;  %v2626_v58 = vpop.f32.mrf.mxu2 }
 0x374   : > { %v2644_v59 = vadd.f32 %v2624_v63, %v2399_v12 }
 0x376   : > { %v2817_v62 = vadd.f32 %v2797_v0, %v2644_v59 }
 0x378   : > { %v2799_v14 = vpop.f32.mrf.mxu3 }
 0x379   : > { %v2381_v37 = vpop.f32.mrf.mxu1 }
 0x37a   : > { %v2400_v60 = vadd.f32 %v2381_v37, %v6254_v53  ;;  %v2629_v41 = vpop.f32.mrf.mxu2 }
 0x37c   : > { %v2645_v35 = vadd.f32 %v2626_v58, %v2400_v60 }
 0x37e   : > { %v2818_v57 = vadd.f32 %v2799_v14, %v2645_v35 }
 0x380   : > { %v2802_v10 = vpop.f32.mrf.mxu3 }
 0x381   : > { %v2384_v19 = vpop.f32.mrf.mxu1 }
 0x382   : > { %v2401_v24 = vadd.f32 %v2384_v19, %v6264_v17  ;;  %v2631_v48 = vpop.f32.mrf.mxu2 }
 0x384   : > { %v2646_v32 = vadd.f32 %v2629_v41, %v2401_v24 }
 0x386   : > { %v2819_v33 = vadd.f32 %v2802_v10, %v2646_v32 }
 0x388   : > { %v2804_v51 = vpop.f32.mrf.mxu3 }
 0x389   : > { %v2386_v38 = vpop.f32.mrf.mxu1 }
 0x38a   : > { %v2402_v30 = vadd.f32 %v2386_v38, %v6266_v44  ;;  %v2634_v52 = vpop.f32.mrf.mxu2 }
 0x38c   : > { %v2647_v11 = vadd.f32 %v2631_v48, %v2402_v30 }
 0x38e   : > { %v2820_v3 = vadd.f32 %v2804_v51, %v2647_v11 }
 0x390   : > { %v2807_v9 = vpop.f32.mrf.mxu3 }
 0x391   : > { %v2389_v18 = vpop.f32.mrf.mxu1 }
 0x392   : > { %v2403_v53 = vadd.f32 %v2389_v18, %v2270_v21  ;;  %v2636_v25 = vpop.f32.mrf.mxu2 }
 0x394   : > { %v2648_v28 = vadd.f32 %v2634_v52, %v2403_v53 }
 0x396   : > { %v2821_v29 = vadd.f32 %v2807_v9, %v2648_v28 }
 0x398   : > { %v2809_v20 = vpop.f32.mrf.mxu3 }
 0x399   : > { %v2391_v5 = vpop.f32.mrf.mxu1 }
 0x39a   : > { %v2404_v26 = vadd.f32 %v2391_v5, %v2271_v49  ;;  %v2639_v50 = vpop.f32.mrf.mxu2 }
 0x39c   : > { %v2649_v17 = vadd.f32 %v2636_v25, %v2404_v26 }
 0x39e   : > { %v2822_v45 = vadd.f32 %v2809_v20, %v2649_v17 }
 0x3a0   : > { %v2812_v54 = vpop.f32.mrf.mxu3 }
 0x3a1   : > { %v2394_v40 = vpop.f32.mrf.mxu1 }
 0x3a2   : > { %v2405_v22 = vadd.f32 %v2394_v40, %v2272_v42  ;;  %v2641_v44 = vpop.f32.mrf.mxu2 }
 0x3a4   : > { %v2650_v36 = vadd.f32 %v2639_v50, %v2405_v22 }
 0x3a6   : > { %v2823_v46 = vadd.f32 %v2812_v54, %v2650_v36 }
 0x3a8   : > { %v2814_v6 = vpop.f32.mrf.mxu3 }
 0x3a9   : > { %v2396_v1 = vpop.f32.mrf.mxu1 }
 0x3aa   : > { %v3176_v56 = vpop.f32.mrf.mxu2  ;;  %v2406_v11 = vadd.f32 %v2396_v1, %v6276_v31 }
 0x3ac   : > { %v2651_v28 = vadd.f32 %v2641_v44, %v2406_v11  ;;  %v3659_v11 = vld [vmem:[%s6400_s7 + $0x58] sm:$0xff] }
 0x3b0   : > { %v3349_v21 = vpop.f32.mrf.mxu3 }
 0x3b1   : > { %v2931_v27 = vpop.f32.mrf.mxu1 }
 0x3b2   : > { %v3178_v7 = vpop.f32.mrf.mxu2  ;;  %v2951_v16 = vadd.f32 %v2931_v27, %v2817_v62 }
 0x3b4   : > { %v3196_v4 = vadd.f32 %v3176_v56, %v2951_v16 }
 0x3b6   : > { %v3369_v47 = vadd.f32 %v3349_v21, %v3196_v4 }
 0x3b8   : > { %v3351_v8 = vpop.f32.mrf.mxu3 }
 0x3b9   : > { %v2933_v34 = vpop.f32.mrf.mxu1 }
 0x3ba   : > { %v2952_v49 = vadd.f32 %v2933_v34, %v2818_v57  ;;  %v3181_v23 = vpop.f32.mrf.mxu2 }
 0x3bc   : > { %v3197_v61 = vadd.f32 %v3178_v7, %v2952_v49 }
 0x3be   : > { %v3370_v39 = vadd.f32 %v3351_v8, %v3197_v61 }
 0x3c0   : > { %v3377_v13 = vadd.f32 %v3370_v39, %v3369_v47  ;;  %v3354_v2 = vpop.f32.mrf.mxu3 }
 0x3c1   : > { %v2936_v42 = vpop.f32.mrf.mxu1 }
 0x3c2   : > { %v2953_v15 = vadd.f32 %v2936_v42, %v2819_v33  ;;  %v3183_v63 = vpop.f32.mrf.mxu2 }
 0x3c4   : > { %v3198_v55 = vadd.f32 %v3181_v23, %v2953_v15 }
 0x3c6   : > { %v3371_v43 = vadd.f32 %v3354_v2, %v3198_v55 }
 0x3c8   : > { %v3378_v0 = vadd.f32 %v3377_v13, %v3371_v43  ;;  %v3356_v59 = vpop.f32.mrf.mxu3 }
 0x3c9   : > { %v2938_v12 = vpop.f32.mrf.mxu1 }
 0x3ca   : > { %v2954_v58 = vadd.f32 %v2938_v12, %v2820_v3  ;;  %v3186_v37 = vpop.f32.mrf.mxu2 }
 0x3cc   : > { %v3199_v62 = vadd.f32 %v3183_v63, %v2954_v58 }
 0x3ce   : > { %v3372_v14 = vadd.f32 %v3356_v59, %v3199_v62 }
 0x3d0   : > { %v3379_v60 = vadd.f32 %v3378_v0, %v3372_v14  ;;  %v3359_v41 = vpop.f32.mrf.mxu3 }
 0x3d1   : > { %v2941_v35 = vpop.f32.mrf.mxu1 }
 0x3d2   : > { %v2955_v57 = vadd.f32 %v2941_v35, %v2821_v29  ;;  %v3188_v24 = vpop.f32.mrf.mxu2  ;;  %v2824_v29 = vadd.f32 %v2814_v6, %v2651_v28 }
 0x3d4   : > { %v3200_v19 = vadd.f32 %v3186_v37, %v2955_v57 }
 0x3d6   : > { %v3373_v10 = vadd.f32 %v3359_v41, %v3200_v19 }
 0x3d8   : > { %v3380_v32 = vadd.f32 %v3379_v60, %v3373_v10  ;;  %v3361_v33 = vpop.f32.mrf.mxu3 }
 0x3d9   : > { %v2943_v48 = vpop.f32.mrf.mxu1 }
 0x3da   : > { %v2956_v38 = vadd.f32 %v2943_v48, %v2822_v45  ;;  %v3191_v3 = vpop.f32.mrf.mxu2 }
 0x3dc   : > { %v3201_v51 = vadd.f32 %v3188_v24, %v2956_v38  ;;  %v3663_v24 = vld [vmem:[%s6400_s7 + $0x78] sm:$0xff] }
 0x3dd   : > { %3665 = vmatpush.msrb.mxu1 %v3663_v24 }
 0x3de   : > { %v3374_v30 = vadd.f32 %v3361_v33, %v3201_v51  ;;  %v3661_v33 = vld [vmem:[%s6400_s7 + $0x68] sm:$0xff]  ;;  %v3660_v51 = vld [vmem:[%s6400_s7 + $0x60] sm:$0xff] }
 0x3e0   : > { %v3381_v52 = vadd.f32 %v3380_v32, %v3374_v30  ;;  %v3364_v53 = vpop.f32.mrf.mxu3  ;;  %v3662_v32 = vld [vmem:[%s6400_s7 + $0x70] sm:$0xff] }
 0x3e1   : > { %v2946_v18 = vpop.f32.mrf.mxu1  ;;  %3666 = vmatpush.msrb.mxu1 %v3662_v32 }
 0x3e2   : > { %v2957_v9 = vadd.f32 %v2946_v18, %v2823_v46  ;;  %v3193_v50 = vpop.f32.mrf.mxu2 }
 0x3e3   : > { %3667 = vmatpush.msrb.mxu1 %v3661_v33 }
 0x3e4   : > { %v3202_v25 = vadd.f32 %v3191_v3, %v2957_v9  ;;  %v3658_v3 = vld [vmem:[%s6400_s7 + $0x50] sm:$0xff]  ;;  %v4439_v9 = vld [vmem:[%s6397_s4] ss:$0 sm:$0xff] }
 0x3e5   : > { %3668 = vmatpush.msrb.mxu1 %v3660_v51 }
 0x3e6   : > { %v3375_v5 = vadd.f32 %v3364_v53, %v3202_v25  ;;  %v3657_v53 = vld [vmem:[%s6400_s7 + $0x48] sm:$0xff] }
 0x3e7   : > { %3669 = vmatpush.msrb.mxu1 %v3659_v11 }
 0x3e8   : > { %v3382_v20 = vadd.f32 %v3381_v52, %v3375_v5  ;;  %v3366_v54 = vpop.f32.mrf.mxu3 }
 0x3e9   : > { %v2948_v26 = vpop.f32.mrf.mxu1  ;;  %3670 = vmatpush.msrb.mxu1 %v3658_v3 }
 0x3ea   : > { %v2958_v17 = vadd.f32 %v2948_v26, %v2824_v29  ;;  %v4440_v26 = vld [vmem:[%s6399_s6] ss:$0 sm:$0xff] }
 0x3eb   : > { %3671 = vmatpush.msrb.mxu1 %v3657_v53  ;;  %v3648_v53 = vld [vmem:[%s6400_s7] sm:$0xff] }
 0x3ec   : > { %v3203_v40 = vadd.f32 %v3193_v50, %v2958_v17  ;;  %v3656_v17 = vld [vmem:[%s6400_s7 + $0x40] sm:$0xff] }
 0x3ed   : > { %3672 = vmatpush.msrb.mxu1 %v3656_v17 }
 0x3ee   : > { %v3376_v45 = vadd.f32 %v3366_v54, %v3203_v40 }
 0x3f0   : > { %v3383_v22 = vadd.f32 %v3382_v20, %v3376_v45 }
 0x3f2   : > { %v3384_v36 = vrot.slane %v3383_v22, 4 }
 0x3f4   : > { %v3385_v56 = vadd.f32 %v3384_v36, %v3383_v22 }
 0x3f6   : > { %v3386_v31 = vrot.slane %v3385_v56, 2 }
 0x3f8   : > { %v3387_v1 = vadd.f32 %v3386_v31, %v3385_v56 }
 0x3fa   : > { %v3388_v27 = vrot.slane %v3387_v1, 1 }
 0x3fc   : > { %v3389_v21 = vadd.f32 %v3388_v27, %v3387_v1  ;;  %v3655_v1 = vld [vmem:[%s6400_s7 + $0x38] sm:$0xff] }
 0x3fd   : > { %3673 = vmatpush.msrb.mxu1 %v3655_v1 }
 0x3fe   : > { %v3390_v46 = vmul.f32 0.015625, %v3389_v21 }
 0x400   : > { %v3391_v7 = vsub.f32 %v3369_v47, %v3390_v46  ;;  %v3392_v44 = vsub.f32 %v3370_v39, %v3390_v46  ;;  %v3393_v16 = vsub.f32 %v3371_v43, %v3390_v46  ;;  %v3394_v34 = vsub.f32 %v3372_v14, %v3390_v46 }
 0x401   : > { %v3395_v6 = vsub.f32 %v3373_v10, %v3390_v46  ;;  %v3396_v8 = vsub.f32 %v3374_v30, %v3390_v46  ;;  %v3397_v4 = vsub.f32 %v3375_v5, %v3390_v46  ;;  %v3398_v49 = vsub.f32 %v3376_v45, %v3390_v46 }
 0x402   : > { %v3399_v61 = vmul.f32 %v3391_v7, %v3391_v7  ;;  %v3400_v23 = vmul.f32 %v3392_v44, %v3392_v44  ;;  %v3401_v13 = vmul.f32 %v3393_v16, %v3393_v16  ;;  %v3402_v2 = vmul.f32 %v3394_v34, %v3394_v34 }
 0x403   : > { %v3403_v55 = vmul.f32 %v3395_v6, %v3395_v6  ;;  %v3404_v0 = vmul.f32 %v3396_v8, %v3396_v8  ;;  %v3405_v59 = vmul.f32 %v3397_v4, %v3397_v4  ;;  %v3406_v47 = vmul.f32 %v3398_v49, %v3398_v49 }
 0x404   : > { %v3407_v42 = vadd.f32 %v3400_v23, %v3399_v61 }
 0x406   : > { %v3408_v15 = vadd.f32 %v3407_v42, %v3401_v13 }
 0x408   : > { %v3409_v63 = vadd.f32 %v3408_v15, %v3402_v2 }
 0x40a   : > { %v3410_v12 = vadd.f32 %v3409_v63, %v3403_v55  ;;  %v3653_v55 = vld [vmem:[%s6400_s7 + $0x28] sm:$0xff] }
 0x40c   : > { %v3411_v58 = vadd.f32 %v3410_v12, %v3404_v0 }
 0x40e   : > { %v3412_v39 = vadd.f32 %v3411_v58, %v3405_v59 }
 0x410   : > { %v3413_v43 = vadd.f32 %v3412_v39, %v3406_v47  ;;  %v3652_v39 = vld [vmem:[%s6400_s7 + $0x20] sm:$0xff] }
 0x412   : > { %v3414_v62 = vrot.slane %v3413_v43, 4 }
 0x414   : > { %v3415_v37 = vadd.f32 %v3414_v62, %v3413_v43 }
 0x416   : > { %v3416_v14 = vrot.slane %v3415_v37, 2 }
 0x418   : > { %v3417_v60 = vadd.f32 %v3416_v14, %v3415_v37  ;;  %v3651_v37 = vld [vmem:[%s6400_s7 + $0x18] sm:$0xff] }
 0x41a   : > { %v3418_v35 = vrot.slane %v3417_v60, 1 }
 0x41c   : > { %v3419_v41 = vadd.f32 %v3418_v35, %v3417_v60 }
 0x41e   : > { %v3420_v57 = vmul.f32 0.015625, %v3419_v41 }
 0x420   : > { %v3421_v19 = vadd.f32 1e-05, %v3420_v57 }
 0x422   : > { %4443 = vrsqrt.f32 %v3421_v19  ;;  %vm3428_vm13 = vweird.f32 %v3421_v19 }
 0x428   : > { %v4444_v10 = vpop.eup %4443 }
 0x429   : > { %v3423_v48 = vmul.f32 %v4444_v10, %v3421_v19  ;;  %vm3429_vm12 = vweird.f32 %v4444_v10 }
 0x42a   : > { %vm3430_vm14 = vmor %vm3428_vm13, %vm3429_vm12 }
 0x42b   : > { %v3424_v38 = vmul.f32 %v4444_v10, %v3423_v48 }
 0x42d   : > { %v3425_v30 = vmul.f32 0.5, %v3424_v38 }
 0x42f   : > { %v3426_v52 = vsub.f32 1.5, %v3425_v30  ;;  %v3649_v30 = vld [vmem:[%s6400_s7 + $0x8] sm:$0xff] }
 0x431   : > { %v3427_v18 = vmul.f32 %v4444_v10, %v3426_v52 }
 0x433   : > { %v3431_v28 = vsel %vm3430_vm14, %v4444_v10, %v3427_v18  ;;  %v3650_v10 = vld [vmem:[%s6400_s7 + $0x10] sm:$0xff] }
 0x434   : > { %v3432_v25 = vmul.f32 %v3431_v28, %v3391_v7  ;;  %v3433_v5 = vmul.f32 %v3431_v28, %v3392_v44  ;;  %v3434_v29 = vmul.f32 %v3431_v28, %v3393_v16  ;;  %v3435_v20 = vmul.f32 %v3431_v28, %v3394_v34 }
 0x435   : > { %v3436_v50 = vmul.f32 %v3431_v28, %v3395_v6  ;;  %v3437_v40 = vmul.f32 %v3431_v28, %v3396_v8  ;;  %v3438_v54 = vmul.f32 %v3431_v28, %v3397_v4  ;;  %v3439_v45 = vmul.f32 %v3431_v28, %v3398_v49  ;;  %v3654_v8 = vld [vmem:[%s6400_s7 + $0x30] sm:$0xff] }
 0x436   : > { %v3444_v22 = vmul.f32 %v4439_v9, %v3432_v25  ;;  %v3445_v36 = vmul.f32 %v4439_v9, %v3433_v5  ;;  %v3446_v56 = vmul.f32 %v4439_v9, %v3434_v29  ;;  %v3447_v31 = vmul.f32 %v4439_v9, %v3435_v20  ;;  %3674 = vmatpush.msrb.mxu1 %v3654_v8 }
 0x437   : > { %v3448_v27 = vmul.f32 %v4439_v9, %v3436_v50  ;;  %v3449_v21 = vmul.f32 %v4439_v9, %v3437_v40  ;;  %v3450_v46 = vmul.f32 %v4439_v9, %v3438_v54  ;;  %v3451_v7 = vmul.f32 %v4439_v9, %v3439_v45 }
 0x438   : > { %v3456_v44 = vadd.f32 %v4440_v26, %v3444_v22  ;;  %v3457_v16 = vadd.f32 %v4440_v26, %v3445_v36  ;;  %v3458_v34 = vadd.f32 %v4440_v26, %v3446_v56  ;;  %v3459_v6 = vadd.f32 %v4440_v26, %v3447_v31  ;;  %3675 = vmatpush.msrb.mxu1 %v3653_v55 }
 0x439   : > { %v3460_v4 = vadd.f32 %v4440_v26, %v3448_v27  ;;  %v3461_v49 = vadd.f32 %v4440_v26, %v3449_v21  ;;  %v3462_v61 = vadd.f32 %v4440_v26, %v3450_v46  ;;  %v3463_v23 = vadd.f32 %v4440_v26, %v3451_v7 }
 0x43a   : > { %v3464_v13 = vmax.f32 %v3456_v44, 0.0  ;;  %v3465_v42 = vmax.f32 %v3457_v16, 0.0  ;;  %v3466_v2 = vmax.f32 %v3458_v34, 0.0  ;;  %v3467_v15 = vmax.f32 %v3459_v6, 0.0  ;;  %3676 = vmatpush.msrb.mxu1 %v3652_v39 }
 0x43b   : > { %v3468_v63 = vmax.f32 %v3460_v4, 0.0  ;;  %v3469_v0 = vmax.f32 %v3461_v49, 0.0  ;;  %v3470_v12 = vmax.f32 %v3462_v61, 0.0  ;;  %v3471_v59 = vmax.f32 %v3463_v23, 0.0 }
 0x43c   : > { %v3472_v58 = vadd.f32 %v3465_v42, %v3464_v13  ;;  %v6322_v47 = vadd.f32 %v3467_v15, %v3466_v2  ;;  %3677 = vmatpush.msrb.mxu1 %v3651_v37 }
 0x43d   : > { %v3474_v43 = vadd.f32 %v3469_v0, %v3468_v63  ;;  %v3475_v62 = vadd.f32 %v3471_v59, %v3470_v12 }
 0x43e   : > { %v3480_v48 = vrot.slane %v3472_v58, 2  ;;  %v3481_v11 = vrot.slane %v3472_v58, 4  ;;  %3678 = vmatpush.msrb.mxu1 %v3650_v10  ;;  %v3482_v18 = vrot.slane %v3472_v58, 6  ;;  %v3483_v28 = vrot.slane %v6322_v47, 2 }
 0x43f   : > { %v3486_v14 = vrot.slane %v3474_v43, 2  ;;  %v3487_v60 = vrot.slane %v3474_v43, 4  ;;  %v3489_v35 = vrot.slane %v3475_v62, 2  ;;  %v3490_v41 = vrot.slane %v3475_v62, 4 }
 0x440   : > { %v3491_v57 = vrot.slane %v3475_v62, 6  ;;  %v4281_v19 = vrot.slane %v3474_v43, 9  ;;  %v4285_v32 = vrot.slane %v3475_v62, 9  ;;  %v3484_v25 = vrot.slane %v6322_v47, 4  ;;  %3679 = vmatpush.msrb.mxu1 %v3649_v30 }
 0x441   : > { %v4282_v24 = vrot.slane %v3486_v14, 9  ;;  %v4283_v33 = vrot.slane %v3487_v60, 9  ;;  %v4286_v38 = vrot.slane %v3489_v35, 9  ;;  %v4287_v51 = vrot.slane %v3490_v41, 9 }
 0x442   : > { %v4288_v52 = vrot.slane %v3491_v57, 9  ;;  %v3560_v3 = vadd.f32 %v4281_v19, %v3474_v43  ;;  %v3485_v5 = vrot.slane %v6322_v47, 6  ;;  %v3488_v29 = vrot.slane %v3474_v43, 6  ;;  %3680 = vmatpush.msrb.mxu1 %v3648_v53 }
 0x443   : > { %v3561_v9 = vadd.f32 %v4282_v24, %v3486_v14  ;;  %v3564_v20 = vadd.f32 %v4285_v32, %v3475_v62  ;;  %v4273_v26 = vrot.slane %v3472_v58, 9  ;;  %v4274_v17 = vrot.slane %v3480_v48, 9 }
 0x444   : > { %v3562_v50 = vadd.f32 %v4283_v33, %v3487_v60  ;;  %v3565_v40 = vadd.f32 %v4286_v38, %v3489_v35  ;;  %v3566_v54 = vadd.f32 %v4287_v51, %v3490_v41  ;;  %v4275_v45 = vrot.slane %v3481_v11, 9 }
 0x445   : > { %v3567_v22 = vadd.f32 %v4288_v52, %v3491_v57  ;;  %v3576_v36 = vmul.f32 0.25, %v3560_v3  ;;  %v4276_v56 = vrot.slane %v3482_v18, 9  ;;  %v4277_v31 = vrot.slane %v6322_v47, 9 }
 0x446   : > { %v3577_v1 = vmul.f32 0.25, %v3561_v9  ;;  %v4278_v27 = vrot.slane %v3483_v28, 9  ;;  %v4279_v21 = vrot.slane %v3484_v25, 9  ;;  %v4280_v46 = vrot.slane %v3485_v5, 9 }
 0x447   : > { %v4284_v7 = vrot.slane %v3488_v29, 9  ;;  %v3552_v44 = vadd.f32 %v4273_v26, %v3472_v58  ;;  %v3553_v16 = vadd.f32 %v4274_v17, %v3480_v48  ;;  %v3554_v34 = vadd.f32 %v4275_v45, %v3481_v11 }
 0x448   : > { %v3580_v6 = vmul.f32 0.25, %v3564_v20  ;;  %v3555_v8 = vadd.f32 %v4276_v56, %v3482_v18  ;;  %v3556_v4 = vadd.f32 %v4277_v31, %v6322_v47  ;;  %v3557_v49 = vadd.f32 %v4278_v27, %v3483_v28 }
 0x449   : > { %v3558_v61 = vadd.f32 %v4279_v21, %v3484_v25  ;;  %v3563_v23 = vadd.f32 %v4284_v7, %v3488_v29  ;;  %v3568_v13 = vmul.f32 0.25, %v3552_v44  ;;  %v3569_v42 = vmul.f32 0.25, %v3553_v16 }
 0x44a   : > { %v3581_v2 = vmul.f32 0.25, %v3565_v40  ;;  %v3559_v15 = vadd.f32 %v4280_v46, %v3485_v5  ;;  %v3570_v55 = vmul.f32 0.25, %v3554_v34  ;;  %v3571_v63 = vmul.f32 0.25, %v3555_v8  ;;  %v3664_v8 = vld [vmem:[%s6401_s8] sm:$0x1] }
 0x44b   : > { %v3582_v0 = vmul.f32 0.25, %v3566_v54  ;;  %v3609_v12 = vperm.slane %v3577_v1, 0  ;;  %v3578_v59 = vmul.f32 0.25, %v3562_v50  ;;  %v3579_v39 = vmul.f32 0.25, %v3563_v23 }
 0x44c   : > { %v3608_v58 = vperm.slane %v3576_v36, 0  ;;  %v3572_v43 = vmul.f32 0.25, %v3556_v4  ;;  %v3601_v62 = vperm.slane %v3569_v42, 0  ;;  %v3602_v37 = vperm.slane %v3570_v55, 0 }
 0x44d   : > { %v3612_v14 = vperm.slane %v3580_v6, 0  ;;  %v3573_v60 = vmul.f32 0.25, %v3557_v49  ;;  %v3574_v47 = vmul.f32 0.25, %v3558_v61  ;;  %v3600_v35 = vperm.slane %v3568_v13, 0 }
 0x44e   : > { %v3575_v41 = vmul.f32 0.25, %v3559_v15  ;;  %v3583_v57 = vmul.f32 0.25, %v3567_v22  ;;  %v3603_v19 = vperm.slane %v3571_v63, 0  ;;  %v3610_v10 = vperm.slane %v3578_v59, 0 }
 0x44f   : > { %v3611_v24 = vperm.slane %v3579_v39, 0  ;;  %v3617_v32 = vsel %vm3616_vm15, %v3601_v62, %v3600_v35  ;;  %v3624_v48 = vsel %vm3616_vm15, %v3609_v12, %v3608_v58  ;;  %v3604_v33 = vperm.slane %v3572_v43, 0 }
 0x450   : > { %v3618_v38 = vsel %vm1546_vm6, %v3602_v37, %v3617_v32  ;;  %v3625_v51 = vsel %vm1546_vm6, %v3610_v10, %v3624_v48  ;;  %v4512_v30 = vmov 16.0   ;;  %v3613_v11 = vperm.slane %v3581_v2, 0 }
 0x451   : > { %4445 = vrcp.f32 %v4512_v30  ;;  %v3605_v52 = vperm.slane %v3573_v60, 0  ;;  %v3619_v3 = vsel %vm1549_vm7, %v3603_v19, %v3618_v38  ;;  %v3626_v18 = vsel %vm1549_vm7, %v3611_v24, %v3625_v51 }
 0x452   : > { %v3614_v9 = vperm.slane %v3582_v0, 0  ;;  %v3606_v53 = vperm.slane %v3574_v47, 0  ;;  %v3620_v28 = vsel %vm1552_vm8, %v3604_v33, %v3619_v3  ;;  %v3627_v25 = vsel %vm1552_vm8, %v3612_v14, %v3626_v18 }
 0x453   : > { %v3607_v5 = vperm.slane %v3575_v41, 0  ;;  %v3615_v29 = vperm.slane %v3583_v57, 0  ;;  %v3621_v20 = vsel %vm1555_vm9, %v3605_v52, %v3620_v28  ;;  %v3628_v26 = vsel %vm1555_vm9, %v3613_v11, %v3627_v25 }
 0x454   : > { %v3622_v17 = vsel %vm1558_vm10, %v3606_v53, %v3621_v20  ;;  %v3629_v50 = vsel %vm1558_vm10, %v3614_v9, %v3628_v26  ;;  %vm3685_vm7 = vcmask 73728  }
 0x455   : > { %v3623_v40 = vsel %vm1561_vm11, %v3607_v5, %v3622_v17  ;;  %v3630_v54 = vsel %vm1561_vm11, %v3615_v29, %v3629_v50 }
 0x456   : > { %v3633_v22 = vadd.f32 %v3630_v54, %v3623_v40 }
 0x457   : > { %v4446_v45 = vpop.eup %4445 }
 0x458   : > { %v3641_v36 = vmul.f32 16.0, %v4446_v45  ;;  %v3634_v56 = vrot.slane %v3633_v22, 4  ;;  %vm3645_vm6 = vweird.f32 %v4446_v45 }
 0x45a   : > { %v3642_v31 = vsub.f32 1.0, %v3641_v36  ;;  %v3635_v1 = vadd.f32 %v3634_v56, %v3633_v22 }
 0x45c   : > { %v3643_v27 = vmul.f32 %v4446_v45, %v3642_v31  ;;  %v3636_v21 = vrot.slane %v3635_v1, 2 }
 0x45e   : > { %v3644_v46 = vadd.f32 %v4446_v45, %v3643_v27  ;;  %v3637_v7 = vadd.f32 %v3636_v21, %v3635_v1 }
 0x460   : > { %v3638_v44 = vrot.slane %v3637_v7, 1  ;;  %v3646_v16 = vsel %vm3645_vm6, %v4446_v45, %v3644_v46 }
 0x462   : > { %v3639_v34 = vadd.f32 %v3638_v44, %v3637_v7 }
 0x464   : > { %v3647_v6 = vmul.f32 %v3646_v16, %v3639_v34 }
 0x466   : > { %3681 = vmatmul.f32.vlgmr.msrb.gmra.mxu1 %v3647_v6 }
 0x4e3   : > { %v3682_v4 = vpop.f32.mrf.mxu1 }
 0x4e4   : > { %v3683_v49 = vadd.f32 %v3682_v4, %v3664_v8 }
 0x4e6   : > { %3686 = vst.msk [vmem:[%s324_s28] sm:$0x1] %vm3685_vm7, %v3683_v49 }
 0x4e7   : > { %4474 = shalt.err (!%p4471_p3)
}
 0x4e8   : > { %4396 = dma.vmem_to_hbm [thread:$0]  (%p4601_p5), %s3699_s29, 16, %s3701_s14, %s3688_s16  }
 0x4e9 PF: > { %p4402_p4 = scmp.ge.s32.totalorder %s4509_s12, 2  ;;  %s3712_s22 = sand.u32 1, %s4497_s30  }
 0x4ea   : > { %s3713_s27 = scalar_lea.sflag [#allocation4], %s3712_s22 }
 0x4eb   : > { %p4399_p7 = pnand %p4402_p4, %p4605_p6 }
 0x4ed   : > { %p4400_p8 = pneg %p4399_p7 }
 0x4ef   : > { %4492 = dma.done.wait (%p4400_p8), %s3713_s27, 16  }
 0x4f0   : > { %4494 = vsyncadd (%p4400_p8), %s3713_s27, 4294967280  ;;  %p19_p9 = scmp.ge.s32.totalorder %s4588_s15, 4   ;;  %s6575_s30 = smov %s4501_s10 }
 0x4f1   : > { %s6576_s10 = smov %s4505_s11  ;;  %s6577_s11 = smov %s4599_s18 }
 0x4f2   : > { %s6578_s12 = smov %s4588_s15  ;;  %21 = sbr.rel (!%p19_p9) target bundleno = 3 (0x3), region = 93 }
 0x4f7   :  { %3718 = vsyncpa [#allocation4], 1 }
 0x4f8   :  { %3720 = vsyncpa [#allocation4 + $0x1], 1 }

</bundles_post_ra>
